<compile_context>
chip_gen: v6e
topology: v6e:2x2x1
jax: 0.10.0
libtpu: 0.0.40
codegen_flags: <defaults>
</compile_context>

<pallas_src>
import jax
import jax.numpy as jnp
from jax import lax
from jax.experimental import pallas as pl
from jax.experimental.pallas import tpu as pltpu


SEQ_LEN = 29
IN_CH = 21
NUM_CLASSES = 2
LANE = 128


def _round_up(n, m):
    return (n + m - 1) // m * m


# ----------------------------------------------------------------------------
# One-time weight layout lowering (hoisted out of the forward path)
# ----------------------------------------------------------------------------
def _conv1d_as_dense(w, lin, stride, pad):
    """Lower Conv1d weights (Cout, Cin, K) to a dense (Lin*Cin, Lout*Cout) matrix.

    Row index = li*Cin + ci (length-major input features);
    col index = lo*Cout + o (length-major output features).
    Out-of-range taps (zero padding) contribute exactly 0.
    """
    cout, cin, k = w.shape
    lout = (lin + 2 * pad - k) // stride + 1
    lo = jnp.arange(lout)
    kk = jnp.arange(k)
    li_tap = lo[:, None] * stride - pad + kk[None, :]                  # (Lout, K)
    li = jnp.arange(lin)
    sel = (li_tap[:, :, None] == li[None, None, :]).astype(w.dtype)    # (Lout, K, Lin)
    # m4d[li, ci, lo, o] = sum_k sel[lo, k, li] * w[o, ci, k]
    m4d = jnp.einsum("Lkl,ock->lcLo", sel, w)                          # (Lin, Cin, Lout, Cout)
    return m4d.reshape(lin * cin, lout * cout), lout


def _pad2(m, rows, cols):
    return jnp.pad(m, ((0, rows - m.shape[0]), (0, cols - m.shape[1])))


def prepare_params(params):
    """PyTorch weights -> bf16, 128-lane-padded matmul-chain matrices (done once)."""
    f32 = jnp.float32
    m1, l1 = _conv1d_as_dense(params["w1"].astype(f32), SEQ_LEN, 1, 2)  # (609, 928)
    m2, l2 = _conv1d_as_dense(params["w2"].astype(f32), l1, 2, 2)       # (928, 480)
    m3, l3 = _conv1d_as_dense(params["w3"].astype(f32), l2, 2, 2)       # (480, 256)

    cout = params["w3"].shape[0]            # 32
    nfeat = l3 * cout                       # 256
    # PyTorch flattens (B, C, L) channel-major: torch feature j_t = o*L3 + lo,
    # our conv3 output feature j = lo*Cout + o.  Fold that permutation into lw1.
    j = jnp.arange(nfeat)
    torch_j = (j % cout) * l3 + (j // cout)
    m4 = params["lw1"].astype(f32)[:, torch_j].T                        # (256, 128)
    m5 = params["lw2"].astype(f32).T                                    # (128, 2)

    # Lane-dense (multiple-of-128) widths, zero-padded at prep time (free).
    d_in  = _round_up(SEQ_LEN * IN_CH, LANE)     # 609 -> 640
    d1    = _round_up(m1.shape[1], LANE)         # 928 -> 1024
    d2    = _round_up(m2.shape[1], LANE)         # 480 -> 512
    d3    = _round_up(m3.shape[1], LANE)         # 256 -> 256
    d4    = _round_up(m4.shape[1], LANE)         # 128 -> 128
    d_out = _round_up(m5.shape[1], LANE)         # 2   -> 128 (unmasked output store)

    def bias_row(b, width):
        # Padded bias entries must stay exactly zero (keeps padded lanes at 0).
        r = jnp.zeros((1, width), f32)
        return r.at[0, : b.shape[0]].set(b.astype(f32))

    bf16 = jnp.bfloat16
    # TODO(synk): on v7x the two big layers (m1, m2 ~= 87% of FLOPs) could be
    # fp8 weights with bf16 activations if accuracy permits; kept bf16 here.
    return {
        "m1": _pad2(m1, d_in, d1).astype(bf16),
        "bb1": bias_row(jnp.tile(params["b1"], l1), d1),
        "m2": _pad2(m2, d1, d2).astype(bf16),
        "bb2": bias_row(jnp.tile(params["b2"], l2), d2),
        "m3": _pad2(m3, d2, d3).astype(bf16),
        "bb3": bias_row(jnp.tile(params["b3"], l3), d3),
        "m4": _pad2(m4, d3, d4).astype(bf16),
        "bb4": bias_row(params["lb1"], d4),
        "m5": _pad2(m5, d4, d_out).astype(bf16),
        "bb5": bias_row(params["lb2"], d_out),
    }


# ----------------------------------------------------------------------------
# Fused Pallas kernel: whole network per batch tile (activations stay in VMEM)
# ----------------------------------------------------------------------------
def _kcrnet_kernel(x_ref, m1_ref, bb1_ref, m2_ref, bb2_ref, m3_ref, bb3_ref,
                   m4_ref, bb4_ref, m5_ref, bb5_ref, out_ref):
    def layer(h_bf16, m_ref, b_ref, relu=True):
        # bf16 operands feed the MXU; accumulate in f32; bias+ReLU in f32 (VPU).
        a = jnp.dot(h_bf16, m_ref[...], preferred_element_type=jnp.float32) + b_ref[...]
        return jnp.maximum(a, 0.0) if relu else a

    h = x_ref[...]                                                # (tb,  640) bf16
    h = layer(h, m1_ref, bb1_ref).astype(jnp.bfloat16)            # (tb, 1024)
    h = layer(h, m2_ref, bb2_ref).astype(jnp.bfloat16)            # (tb,  512)
    h = layer(h, m3_ref, bb3_ref).astype(jnp.bfloat16)            # (tb,  256)
    h = layer(h, m4_ref, bb4_ref).astype(jnp.bfloat16)            # (tb,  128)
    out_ref[...] = layer(h, m5_ref, bb5_ref, relu=False)          # (tb,  128) f32, lane-dense


def kcrnet_forward(x, prep, *, block_b=512):
    """x: (B, L=29, C=21) float32 -> logits (B, 2)."""
    B, L, C = x.shape
    nin = L * C
    d_in = prep["m1"].shape[0]      # 640 (lane-padded input width)
    nout = prep["m5"].shape[1]      # 128 (lane-padded logits width)

    # Batch tile: multiple of 16 (bf16 sublane packing), big enough to amortize
    # the ~0.35us/step grid overhead and MXU drains at the 5 layer boundaries,
    # but large batches are forced into >=2 grid steps so ("parallel",) can
    # shard across both v7x TensorCores.
    tb = _round_up(min(block_b, max(B, 1)), 16)
    if _round_up(B, tb) // tb < 2 and B >= 64:
        tb = _round_up(pl.cdiv(B, 2), 16)
    bpad = _round_up(B, tb)

    x2 = x.reshape(B, nin).astype(jnp.bfloat16)            # feature = l*C + c
    x2 = jnp.pad(x2, ((0, bpad - B), (0, d_in - nin)))     # zero rows/lanes

    ws = [prep["m1"], prep["bb1"], prep["m2"], prep["bb2"], prep["m3"], prep["bb3"],
          prep["m4"], prep["bb4"], prep["m5"], prep["bb5"]]
    # Constant index_map -> all weights (~2.6 MB bf16) stay VMEM-resident.
    w_specs = [pl.BlockSpec(w.shape, lambda i: (0, 0)) for w in ws]

    out = pl.pallas_call(
        _kcrnet_kernel,
        out_shape=jax.ShapeDtypeStruct((bpad, nout), jnp.float32),
        grid_spec=pltpu.PrefetchScalarGridSpec(
            num_scalar_prefetch=0,
            grid=(bpad // tb,),
            in_specs=[pl.BlockSpec((tb, d_in), lambda i: (i, 0))] + w_specs,
            out_specs=pl.BlockSpec((tb, nout), lambda i: (i, 0)),
        ),
        compiler_params=pltpu.CompilerParams(
            dimension_semantics=("parallel",),          # megacore / v7x 2-TC sharding
            vmem_limit_bytes=32 * 1024 * 1024,          # safe on v7x 64 MiB/TC, v5e/v6e
        ),
    )(x2, *ws)
    return out[:B, :NUM_CLASSES]


# ----------------------------------------------------------------------------
# Pure-JAX f32 reference (mirrors the PyTorch NCW forward exactly)
# ----------------------------------------------------------------------------
def kcrnet_reference(x, params):
    h = jnp.transpose(x, (0, 2, 1))  # (B, C, L)  == torch.permute(x, [0, 2, 1])
    for w, b, s in ((params["w1"], params["b1"], 1),
                    (params["w2"], params["b2"], 2),
                    (params["w3"], params["b3"], 2)):
        h = lax.conv_general_dilated(
            h, w, window_strides=(s,), padding=[(2, 2)],
            dimension_numbers=("NCW", "OIW", "NCW"))
        h = jax.nn.relu(h + b[None, :, None])
    h = h.reshape(h.shape[0], -1)                        # (B, 32*8) channel-major
    h = jax.nn.relu(h @ params["lw1"].T + params["lb1"])
    h = h @ params["lw2"].T + params["lb2"]
    return h


# ----------------------------------------------------------------------------
# Deterministic parameter init (PyTorch-shaped weights)
# ----------------------------------------------------------------------------
def init_params(key):
    ks = jax.random.split(key, 10)

    def unif(k, shape, fan_in):
        bound = 1.0 / jnp.sqrt(jnp.float32(fan_in))
        return jax.random.uniform(k, shape, jnp.float32, -bound, bound)

    return {
        "w1": unif(ks[0], (32, 21, 5), 21 * 5),
        "b1": unif(ks[1], (32,), 21 * 5),
        "w2": unif(ks[2], (32, 32, 5), 32 * 5),
        "b2": unif(ks[3], (32,), 32 * 5),
        "w3": unif(ks[4], (32, 32, 5), 32 * 5),
        "b3": unif(ks[5], (32,), 32 * 5),
        "lw1": unif(ks[6], (128, 256), 256),
        "lb1": unif(ks[7], (128,), 256),
        "lw2": unif(ks[8], (2, 128), 128),
        "lb2": unif(ks[9], (2,), 128),
    }


if __name__ == "__main__":
    key = jax.random.PRNGKey(0)
    k_param, k_x1, k_x2, k_x3 = jax.random.split(key, 4)
    params = init_params(k_param)
    prep = prepare_params(params)          # one-time hoisted weight layout prep

    fwd = jax.jit(kcrnet_forward, static_argnames=("block_b",))

    def check(x, **kw):
        out = jax.block_until_ready(fwd(x, prep, **kw))
        ref = jax.block_until_ready(kcrnet_reference(x, params))
        assert out.shape == ref.shape, (out.shape, ref.shape)
        # bf16 MXU path -> loosened tolerance vs. the f32 reference.
        assert jnp.allclose(out, ref, atol=5e-2, rtol=5e-2), (
            f"max abs diff = {jnp.max(jnp.abs(out - ref))}")

    # Kcr peptide window: seq_len=29, 21 channels, small batch=2.
    check(jax.random.normal(k_x1, (2, SEQ_LEN, IN_CH), jnp.float32))
    # Multiple batch tiles + ragged batch padding (grid of 3 steps).
    check(jax.random.normal(k_x2, (40, SEQ_LEN, IN_CH), jnp.float32), block_b=16)
    # Large-batch auto-split into >=2 grid steps (v7x dual-TC path).
    check(jax.random.normal(k_x3, (100, SEQ_LEN, IN_CH), jnp.float32))

    print("KERNEL_OK")
</pallas_src>

<mosaic_0001>
module attributes {stable_mosaic.version = 11 : i64} {
  func.func @_kcrnet_kernel(%arg0: i32, %arg1: memref<16x640xbf16, #tpu.memory_space<vmem>>, %arg2: memref<640x1024xbf16, #tpu.memory_space<vmem>>, %arg3: memref<1x1024xf32, #tpu.memory_space<vmem>>, %arg4: memref<1024x512xbf16, #tpu.memory_space<vmem>>, %arg5: memref<1x512xf32, #tpu.memory_space<vmem>>, %arg6: memref<512x256xbf16, #tpu.memory_space<vmem>>, %arg7: memref<1x256xf32, #tpu.memory_space<vmem>>, %arg8: memref<256x128xbf16, #tpu.memory_space<vmem>>, %arg9: memref<1x128xf32, #tpu.memory_space<vmem>>, %arg10: memref<128x128xbf16, #tpu.memory_space<vmem>>, %arg11: memref<1x128xf32, #tpu.memory_space<vmem>>, %arg12: memref<16x128xf32, #tpu.memory_space<vmem>>) attributes {dimension_semantics = [#tpu.dimension_semantics<parallel>], iteration_bounds = array<i64: 1>, scalar_prefetch = 0 : i64, scratch_operands = 0 : i64, tpu.core_type = #tpu.core_type<tc>, window_params = [{transform_indices = @transform_0, window_bounds = array<i64: 16, 640>}, {pipeline_mode = #tpu.pipeline_mode<synchronous>, transform_indices = @transform_1, window_bounds = array<i64: 640, 1024>}, {pipeline_mode = #tpu.pipeline_mode<synchronous>, transform_indices = @transform_2, window_bounds = array<i64: 1, 1024>}, {pipeline_mode = #tpu.pipeline_mode<synchronous>, transform_indices = @transform_3, window_bounds = array<i64: 1024, 512>}, {pipeline_mode = #tpu.pipeline_mode<synchronous>, transform_indices = @transform_4, window_bounds = array<i64: 1, 512>}, {pipeline_mode = #tpu.pipeline_mode<synchronous>, transform_indices = @transform_5, window_bounds = array<i64: 512, 256>}, {pipeline_mode = #tpu.pipeline_mode<synchronous>, transform_indices = @transform_6, window_bounds = array<i64: 1, 256>}, {pipeline_mode = #tpu.pipeline_mode<synchronous>, transform_indices = @transform_7, window_bounds = array<i64: 256, 128>}, {pipeline_mode = #tpu.pipeline_mode<synchronous>, transform_indices = @transform_8, window_bounds = array<i64: 1, 128>}, {pipeline_mode = #tpu.pipeline_mode<synchronous>, transform_indices = @transform_9, window_bounds = array<i64: 128, 128>}, {pipeline_mode = #tpu.pipeline_mode<synchronous>, transform_indices = @transform_10, window_bounds = array<i64: 1, 128>}, {transform_indices = @transform_11, window_bounds = array<i64: 16, 128>}]} {
    %c0 = arith.constant 0 : index
    %c0_0 = arith.constant 0 : index
    %0 = vector.load %arg1[%c0, %c0_0] : memref<16x640xbf16, #tpu.memory_space<vmem>>, vector<16x640xbf16>
    %c0_1 = arith.constant 0 : index
    %c0_2 = arith.constant 0 : index
    %1 = vector.load %arg2[%c0_1, %c0_2] : memref<640x1024xbf16, #tpu.memory_space<vmem>>, vector<640x1024xbf16>
    %cst = arith.constant dense<0.000000e+00> : vector<16x1024xf32>
    %2 = tpu.matmul %0, %1, %cst {dimension_numbers = #tpu.dot_dimension_numbers<[1], [0], [0], [1], [0, 0, 1, 1], [], []>} : vector<16x640xbf16>, vector<640x1024xbf16>, vector<16x1024xf32> -> vector<16x1024xf32>
    %c0_3 = arith.constant 0 : index
    %c0_4 = arith.constant 0 : index
    %3 = vector.load %arg3[%c0_3, %c0_4] : memref<1x1024xf32, #tpu.memory_space<vmem>>, vector<1x1024xf32>
    %4 = vector.broadcast %3 : vector<1x1024xf32> to vector<16x1024xf32>
    %5 = arith.addf %2, %4 : vector<16x1024xf32>
    %cst_5 = arith.constant 0.000000e+00 : f32
    %6 = vector.broadcast %cst_5 : f32 to vector<16x1024xf32>
    %7 = arith.maximumf %5, %6 : vector<16x1024xf32>
    %8 = arith.truncf %7 : vector<16x1024xf32> to vector<16x1024xbf16>
    %c0_6 = arith.constant 0 : index
    %c0_7 = arith.constant 0 : index
    %9 = vector.load %arg4[%c0_6, %c0_7] : memref<1024x512xbf16, #tpu.memory_space<vmem>>, vector<1024x512xbf16>
    %cst_8 = arith.constant dense<0.000000e+00> : vector<16x512xf32>
    %10 = tpu.matmul %8, %9, %cst_8 {dimension_numbers = #tpu.dot_dimension_numbers<[1], [0], [0], [1], [0, 0, 1, 1], [], []>} : vector<16x1024xbf16>, vector<1024x512xbf16>, vector<16x512xf32> -> vector<16x512xf32>
    %c0_9 = arith.constant 0 : index
    %c0_10 = arith.constant 0 : index
    %11 = vector.load %arg5[%c0_9, %c0_10] : memref<1x512xf32, #tpu.memory_space<vmem>>, vector<1x512xf32>
    %12 = vector.broadcast %11 : vector<1x512xf32> to vector<16x512xf32>
    %13 = arith.addf %10, %12 : vector<16x512xf32>
    %cst_11 = arith.constant 0.000000e+00 : f32
    %14 = vector.broadcast %cst_11 : f32 to vector<16x512xf32>
    %15 = arith.maximumf %13, %14 : vector<16x512xf32>
    %16 = arith.truncf %15 : vector<16x512xf32> to vector<16x512xbf16>
    %c0_12 = arith.constant 0 : index
    %c0_13 = arith.constant 0 : index
    %17 = vector.load %arg6[%c0_12, %c0_13] : memref<512x256xbf16, #tpu.memory_space<vmem>>, vector<512x256xbf16>
    %cst_14 = arith.constant dense<0.000000e+00> : vector<16x256xf32>
    %18 = tpu.matmul %16, %17, %cst_14 {dimension_numbers = #tpu.dot_dimension_numbers<[1], [0], [0], [1], [0, 0, 1, 1], [], []>} : vector<16x512xbf16>, vector<512x256xbf16>, vector<16x256xf32> -> vector<16x256xf32>
    %c0_15 = arith.constant 0 : index
    %c0_16 = arith.constant 0 : index
    %19 = vector.load %arg7[%c0_15, %c0_16] : memref<1x256xf32, #tpu.memory_space<vmem>>, vector<1x256xf32>
    %20 = vector.broadcast %19 : vector<1x256xf32> to vector<16x256xf32>
    %21 = arith.addf %18, %20 : vector<16x256xf32>
    %cst_17 = arith.constant 0.000000e+00 : f32
    %22 = vector.broadcast %cst_17 : f32 to vector<16x256xf32>
    %23 = arith.maximumf %21, %22 : vector<16x256xf32>
    %24 = arith.truncf %23 : vector<16x256xf32> to vector<16x256xbf16>
    %c0_18 = arith.constant 0 : index
    %c0_19 = arith.constant 0 : index
    %25 = vector.load %arg8[%c0_18, %c0_19] : memref<256x128xbf16, #tpu.memory_space<vmem>>, vector<256x128xbf16>
    %cst_20 = arith.constant dense<0.000000e+00> : vector<16x128xf32>
    %26 = tpu.matmul %24, %25, %cst_20 {dimension_numbers = #tpu.dot_dimension_numbers<[1], [0], [0], [1], [0, 0, 1, 1], [], []>} : vector<16x256xbf16>, vector<256x128xbf16>, vector<16x128xf32> -> vector<16x128xf32>
    %c0_21 = arith.constant 0 : index
    %c0_22 = arith.constant 0 : index
    %27 = vector.load %arg9[%c0_21, %c0_22] : memref<1x128xf32, #tpu.memory_space<vmem>>, vector<1x128xf32>
    %28 = vector.broadcast %27 : vector<1x128xf32> to vector<16x128xf32>
    %29 = arith.addf %26, %28 : vector<16x128xf32>
    %cst_23 = arith.constant 0.000000e+00 : f32
    %30 = vector.broadcast %cst_23 : f32 to vector<16x128xf32>
    %31 = arith.maximumf %29, %30 : vector<16x128xf32>
    %32 = arith.truncf %31 : vector<16x128xf32> to vector<16x128xbf16>
    %c0_24 = arith.constant 0 : index
    %c0_25 = arith.constant 0 : index
    %33 = vector.load %arg10[%c0_24, %c0_25] : memref<128x128xbf16, #tpu.memory_space<vmem>>, vector<128x128xbf16>
    %cst_26 = arith.constant dense<0.000000e+00> : vector<16x128xf32>
    %34 = tpu.matmul %32, %33, %cst_26 {dimension_numbers = #tpu.dot_dimension_numbers<[1], [0], [0], [1], [0, 0, 1, 1], [], []>} : vector<16x128xbf16>, vector<128x128xbf16>, vector<16x128xf32> -> vector<16x128xf32>
    %c0_27 = arith.constant 0 : index
    %c0_28 = arith.constant 0 : index
    %35 = vector.load %arg11[%c0_27, %c0_28] : memref<1x128xf32, #tpu.memory_space<vmem>>, vector<1x128xf32>
    %36 = vector.broadcast %35 : vector<1x128xf32> to vector<16x128xf32>
    %37 = arith.addf %34, %36 : vector<16x128xf32>
    %c0_29 = arith.constant 0 : index
    %c0_30 = arith.constant 0 : index
    %38 = vector.load %arg12[%c0_29, %c0_30] : memref<16x128xf32, #tpu.memory_space<vmem>>, vector<16x128xf32>
    tpu.vector_store %arg12[%c0_29, %c0_30], %37 {strides = array<i32>} : memref<16x128xf32, #tpu.memory_space<vmem>>, vector<16x128xf32>,
    return
  }
  func.func @transform_0(%arg0: i32) -> (i32, i32) {
    %c0_i32 = arith.constant 0 : i32
    %c0_i32_0 = arith.constant 0 : i32
    return %arg0, %c0_i32 : i32, i32
  }
  func.func @transform_1(%arg0: i32) -> (i32, i32) {
    %c0_i32 = arith.constant 0 : i32
    %c0_i32_0 = arith.constant 0 : i32
    %c0_i32_1 = arith.constant 0 : i32
    return %c0_i32, %c0_i32_0 : i32, i32
  }
  func.func @transform_2(%arg0: i32) -> (i32, i32) {
    %c0_i32 = arith.constant 0 : i32
    %c0_i32_0 = arith.constant 0 : i32
    %c0_i32_1 = arith.constant 0 : i32
    return %c0_i32, %c0_i32_0 : i32, i32
  }
  func.func @transform_3(%arg0: i32) -> (i32, i32) {
    %c0_i32 = arith.constant 0 : i32
    %c0_i32_0 = arith.constant 0 : i32
    %c0_i32_1 = arith.constant 0 : i32
    return %c0_i32, %c0_i32_0 : i32, i32
  }
  func.func @transform_4(%arg0: i32) -> (i32, i32) {
    %c0_i32 = arith.constant 0 : i32
    %c0_i32_0 = arith.constant 0 : i32
    %c0_i32_1 = arith.constant 0 : i32
    return %c0_i32, %c0_i32_0 : i32, i32
  }
  func.func @transform_5(%arg0: i32) -> (i32, i32) {
    %c0_i32 = arith.constant 0 : i32
    %c0_i32_0 = arith.constant 0 : i32
    %c0_i32_1 = arith.constant 0 : i32
    return %c0_i32, %c0_i32_0 : i32, i32
  }
  func.func @transform_6(%arg0: i32) -> (i32, i32) {
    %c0_i32 = arith.constant 0 : i32
    %c0_i32_0 = arith.constant 0 : i32
    %c0_i32_1 = arith.constant 0 : i32
    return %c0_i32, %c0_i32_0 : i32, i32
  }
  func.func @transform_7(%arg0: i32) -> (i32, i32) {
    %c0_i32 = arith.constant 0 : i32
    %c0_i32_0 = arith.constant 0 : i32
    %c0_i32_1 = arith.constant 0 : i32
    return %c0_i32, %c0_i32_0 : i32, i32
  }
  func.func @transform_8(%arg0: i32) -> (i32, i32) {
    %c0_i32 = arith.constant 0 : i32
    %c0_i32_0 = arith.constant 0 : i32
    %c0_i32_1 = arith.constant 0 : i32
    return %c0_i32, %c0_i32_0 : i32, i32
  }
  func.func @transform_9(%arg0: i32) -> (i32, i32) {
    %c0_i32 = arith.constant 0 : i32
    %c0_i32_0 = arith.constant 0 : i32
    %c0_i32_1 = arith.constant 0 : i32
    return %c0_i32, %c0_i32_0 : i32, i32
  }
  func.func @transform_10(%arg0: i32) -> (i32, i32) {
    %c0_i32 = arith.constant 0 : i32
    %c0_i32_0 = arith.constant 0 : i32
    %c0_i32_1 = arith.constant 0 : i32
    return %c0_i32, %c0_i32_0 : i32, i32
  }
  func.func @transform_11(%arg0: i32) -> (i32, i32) {
    %c0_i32 = arith.constant 0 : i32
    %c0_i32_0 = arith.constant 0 : i32
    return %arg0, %c0_i32 : i32, i32
  }
}

</mosaic_0001>

<bundles_post_ra>
// kernel: kcrnet_forward.1
= control target key start
LH: loop header
LB: loop body
LE: loop exit
PB: predicated region body
PF: predicated region fallthrough
CT: control target
= control target key end

     0   :  { %16 = vsyncpa [#allocation3], 0  ;;  %s7175_s0 = inlined_call_operand.vmem [shape: bf16[16,640], index: 0, kind: input, shape index: {}]   ;;  %s7176_s1 = inlined_call_operand.hbm [shape: bf16[640,1024], index: 1, kind: input, shape index: {}]   ;;  %s7177_s2 = inlined_call_operand.hbm [shape: f32[1,1024], index: 2, kind: input, shape index: {}]   ;;  %s7178_s3 = inlined_call_operand.hbm [shape: bf16[1024,512], index: 3, kind: input, shape index: {}]   ;;  %s7179_s4 = inlined_call_operand.hbm [shape: f32[1,512], index: 4, kind: input, shape index: {}]   ;;  %s7180_s5 = inlined_call_operand.hbm [shape: bf16[512,256], index: 5, kind: input, shape index: {}]   ;;  %s7181_s6 = inlined_call_operand.hbm [shape: f32[1,256], index: 6, kind: input, shape index: {}]   ;;  %s7182_s7 = inlined_call_operand.hbm [shape: bf16[256,128], index: 7, kind: input, shape index: {}]   ;;  %s7183_s8 = inlined_call_operand.hbm [shape: f32[1,128], index: 8, kind: input, shape index: {}]   ;;  %s7184_s9 = inlined_call_operand.hbm [shape: bf16[128,128], index: 9, kind: input, shape index: {}]   ;;  %s7185_s10 = inlined_call_operand.hbm [shape: f32[1,128], index: 10, kind: input, shape index: {}]   ;;  %s7186_s11 = inlined_call_operand.vmem [shape: f32[16,128], index: 11, kind: output, shape index: {}]  }
   0x1   :  { %17 = vsyncpa [#allocation5], 0 }
   0x2   :  { %18 = vsyncpa [#allocation8], 0 }
   0x3   :  { %19 = vsyncpa [#allocation11], 0 }
   0x4   :  { %20 = vsyncpa [#allocation14], 0 }
   0x5   :  { %21 = vsyncpa [#allocation17], 0  ;;  %s6876_s17 = smov [#allocation4]   ;;  %s6877_s19 = smov [#allocation7]  }
   0x6   :  { %s42_s18 = sshll.u32 %s6876_s17, 4  ;;  %s64_s20 = sshll.u32 %s6877_s19, 4  ;;  %s43_s18 = int_to_ptr.vmem [resolvable:$true] %s42_s18  ;;  %s65_s20 = int_to_ptr.vmem [resolvable:$true] %s64_s20 }
   0x7   :  { %s6672_s21 = scalar_lea.vmem %s43_s18, 128  ;;  %p6677_p1 = scmp.lt.s32.totalorder %s43_s18, %s43_s18 }
   0x8   :  { %p6673_p0 = scmp.ne.s32.totalorder %s43_s18, %s6672_s21  ;;  %p6678_p2 = scmp.lt.s32.totalorder %s6672_s21, %s6672_s21 }
   0xa   :  { %p6679_p3 = por %p6678_p2, %p6677_p1 }
   0xc   :  { %p6680_p4 = pnand %p6679_p3, %p6673_p0 }
   0xe   :  { %6683 = shalt.err (!%p6680_p4)
}
   0xf   :  { %45 = dma.hbm_to_vmem [thread:$0]  %s7177_s2, 128, %s43_s18, [#allocation5]  }
  0x10   :  { %s6692_s24 = scalar_lea.vmem %s65_s20, 64  ;;  %p6697_p6 = scmp.lt.s32.totalorder %s65_s20, %s65_s20 }
  0x11   :  { %p6693_p5 = scmp.ne.s32.totalorder %s65_s20, %s6692_s24  ;;  %p6698_p7 = scmp.lt.s32.totalorder %s6692_s24, %s6692_s24 }
  0x13   :  { %p6699_p8 = por %p6698_p7, %p6697_p6 }
  0x15   :  { %p6700_p9 = pnand %p6699_p8, %p6693_p5 }
  0x17   :  { %6703 = shalt.err (!%p6700_p9)
}
  0x18   :  { %67 = dma.hbm_to_vmem [thread:$0]  %s7179_s4, 64, %s65_s20, [#allocation8]  }
  0x19   :  { %s6878_s27 = smov [#allocation10]   ;;  %s6879_s29 = smov [#allocation13]  }
  0x1a   :  { %s86_s28 = sshll.u32 %s6878_s27, 4  ;;  %s108_s30 = sshll.u32 %s6879_s29, 4  ;;  %s87_s28 = int_to_ptr.vmem [resolvable:$true] %s86_s28  ;;  %s109_s30 = int_to_ptr.vmem [resolvable:$true] %s108_s30 }
  0x1b   :  { %s6712_s12 = scalar_lea.vmem %s87_s28, 32  ;;  %p6717_p11 = scmp.lt.s32.totalorder %s87_s28, %s87_s28 }
  0x1c   :  { %p6713_p10 = scmp.ne.s32.totalorder %s87_s28, %s6712_s12  ;;  %p6718_p12 = scmp.lt.s32.totalorder %s6712_s12, %s6712_s12 }
  0x1e   :  { %p6719_p13 = por %p6718_p12, %p6717_p11 }
  0x20   :  { %p6720_p0 = pnand %p6719_p13, %p6713_p10 }
  0x22   :  { %6723 = shalt.err (!%p6720_p0)
}
  0x23   :  { %89 = dma.hbm_to_vmem [thread:$0]  %s7181_s6, 32, %s87_s28, [#allocation11]  }
  0x24   :  { %s6732_s14 = scalar_lea.vmem %s109_s30, 16  ;;  %s6736_s4 = scalar_lea.vmem %s109_s30, 32 }
  0x25   :  { %p6733_p1 = scmp.ne.s32.totalorder %s109_s30, %s6732_s14  ;;  %p6737_p2 = scmp.lt.s32.totalorder %s109_s30, %s109_s30 }
  0x26   :  { %p6738_p3 = scmp.lt.s32.totalorder %s6736_s4, %s6732_s14 }
  0x28   :  { %p6739_p4 = por %p6738_p3, %p6737_p2 }
  0x2a   :  { %p6740_p5 = pnand %p6739_p4, %p6733_p1 }
  0x2c   :  { %6743 = shalt.err (!%p6740_p5)
}
  0x2d   :  { %111 = dma.hbm_to_vmem [thread:$0]  %s7183_s8, 16, %s109_s30, [#allocation14]  }
  0x2e   :  { %s6880_s17 = smov [#allocation2]  }
  0x2f   :  { %s29_s18 = sshll.u32 %s6880_s17, 4  ;;  %s30_s18 = int_to_ptr.vmem [resolvable:$true] %s29_s18 }
  0x30   :  { %s6752_s19 = scalar_lea.vmem %s30_s18, 40960  ;;  %p6757_p7 = scmp.lt.s32.totalorder %s30_s18, %s30_s18 }
  0x31   :  { %p6753_p6 = scmp.ne.s32.totalorder %s30_s18, %s6752_s19  ;;  %p6758_p8 = scmp.lt.s32.totalorder %s6752_s19, %s6752_s19 }
  0x33   :  { %p6759_p9 = por %p6758_p8, %p6757_p7 }
  0x35   :  { %p6760_p10 = pnand %p6759_p9, %p6753_p6 }
  0x37   :  { %6763 = shalt.err (!%p6760_p10)
}
  0x38   :  { %s6881_s6 = smov 512   ;;  %s6882_s20 = smov 32  }
  0x39   :  { %35 = dma.hbm_to_vmem [thread:$0]  %s7176_s1, 40960, %s30_s18, [#allocation3], %s6881_s6, %s6881_s6, %s6882_s20  }
  0x3a   :  { %s6883_s23 = smov [#allocation6]  }
  0x3b   :  { %s51_s24 = sshll.u32 %s6883_s23, 4  ;;  %s52_s24 = int_to_ptr.vmem [resolvable:$true] %s51_s24 }
  0x3c   :  { %s6772_s8 = scalar_lea.vmem %s52_s24, 32768  ;;  %p6777_p12 = scmp.lt.s32.totalorder %s52_s24, %s52_s24 }
  0x3d   :  { %p6773_p11 = scmp.ne.s32.totalorder %s52_s24, %s6772_s8  ;;  %p6778_p13 = scmp.lt.s32.totalorder %s6772_s8, %s6772_s8 }
  0x3f   :  { %p6779_p0 = por %p6778_p13, %p6777_p12 }
  0x41   :  { %p6780_p1 = pnand %p6779_p0, %p6773_p11 }
  0x43   :  { %6783 = shalt.err (!%p6780_p1)
}
  0x44   :  { %s6884_s25 = smov 256   ;;  %s6885_s26 = smov 16  }
  0x45   :  { %57 = dma.hbm_to_vmem [thread:$0]  %s7178_s3, 32768, %s52_s24, [#allocation5], %s6884_s25, %s6884_s25, %s6885_s26  }
  0x46   :  { %s6886_s29 = smov [#allocation9]  }
  0x47   :  { %s73_s30 = sshll.u32 %s6886_s29, 4  ;;  %s74_s30 = int_to_ptr.vmem [resolvable:$true] %s73_s30 }
  0x48   :  { %s6792_s1 = scalar_lea.vmem %s74_s30, 8192  ;;  %p6797_p3 = scmp.lt.s32.totalorder %s74_s30, %s74_s30 }
  0x49   :  { %p6793_p2 = scmp.ne.s32.totalorder %s74_s30, %s6792_s1  ;;  %p6798_p4 = scmp.lt.s32.totalorder %s6792_s1, %s6792_s1 }
  0x4b   :  { %p6799_p5 = por %p6798_p4, %p6797_p3 }
  0x4d   :  { %p6800_p6 = pnand %p6799_p5, %p6793_p2 }
  0x4f   :  { %6803 = shalt.err (!%p6800_p6)
}
  0x50   :  { %s6887_s12 = smov 128   ;;  %s6888_s2 = smov 8  }
  0x51   :  { %79 = dma.hbm_to_vmem [thread:$0]  %s7180_s5, 8192, %s74_s30, [#allocation8], %s6887_s12, %s6887_s12, %s6888_s2  }
  0x52   :  { %s6889_s4 = smov [#allocation12]  }
  0x53   :  { %s95_s15 = sshll.u32 %s6889_s4, 4  ;;  %s96_s15 = int_to_ptr.vmem [resolvable:$true] %s95_s15 }
  0x54   :  { %s6812_s3 = scalar_lea.vmem %s96_s15, 2048  ;;  %p6817_p8 = scmp.lt.s32.totalorder %s96_s15, %s96_s15 }
  0x55   :  { %p6813_p7 = scmp.ne.s32.totalorder %s96_s15, %s6812_s3  ;;  %p6818_p9 = scmp.lt.s32.totalorder %s6812_s3, %s6812_s3 }
  0x57   :  { %p6819_p10 = por %p6818_p9, %p6817_p8 }
  0x59   :  { %p6820_p11 = pnand %p6819_p10, %p6813_p7 }
  0x5b   :  { %6823 = shalt.err (!%p6820_p11)
}
  0x5c   :  { %s6890_s16 = smov 64   ;;  %s6891_s17 = smov 4  }
  0x5d   :  { %101 = dma.hbm_to_vmem [thread:$0]  %s7182_s7, 2048, %s96_s15, [#allocation11], %s6890_s16, %s6890_s16, %s6891_s17  }
  0x5e   :  { %s6892_s6 = smov [#allocation15]   ;;  %s6893_s21 = smov [#allocation16]  }
  0x5f   :  { %s117_s20 = sshll.u32 %s6892_s6, 4  ;;  %s130_s5 = sshll.u32 %s6893_s21, 4  ;;  %s118_s20 = int_to_ptr.vmem [resolvable:$true] %s117_s20  ;;  %s131_s5 = int_to_ptr.vmem [resolvable:$true] %s130_s5 }
  0x60   :  { %s6832_s22 = scalar_lea.vmem %s118_s20, 1024  ;;  %p6837_p13 = scmp.lt.s32.totalorder %s118_s20, %s118_s20 }
  0x61   :  { %p6833_p12 = scmp.ne.s32.totalorder %s118_s20, %s6832_s22  ;;  %p6838_p0 = scmp.lt.s32.totalorder %s6832_s22, %s6832_s22 }
  0x63   :  { %p6839_p1 = por %p6838_p0, %p6837_p13 }
  0x65   :  { %p6840_p2 = pnand %p6839_p1, %p6833_p12 }
  0x67   :  { %6843 = shalt.err (!%p6840_p2)
}
  0x68   :  { %123 = dma.hbm_to_vmem [thread:$0]  %s7184_s9, 1024, %s118_s20, [#allocation14], %s6890_s16, %s6890_s16, %s6891_s17  }
  0x69   :  { %s6852_s8 = scalar_lea.vmem %s131_s5, 16  ;;  %s6856_s7 = scalar_lea.vmem %s131_s5, 32 }
  0x6a   :  { %p6853_p3 = scmp.ne.s32.totalorder %s131_s5, %s6852_s8  ;;  %p6857_p4 = scmp.lt.s32.totalorder %s131_s5, %s131_s5 }
  0x6b   :  { %p6858_p5 = scmp.lt.s32.totalorder %s6856_s7, %s6852_s8 }
  0x6d   :  { %p6859_p6 = por %p6858_p5, %p6857_p4 }
  0x6f   :  { %p6860_p7 = pnand %p6859_p6, %p6853_p3 }
  0x71   :  { %6863 = shalt.err (!%p6860_p7)
}
  0x72   :  { %133 = dma.hbm_to_vmem [thread:$0]  %s7185_s10, 16, %s131_s5, [#allocation17]  }
  0x73   :  { %6864 = dma.done.wait [#allocation3], 40960  }
  0x74   :  { %6865 = vsyncadd [#allocation3], 4294926336 }
  0x75   :  { %6866 = dma.done.wait [#allocation5], 32896  }
  0x76   :  { %6867 = vsyncadd [#allocation5], 4294934400 }
  0x77   :  { %6868 = dma.done.wait [#allocation8], 8256  }
  0x78   :  { %6869 = vsyncadd [#allocation8], 4294959040 }
  0x79   :  { %6870 = dma.done.wait [#allocation11], 2080  }
  0x7a   :  { %6871 = vsyncadd [#allocation11], 4294965216 }
  0x7b   :  { %6872 = dma.done.wait [#allocation14], 1040  }
  0x7c   :  { %6873 = vsyncadd [#allocation14], 4294966256 }
  0x7d   :  { %6874 = dma.done.wait [#allocation17], 16  }
  0x7e   :  { %6875 = vsyncadd [#allocation17], 4294967280  ;;  %v227_v0 = vld [vmem:[#allocation2 + $0x1c0] sm:$0xff]  ;;  %vm6896_vm0 = vmmov 0  }
  0x7f   :  { %v231_v1 = vld [vmem:[#allocation2 + $0x1e0] sm:$0xff] }
  0x80   :  { %v355_v2 = vld [vmem:[#allocation2 + $0x5c0] sm:$0xff]  ;;  %v5466_v3 = vcombine.high %v227_v0, %v231_v1  ;;  %v5465_v5 = vcombine.low %v227_v0, %v231_v1 }
  0x81   :  { %v359_v4 = vld [vmem:[#allocation2 + $0x5e0] sm:$0xff] }
  0x82   :  { %v219_v6 = vld [vmem:[#allocation2 + $0x180] sm:$0xff]  ;;  %v5594_v8 = vcombine.high %v355_v2, %v359_v4  ;;  %v5593_v9 = vcombine.low %v355_v2, %v359_v4  ;;  %2159 = vmatprep.subr.bf16.mxu0 %v5466_v3 }
  0x83   :  { %v223_v7 = vld [vmem:[#allocation2 + $0x1a0] sm:$0xff]  ;;  %2160 = vmatpush1.bf16.msra.mxu0 %v5465_v5 }
  0x84   :  { %v5458_v10 = vcombine.high %v219_v6, %v223_v7  ;;  %v347_v11 = vld [vmem:[#allocation2 + $0x580] sm:$0xff]  ;;  %2202 = vmatprep.subr.bf16.mxu1 %v5594_v8  ;;  %v5457_v18 = vcombine.low %v219_v6, %v223_v7 }
  0x85   :  { %v351_v12 = vld [vmem:[#allocation2 + $0x5a0] sm:$0xff]  ;;  %2203 = vmatpush1.bf16.msra.mxu1 %v5593_v9 }
  0x86   :  { %v211_v13 = vld [vmem:[#allocation2 + $0x140] sm:$0xff]  ;;  %v5586_v14 = vcombine.high %v347_v11, %v351_v12  ;;  %2161 = vmatprep.subr.bf16.mxu0 %v5458_v10  ;;  %v5585_v19 = vcombine.low %v347_v11, %v351_v12 }
  0x87   :  { %v215_v15 = vld [vmem:[#allocation2 + $0x160] sm:$0xff]  ;;  %2162 = vmatpush1.bf16.msra.mxu0 %v5457_v18 }
  0x88   :  { %v339_v16 = vld [vmem:[#allocation2 + $0x540] sm:$0xff]  ;;  %v5450_v20 = vcombine.high %v211_v13, %v215_v15  ;;  %2204 = vmatprep.subr.bf16.mxu1 %v5586_v14  ;;  %v5449_v26 = vcombine.low %v211_v13, %v215_v15 }
  0x89   :  { %v343_v17 = vld [vmem:[#allocation2 + $0x560] sm:$0xff]  ;;  %2205 = vmatpush1.bf16.msra.mxu1 %v5585_v19 }
  0x8a   :  { %v5578_v21 = vcombine.high %v339_v16, %v343_v17  ;;  %v203_v22 = vld [vmem:[#allocation2 + $0x100] sm:$0xff]  ;;  %2163 = vmatprep.subr.bf16.mxu0 %v5450_v20  ;;  %v5577_v27 = vcombine.low %v339_v16, %v343_v17 }
  0x8b   :  { %v207_v23 = vld [vmem:[#allocation2 + $0x120] sm:$0xff]  ;;  %2164 = vmatpush1.bf16.msra.mxu0 %v5449_v26 }
  0x8c   :  { %v331_v24 = vld [vmem:[#allocation2 + $0x500] sm:$0xff]  ;;  %v5442_v28 = vcombine.high %v203_v22, %v207_v23  ;;  %2206 = vmatprep.subr.bf16.mxu1 %v5578_v21  ;;  %v5441_v34 = vcombine.low %v203_v22, %v207_v23 }
  0x8d   :  { %v335_v25 = vld [vmem:[#allocation2 + $0x520] sm:$0xff]  ;;  %2207 = vmatpush1.bf16.msra.mxu1 %v5577_v27 }
  0x8e   :  { %v5570_v29 = vcombine.high %v331_v24, %v335_v25  ;;  %v195_v30 = vld [vmem:[#allocation2 + $0xc0] sm:$0xff]  ;;  %2165 = vmatprep.subr.bf16.mxu0 %v5442_v28  ;;  %v5569_v35 = vcombine.low %v331_v24, %v335_v25 }
  0x8f   :  { %v199_v31 = vld [vmem:[#allocation2 + $0xe0] sm:$0xff]  ;;  %2166 = vmatpush1.bf16.msra.mxu0 %v5441_v34 }
  0x90   :  { %v323_v32 = vld [vmem:[#allocation2 + $0x4c0] sm:$0xff]  ;;  %v5434_v36 = vcombine.high %v195_v30, %v199_v31  ;;  %2208 = vmatprep.subr.bf16.mxu1 %v5570_v29  ;;  %v5433_v42 = vcombine.low %v195_v30, %v199_v31 }
  0x91   :  { %v327_v33 = vld [vmem:[#allocation2 + $0x4e0] sm:$0xff]  ;;  %2209 = vmatpush1.bf16.msra.mxu1 %v5569_v35 }
  0x92   :  { %v5562_v37 = vcombine.high %v323_v32, %v327_v33  ;;  %v187_v38 = vld [vmem:[#allocation2 + $0x80] sm:$0xff]  ;;  %2167 = vmatprep.subr.bf16.mxu0 %v5434_v36  ;;  %v5561_v43 = vcombine.low %v323_v32, %v327_v33 }
  0x93   :  { %v191_v39 = vld [vmem:[#allocation2 + $0xa0] sm:$0xff]  ;;  %2168 = vmatpush1.bf16.msra.mxu0 %v5433_v42 }
  0x94   :  { %v315_v40 = vld [vmem:[#allocation2 + $0x480] sm:$0xff]  ;;  %v5426_v44 = vcombine.high %v187_v38, %v191_v39  ;;  %2210 = vmatprep.subr.bf16.mxu1 %v5562_v37  ;;  %v5425_v50 = vcombine.low %v187_v38, %v191_v39 }
  0x95   :  { %v319_v41 = vld [vmem:[#allocation2 + $0x4a0] sm:$0xff]  ;;  %2211 = vmatpush1.bf16.msra.mxu1 %v5561_v43 }
  0x96   :  { %v5554_v45 = vcombine.high %v315_v40, %v319_v41  ;;  %v179_v46 = vld [vmem:[#allocation2 + $0x40] sm:$0xff]  ;;  %2169 = vmatprep.subr.bf16.mxu0 %v5426_v44  ;;  %v5553_v52 = vcombine.low %v315_v40, %v319_v41 }
  0x97   :  { %v183_v47 = vld [vmem:[#allocation2 + $0x60] sm:$0xff]  ;;  %2170 = vmatpush1.bf16.msra.mxu0 %v5425_v50 }
  0x98   :  { %v307_v48 = vld [vmem:[#allocation2 + $0x440] sm:$0xff]  ;;  %v5418_v53 = vcombine.high %v179_v46, %v183_v47  ;;  %2212 = vmatprep.subr.bf16.mxu1 %v5554_v45  ;;  %v5417_v60 = vcombine.low %v179_v46, %v183_v47 }
  0x99   :  { %v311_v49 = vld [vmem:[#allocation2 + $0x460] sm:$0xff]  ;;  %2213 = vmatpush1.bf16.msra.mxu1 %v5553_v52 }
  0x9a   :  { %v171_v51 = vld [vmem:[#allocation2] sm:$0xff]  ;;  %v5546_v55 = vcombine.high %v307_v48, %v311_v49  ;;  %2171 = vmatprep.subr.bf16.mxu0 %v5418_v53  ;;  %v5545_v61 = vcombine.low %v307_v48, %v311_v49 }
  0x9b   :  { %v175_v54 = vld [vmem:[#allocation2 + $0x20] sm:$0xff]  ;;  %2172 = vmatpush1.bf16.msra.mxu0 %v5417_v60 }
  0x9c   :  { %v6990_v56 = vld [vmem:[%s7175_s0 + $0x4] ss:$20 sps:$4 sm:$0xff]   ;;  %v6995_v59 = vld [vmem:[%s7175_s0 + $0xc] ss:$20 sps:$4 sm:$0xff]   ;;  %v5410_v62 = vcombine.high %v171_v51, %v175_v54  ;;  %2214 = vmatprep.subr.bf16.mxu1 %v5546_v55  ;;  %v5409_v4 = vcombine.low %v171_v51, %v175_v54 }
  0x9d   :  { %v299_v57 = vld [vmem:[#allocation2 + $0x400] sm:$0xff]  ;;  %2191 = vmatprep.mubr.bf16.mxu0 %v6990_v56  ;;  %2234 = vmatprep.mubr.bf16.mxu1 %v6995_v59 }
  0x9e   :  { %v303_v58 = vld [vmem:[#allocation2 + $0x420] sm:$0xff]  ;;  %2215 = vmatpush1.bf16.msra.mxu1 %v5545_v61  ;;  %2173 = vmatprep.subr.bf16.mxu0 %v5410_v62 }
  0x9f   :  { %v5538_v63 = vcombine.high %v299_v57, %v303_v58  ;;  %v291_v0 = vld [vmem:[#allocation2 + $0x3c0] sm:$0xff]  ;;  %v5537_v5 = vcombine.low %v299_v57, %v303_v58  ;;  %2174 = vmatpush1.bf16.msra.mxu0 %v5409_v4  ;;  %v228_v4 = vld [vmem:[#allocation2 + $0x1c8] sm:$0xff] }
  0xa0   :  { %v295_v1 = vld [vmem:[#allocation2 + $0x3e0] sm:$0xff] }
  0xa1   :  { %v419_v2 = vld [vmem:[#allocation2 + $0x7c0] sm:$0xff]  ;;  %v5530_v6 = vcombine.high %v291_v0, %v295_v1  ;;  %2216 = vmatprep.subr.bf16.mxu1 %v5538_v63  ;;  %v5529_v12 = vcombine.low %v291_v0, %v295_v1 }
  0xa2   :  { %v423_v3 = vld [vmem:[#allocation2 + $0x7e0] sm:$0xff]  ;;  %2217 = vmatpush1.bf16.msra.mxu1 %v5537_v5  ;;  %v232_v5 = vld [vmem:[#allocation2 + $0x1e8] sm:$0xff] }
  0xa3   :  { %v5658_v7 = vcombine.high %v419_v2, %v423_v3  ;;  %v283_v8 = vld [vmem:[#allocation2 + $0x380] sm:$0xff]  ;;  %2175 = vmatprep.subr.bf16.mxu0 %v5530_v6  ;;  %v5657_v13 = vcombine.low %v419_v2, %v423_v3 }
  0xa4   :  { %v287_v9 = vld [vmem:[#allocation2 + $0x3a0] sm:$0xff]  ;;  %2176 = vmatpush2.bf16.msra.mxu0 %v5529_v12 }
  0xa5   :  { %v411_v10 = vld [vmem:[#allocation2 + $0x780] sm:$0xff]  ;;  %v5522_v14 = vcombine.high %v283_v8, %v287_v9  ;;  %2218 = vmatprep.subr.bf16.mxu1 %v5658_v7  ;;  %v5521_v20 = vcombine.low %v283_v8, %v287_v9  ;;  %v5468_v9 = vcombine.high %v228_v4, %v232_v5 }
  0xa6   :  { %v415_v11 = vld [vmem:[#allocation2 + $0x7a0] sm:$0xff]  ;;  %2219 = vmatpush2.bf16.msra.mxu1 %v5657_v13  ;;  %v220_v13 = vld [vmem:[#allocation2 + $0x188] sm:$0xff] }
  0xa7   :  { %v5650_v15 = vcombine.high %v411_v10, %v415_v11  ;;  %v275_v16 = vld [vmem:[#allocation2 + $0x340] sm:$0xff]  ;;  %2177 = vmatprep.subr.bf16.mxu0 %v5522_v14  ;;  %v5649_v21 = vcombine.low %v411_v10, %v415_v11  ;;  %v224_v14 = vld [vmem:[#allocation2 + $0x1a8] sm:$0xff] }
  0xa8   :  { %v279_v17 = vld [vmem:[#allocation2 + $0x360] sm:$0xff]  ;;  %2178 = vmatpush2.bf16.msra.mxu0 %v5521_v20 }
  0xa9   :  { %v403_v18 = vld [vmem:[#allocation2 + $0x740] sm:$0xff]  ;;  %v5514_v22 = vcombine.high %v275_v16, %v279_v17  ;;  %2220 = vmatprep.subr.bf16.mxu1 %v5650_v15  ;;  %v5513_v28 = vcombine.low %v275_v16, %v279_v17  ;;  %v7007_v15 = vld [vmem:[%s7175_s0 + $0x8] ss:$20 sps:$4 sm:$0xff]   ;;  %v5467_v17 = vcombine.low %v228_v4, %v232_v5 }
  0xaa   :  { %v407_v19 = vld [vmem:[#allocation2 + $0x760] sm:$0xff]  ;;  %2221 = vmatpush2.bf16.msra.mxu1 %v5649_v21  ;;  %v292_v5 = vld [vmem:[#allocation2 + $0x3c8] sm:$0xff] }
  0xab   :  { %v5642_v23 = vcombine.high %v403_v18, %v407_v19  ;;  %v267_v24 = vld [vmem:[#allocation2 + $0x300] sm:$0xff]  ;;  %2179 = vmatprep.subr.bf16.mxu0 %v5514_v22  ;;  %v5641_v29 = vcombine.low %v403_v18, %v407_v19  ;;  %v5460_v19 = vcombine.high %v220_v13, %v224_v14  ;;  %v212_v22 = vld [vmem:[#allocation2 + $0x148] sm:$0xff] }
  0xac   :  { %v271_v25 = vld [vmem:[#allocation2 + $0x320] sm:$0xff]  ;;  %2180 = vmatpush2.bf16.msra.mxu0 %v5513_v28 }
  0xad   :  { %v395_v26 = vld [vmem:[#allocation2 + $0x700] sm:$0xff]  ;;  %v5506_v30 = vcombine.high %v267_v24, %v271_v25  ;;  %2222 = vmatprep.subr.bf16.mxu1 %v5642_v23  ;;  %v5505_v36 = vcombine.low %v267_v24, %v271_v25  ;;  %v216_v23 = vld [vmem:[#allocation2 + $0x168] sm:$0xff]  ;;  %v5459_v25 = vcombine.low %v220_v13, %v224_v14 }
  0xae   :  { %v399_v27 = vld [vmem:[#allocation2 + $0x720] sm:$0xff]  ;;  %2223 = vmatpush2.bf16.msra.mxu1 %v5641_v29  ;;  %v204_v29 = vld [vmem:[#allocation2 + $0x108] sm:$0xff] }
  0xaf   :  { %v5634_v31 = vcombine.high %v395_v26, %v399_v27  ;;  %v259_v32 = vld [vmem:[#allocation2 + $0x2c0] sm:$0xff]  ;;  %2181 = vmatprep.subr.bf16.mxu0 %v5506_v30  ;;  %v5633_v37 = vcombine.low %v395_v26, %v399_v27  ;;  %v5452_v30 = vcombine.high %v212_v22, %v216_v23 }
  0xb0   :  { %v263_v33 = vld [vmem:[#allocation2 + $0x2e0] sm:$0xff]  ;;  %2182 = vmatpush2.bf16.msra.mxu0 %v5505_v36 }
  0xb1   :  { %v387_v34 = vld [vmem:[#allocation2 + $0x6c0] sm:$0xff]  ;;  %v5498_v38 = vcombine.high %v259_v32, %v263_v33  ;;  %2224 = vmatprep.subr.bf16.mxu1 %v5634_v31  ;;  %v5497_v44 = vcombine.low %v259_v32, %v263_v33  ;;  %v208_v31 = vld [vmem:[#allocation2 + $0x128] sm:$0xff]  ;;  %v6894_v32 = vmov 0  }
  0xb2   :  { %v391_v35 = vld [vmem:[#allocation2 + $0x6e0] sm:$0xff]  ;;  %2225 = vmatpush2.bf16.msra.mxu1 %v5633_v37 }
  0xb3   :  { %v5626_v39 = vcombine.high %v387_v34, %v391_v35  ;;  %v251_v40 = vld [vmem:[#allocation2 + $0x280] sm:$0xff]  ;;  %2183 = vmatprep.subr.bf16.mxu0 %v5498_v38  ;;  %v5625_v45 = vcombine.low %v387_v34, %v391_v35  ;;  %v5451_v34 = vcombine.low %v212_v22, %v216_v23  ;;  %v196_v38 = vld [vmem:[#allocation2 + $0xc8] sm:$0xff] }
  0xb4   :  { %v255_v41 = vld [vmem:[#allocation2 + $0x2a0] sm:$0xff]  ;;  %2184 = vmatpush2.bf16.msra.mxu0 %v5497_v44 }
  0xb5   :  { %v379_v42 = vld [vmem:[#allocation2 + $0x680] sm:$0xff]  ;;  %v5490_v46 = vcombine.high %v251_v40, %v255_v41  ;;  %2226 = vmatprep.subr.bf16.mxu1 %v5626_v39  ;;  %v5489_v52 = vcombine.low %v251_v40, %v255_v41  ;;  %v5444_v39 = vcombine.high %v204_v29, %v208_v31  ;;  %v200_v40 = vld [vmem:[#allocation2 + $0xe8] sm:$0xff] }
  0xb6   :  { %v383_v43 = vld [vmem:[#allocation2 + $0x6a0] sm:$0xff]  ;;  %2227 = vmatpush2.bf16.msra.mxu1 %v5625_v45  ;;  %v188_v45 = vld [vmem:[#allocation2 + $0x88] sm:$0xff] }
  0xb7   :  { %v5618_v47 = vcombine.high %v379_v42, %v383_v43  ;;  %v243_v48 = vld [vmem:[#allocation2 + $0x240] sm:$0xff]  ;;  %2185 = vmatprep.subr.bf16.mxu0 %v5490_v46  ;;  %v5617_v53 = vcombine.low %v379_v42, %v383_v43  ;;  %v5443_v42 = vcombine.low %v204_v29, %v208_v31  ;;  %v5436_v46 = vcombine.high %v196_v38, %v200_v40 }
  0xb8   :  { %v247_v49 = vld [vmem:[#allocation2 + $0x260] sm:$0xff]  ;;  %2186 = vmatpush2.bf16.msra.mxu0 %v5489_v52 }
  0xb9   :  { %v371_v50 = vld [vmem:[#allocation2 + $0x640] sm:$0xff]  ;;  %v5482_v54 = vcombine.high %v243_v48, %v247_v49  ;;  %2228 = vmatprep.subr.bf16.mxu1 %v5618_v47  ;;  %v5481_v62 = vcombine.low %v243_v48, %v247_v49  ;;  %v192_v47 = vld [vmem:[#allocation2 + $0xa8] sm:$0xff]  ;;  %v5435_v49 = vcombine.low %v196_v38, %v200_v40 }
  0xba   :  { %v375_v51 = vld [vmem:[#allocation2 + $0x660] sm:$0xff]  ;;  %2229 = vmatpush2.bf16.msra.mxu1 %v5617_v53  ;;  %v180_v53 = vld [vmem:[#allocation2 + $0x48] sm:$0xff] }
  0xbb   :  { %v5610_v55 = vcombine.high %v371_v50, %v375_v51  ;;  %v235_v57 = vld [vmem:[#allocation2 + $0x200] sm:$0xff]  ;;  %2187 = vmatprep.subr.bf16.mxu0 %v5482_v54  ;;  %v5609_v63 = vcombine.low %v371_v50, %v375_v51  ;;  %v5428_v54 = vcombine.high %v188_v45, %v192_v47 }
  0xbc   :  { %v239_v58 = vld [vmem:[#allocation2 + $0x220] sm:$0xff]  ;;  %2188 = vmatpush2.bf16.msra.mxu0 %v5481_v62 }
  0xbd   :  { %v363_v60 = vld [vmem:[#allocation2 + $0x600] sm:$0xff]  ;;  %v5474_v0 = vcombine.high %v235_v57, %v239_v58  ;;  %2230 = vmatprep.subr.bf16.mxu1 %v5610_v55  ;;  %v5473_v6 = vcombine.low %v235_v57, %v239_v58  ;;  %v184_v55 = vld [vmem:[#allocation2 + $0x68] sm:$0xff]  ;;  %v5427_v58 = vcombine.low %v188_v45, %v192_v47 }
  0xbe   :  { %v367_v61 = vld [vmem:[#allocation2 + $0x620] sm:$0xff]  ;;  %2231 = vmatpush2.bf16.msra.mxu1 %v5609_v63  ;;  %v172_v63 = vld [vmem:[#allocation2 + $0x8] sm:$0xff] }
  0xbf   :  { %v5602_v1 = vcombine.high %v363_v60, %v367_v61  ;;  %v483_v2 = vld [vmem:[#allocation2 + $0x9c0] sm:$0xff]  ;;  %2189 = vmatprep.subr.bf16.mxu0 %v5474_v0  ;;  %v5601_v7 = vcombine.low %v363_v60, %v367_v61  ;;  %v5420_v0 = vcombine.high %v180_v53, %v184_v55  ;;  %v252_v47 = vld [vmem:[#allocation2 + $0x288] sm:$0xff] }
  0xc0   :  { %v487_v3 = vld [vmem:[#allocation2 + $0x9e0] sm:$0xff]  ;;  %2190 = vmatpush2.bf16.msra.mxu0 %v5473_v6  ;;  %v296_v6 = vld [vmem:[#allocation2 + $0x3e8] sm:$0xff] }
  0xc1   :  { %v5722_v8 = vcombine.high %v483_v2, %v487_v3  ;;  %2232 = vmatprep.subr.bf16.mxu1 %v5602_v1  ;;  %v475_v10 = vld [vmem:[#allocation2 + $0x980] sm:$0xff]  ;;  %v5721_v16 = vcombine.low %v483_v2, %v487_v3  ;;  %v176_v1 = vld [vmem:[#allocation2 + $0x28] sm:$0xff]  ;;  %v5419_v3 = vcombine.low %v180_v53, %v184_v55  ;;  %v5531_v22 = vcombine.low %v292_v5, %v296_v6 }
  0xc2   :  { %v479_v11 = vld [vmem:[#allocation2 + $0x9a0] sm:$0xff]  ;;  %2233 = vmatpush2.bf16.msra.mxu1 %v5601_v7  ;;  %v356_v7 = vld [vmem:[#allocation2 + $0x5c8] sm:$0xff] }
  0xc3   :  { %v7002_v12 = vld [vmem:[%s7175_s0] ss:$20 sps:$4 sm:$0xff]   ;;  %2245 = vmatprep.subr.bf16.mxu0 %v5722_v8  ;;  %v5714_v18 = vcombine.high %v475_v10, %v479_v11  ;;  %2288 = vmatprep.subr.bf16.mxu1 %v5468_v9  ;;  %v5713_v24 = vcombine.low %v475_v10, %v479_v11  ;;  %v5412_v8 = vcombine.high %v172_v63, %v176_v1  ;;  %v360_v9 = vld [vmem:[#allocation2 + $0x5e8] sm:$0xff]  ;;  %v7016_v13 = vld [vmem:[%s7175_s0 + $0x10] ss:$20 sps:$4 sm:$0xff]  }
  0xc4   :  { %v467_v20 = vld [vmem:[#allocation2 + $0x940] sm:$0xff]  ;;  %2192 = vmatmul.mubr.bf16.vlgmr.msra.gmra.mxu0 %v7002_v12  ;;  %v5411_v11 = vcombine.low %v172_v63, %v176_v1  ;;  %v5596_v14 = vcombine.high %v356_v7, %v360_v9  ;;  %v244_v55 = vld [vmem:[#allocation2 + $0x248] sm:$0xff] }
  0xc5   :  { %v471_v21 = vld [vmem:[#allocation2 + $0x960] sm:$0xff]  ;;  %2235 = vmatmul.mubr.bf16.vlgmr.msra.gmra.mxu1 %v7007_v15  ;;  %2246 = vmatpush1.bf16.msra.mxu0 %v5721_v16  ;;  %v284_v16 = vld [vmem:[#allocation2 + $0x388] sm:$0xff] }
  0xc6   :  { %2289 = vmatpush1.bf16.msra.mxu1 %v5467_v17  ;;  %2247 = vmatprep.subr.bf16.mxu0 %v5714_v18  ;;  %v5706_v26 = vcombine.high %v467_v20, %v471_v21  ;;  %v459_v27 = vld [vmem:[#allocation2 + $0x900] sm:$0xff]  ;;  %v5705_v33 = vcombine.low %v467_v20, %v471_v21  ;;  %v288_v17 = vld [vmem:[#allocation2 + $0x3a8] sm:$0xff]  ;;  %v5595_v21 = vcombine.low %v356_v7, %v360_v9 }
  0xc7   :  { %v463_v28 = vld [vmem:[#allocation2 + $0x920] sm:$0xff]  ;;  %2290 = vmatprep.subr.bf16.mxu1 %v5460_v19  ;;  %2277 = vmatprep.mubr.bf16.mxu0 %v6894_v32  ;;  %v348_v18 = vld [vmem:[#allocation2 + $0x588] sm:$0xff]  ;;  %v5532_v19 = vcombine.high %v292_v5, %v296_v6 }
  0xc8   :  { %2320 = vmatprep.mubr.bf16.mxu1 %v6990_v56  ;;  %v5698_v35 = vcombine.high %v459_v27, %v463_v28  ;;  %v451_v36 = vld [vmem:[#allocation2 + $0x8c0] sm:$0xff]  ;;  %v5697_v41 = vcombine.low %v459_v27, %v463_v28  ;;  %v352_v20 = vld [vmem:[#allocation2 + $0x5a8] sm:$0xff]  ;;  %v5524_v27 = vcombine.high %v284_v16, %v288_v17 }
  0xc9   :  { %2248 = vmatpush1.bf16.msra.mxu0 %v5713_v24  ;;  %v455_v37 = vld [vmem:[#allocation2 + $0x8e0] sm:$0xff]  ;;  %v5588_v23 = vcombine.high %v348_v18, %v352_v20  ;;  %v276_v24 = vld [vmem:[#allocation2 + $0x348] sm:$0xff]  ;;  %v5587_v29 = vcombine.low %v348_v18, %v352_v20 }
  0xca   :  { %2291 = vmatpush1.bf16.msra.mxu1 %v5459_v25  ;;  %2249 = vmatprep.subr.bf16.mxu0 %v5706_v26  ;;  %v5690_v43 = vcombine.high %v451_v36, %v455_v37  ;;  %v443_v44 = vld [vmem:[#allocation2 + $0x880] sm:$0xff]  ;;  %v5689_v48 = vcombine.low %v451_v36, %v455_v37  ;;  %v280_v25 = vld [vmem:[#allocation2 + $0x368] sm:$0xff] }
  0xcb   :  { %2292 = vmatprep.subr.bf16.mxu1 %v5452_v30  ;;  %v447_v56 = vld [vmem:[#allocation2 + $0x8a0] sm:$0xff]  ;;  %v340_v26 = vld [vmem:[#allocation2 + $0x548] sm:$0xff]  ;;  %v5523_v30 = vcombine.low %v284_v16, %v288_v17  ;;  %v5516_v36 = vcombine.high %v276_v24, %v280_v25 }
  0xcc   :  { %v5682_v50 = vcombine.high %v443_v44, %v447_v56  ;;  %v435_v51 = vld [vmem:[#allocation2 + $0x840] sm:$0xff]  ;;  %v5681_v57 = vcombine.low %v443_v44, %v447_v56  ;;  %v344_v28 = vld [vmem:[#allocation2 + $0x568] sm:$0xff] }
  0xcd   :  { %2250 = vmatpush1.bf16.msra.mxu0 %v5705_v33  ;;  %v439_v52 = vld [vmem:[#allocation2 + $0x860] sm:$0xff]  ;;  %v5580_v31 = vcombine.high %v340_v26, %v344_v28  ;;  %v268_v33 = vld [vmem:[#allocation2 + $0x308] sm:$0xff]  ;;  %v5579_v38 = vcombine.low %v340_v26, %v344_v28 }
  0xce   :  { %2293 = vmatpush1.bf16.msra.mxu1 %v5451_v34  ;;  %2251 = vmatprep.subr.bf16.mxu0 %v5698_v35  ;;  %v5674_v60 = vcombine.high %v435_v51, %v439_v52  ;;  %v427_v61 = vld [vmem:[#allocation2 + $0x800] sm:$0xff]  ;;  %v5673_v2 = vcombine.low %v435_v51, %v439_v52  ;;  %v272_v34 = vld [vmem:[#allocation2 + $0x328] sm:$0xff] }
  0xcf   :  { %2294 = vmatprep.subr.bf16.mxu1 %v5444_v39  ;;  %v431_v62 = vld [vmem:[#allocation2 + $0x820] sm:$0xff]  ;;  %v332_v35 = vld [vmem:[#allocation2 + $0x508] sm:$0xff]  ;;  %v5515_v39 = vcombine.low %v276_v24, %v280_v25  ;;  %v5507_v45 = vcombine.low %v268_v33, %v272_v34 }
  0xd0   :  { %v5666_v4 = vcombine.high %v427_v61, %v431_v62  ;;  %v5665_v10 = vcombine.low %v427_v61, %v431_v62  ;;  %v336_v37 = vld [vmem:[#allocation2 + $0x528] sm:$0xff] }
  0xd1   :  { %2252 = vmatpush1.bf16.msra.mxu0 %v5697_v41  ;;  %v5572_v40 = vcombine.high %v332_v35, %v336_v37  ;;  %v260_v41 = vld [vmem:[#allocation2 + $0x2c8] sm:$0xff]  ;;  %v5571_v56 = vcombine.low %v332_v35, %v336_v37 }
  0xd2   :  { %2295 = vmatpush1.bf16.msra.mxu1 %v5443_v42  ;;  %2253 = vmatprep.subr.bf16.mxu0 %v5690_v43  ;;  %v264_v42 = vld [vmem:[#allocation2 + $0x2e8] sm:$0xff] }
  0xd3   :  { %2296 = vmatprep.subr.bf16.mxu1 %v5436_v46  ;;  %v324_v43 = vld [vmem:[#allocation2 + $0x4c8] sm:$0xff]  ;;  %v5499_v53 = vcombine.low %v260_v41, %v264_v42 }
  0xd4   :  { %v328_v44 = vld [vmem:[#allocation2 + $0x4e8] sm:$0xff] }
  0xd5   :  { %2254 = vmatpush1.bf16.msra.mxu0 %v5689_v48  ;;  %v5564_v46 = vcombine.high %v324_v43, %v328_v44  ;;  %v256_v48 = vld [vmem:[#allocation2 + $0x2a8] sm:$0xff]  ;;  %v5563_v52 = vcombine.low %v324_v43, %v328_v44 }
  0xd6   :  { %2297 = vmatpush1.bf16.msra.mxu1 %v5435_v49  ;;  %2255 = vmatprep.subr.bf16.mxu0 %v5682_v50  ;;  %v316_v49 = vld [vmem:[#allocation2 + $0x488] sm:$0xff]  ;;  %v5500_v50 = vcombine.high %v260_v41, %v264_v42  ;;  %v5491_v63 = vcombine.low %v252_v47, %v256_v48 }
  0xd7   :  { %2298 = vmatprep.subr.bf16.mxu1 %v5428_v54  ;;  %v320_v51 = vld [vmem:[#allocation2 + $0x4a8] sm:$0xff] }
  0xd8   :  { %v5556_v54 = vcombine.high %v316_v49, %v320_v51  ;;  %v312_v61 = vld [vmem:[#allocation2 + $0x468] sm:$0xff]  ;;  %v5555_v62 = vcombine.low %v316_v49, %v320_v51 }
  0xd9   :  { %2256 = vmatpush1.bf16.msra.mxu0 %v5681_v57  ;;  %v248_v57 = vld [vmem:[#allocation2 + $0x268] sm:$0xff] }
  0xda   :  { %2299 = vmatpush1.bf16.msra.mxu1 %v5427_v58  ;;  %2257 = vmatprep.subr.bf16.mxu0 %v5674_v60  ;;  %v308_v58 = vld [vmem:[#allocation2 + $0x448] sm:$0xff]  ;;  %v5492_v60 = vcombine.high %v252_v47, %v256_v48  ;;  %v5483_v7 = vcombine.low %v244_v55, %v248_v57 }
  0xdb   :  { %2300 = vmatprep.subr.bf16.mxu1 %v5420_v0  ;;  %v5548_v0 = vcombine.high %v308_v58, %v312_v61  ;;  %v236_v1 = vld [vmem:[#allocation2 + $0x208] sm:$0xff]  ;;  %v5547_v6 = vcombine.low %v308_v58, %v312_v61 }
  0xdc   :  { %v304_v5 = vld [vmem:[#allocation2 + $0x428] sm:$0xff] }
  0xdd   :  { %2258 = vmatpush1.bf16.msra.mxu0 %v5673_v2  ;;  %v240_v2 = vld [vmem:[#allocation2 + $0x228] sm:$0xff] }
  0xde   :  { %2301 = vmatpush1.bf16.msra.mxu1 %v5419_v3  ;;  %2259 = vmatprep.subr.bf16.mxu0 %v5666_v4  ;;  %v300_v3 = vld [vmem:[#allocation2 + $0x408] sm:$0xff]  ;;  %v5484_v4 = vcombine.high %v244_v55, %v248_v57  ;;  %v5475_v18 = vcombine.low %v236_v1, %v240_v2 }
  0xdf   :  { %2302 = vmatprep.subr.bf16.mxu1 %v5412_v8  ;;  %v5540_v8 = vcombine.high %v300_v3, %v304_v5  ;;  %v420_v9 = vld [vmem:[#allocation2 + $0x7c8] sm:$0xff]  ;;  %v5539_v17 = vcombine.low %v300_v3, %v304_v5 }
  0xe0   :  { %v488_v16 = vld [vmem:[#allocation2 + $0x9e8] sm:$0xff] }
  0xe1   :  { %2260 = vmatpush1.bf16.msra.mxu0 %v5665_v10  ;;  %v424_v10 = vld [vmem:[#allocation2 + $0x7e8] sm:$0xff] }
  0xe2   :  { %2303 = vmatpush1.bf16.msra.mxu1 %v5411_v11  ;;  %2331 = vmatprep.subr.bf16.mxu0 %v5596_v14  ;;  %v484_v11 = vld [vmem:[#allocation2 + $0x9c8] sm:$0xff]  ;;  %v5476_v14 = vcombine.high %v236_v1, %v240_v2  ;;  %v5659_v25 = vcombine.low %v420_v9, %v424_v10 }
  0xe3   :  { %2304 = vmatprep.subr.bf16.mxu1 %v5532_v19  ;;  %v5660_v19 = vcombine.high %v420_v9, %v424_v10  ;;  %v412_v20 = vld [vmem:[#allocation2 + $0x788] sm:$0xff]  ;;  %v5723_v26 = vcombine.low %v484_v11, %v488_v16 }
  0xe4   :  { %2278 = vmatmul.mubr.bf16.vlgmr.msra.gmra.mxu0 %v7016_v13  ;;  %v480_v24 = vld [vmem:[#allocation2 + $0x9a8] sm:$0xff] }
  0xe5   :  { %2332 = vmatpush1.bf16.msra.mxu0 %v5595_v21  ;;  %2363 = vmatprep.mubr.bf16.mxu0 %v6995_v59  ;;  %v5508_v59 = vcombine.high %v268_v33, %v272_v34  ;;  %v416_v21 = vld [vmem:[#allocation2 + $0x7a8] sm:$0xff] }
  0xe6   :  { %2305 = vmatpush2.bf16.msra.mxu1 %v5531_v22  ;;  %2333 = vmatprep.subr.bf16.mxu0 %v5588_v23  ;;  %v476_v22 = vld [vmem:[#allocation2 + $0x988] sm:$0xff]  ;;  %v5724_v23 = vcombine.high %v484_v11, %v488_v16  ;;  %v5651_v34 = vcombine.low %v412_v20, %v416_v21  ;;  %v233_v16 = vld [vmem:[#allocation2 + $0x1f0] sm:$0xff] }
  0xe7   :  { %2306 = vmatprep.subr.bf16.mxu1 %v5524_v27  ;;  %v5652_v27 = vcombine.high %v412_v20, %v416_v21  ;;  %v404_v28 = vld [vmem:[#allocation2 + $0x748] sm:$0xff]  ;;  %v5715_v35 = vcombine.low %v476_v22, %v480_v24 }
  0xe8   :  { %v472_v33 = vld [vmem:[#allocation2 + $0x968] sm:$0xff] }
  0xe9   :  { %2334 = vmatpush1.bf16.msra.mxu0 %v5587_v29  ;;  %v408_v29 = vld [vmem:[#allocation2 + $0x768] sm:$0xff] }
  0xea   :  { %2307 = vmatpush2.bf16.msra.mxu1 %v5523_v30  ;;  %2335 = vmatprep.subr.bf16.mxu0 %v5580_v31  ;;  %v5716_v30 = vcombine.high %v476_v22, %v480_v24  ;;  %v468_v31 = vld [vmem:[#allocation2 + $0x948] sm:$0xff]  ;;  %v5643_v42 = vcombine.low %v404_v28, %v408_v29  ;;  %v225_v24 = vld [vmem:[#allocation2 + $0x1b0] sm:$0xff] }
  0xeb   :  { %2308 = vmatprep.subr.bf16.mxu1 %v5516_v36  ;;  %v5644_v36 = vcombine.high %v404_v28, %v408_v29  ;;  %v396_v37 = vld [vmem:[#allocation2 + $0x708] sm:$0xff]  ;;  %v5707_v43 = vcombine.low %v468_v31, %v472_v33 }
  0xec   :  { %v464_v41 = vld [vmem:[#allocation2 + $0x928] sm:$0xff] }
  0xed   :  { %2336 = vmatpush1.bf16.msra.mxu0 %v5579_v38  ;;  %v400_v38 = vld [vmem:[#allocation2 + $0x728] sm:$0xff] }
  0xee   :  { %2309 = vmatpush2.bf16.msra.mxu1 %v5515_v39  ;;  %2337 = vmatprep.subr.bf16.mxu0 %v5572_v40  ;;  %v460_v39 = vld [vmem:[#allocation2 + $0x908] sm:$0xff]  ;;  %v5708_v40 = vcombine.high %v468_v31, %v472_v33  ;;  %v5635_v47 = vcombine.low %v396_v37, %v400_v38  ;;  %v213_v31 = vld [vmem:[#allocation2 + $0x150] sm:$0xff] }
  0xef   :  { %2310 = vmatprep.subr.bf16.mxu1 %v5508_v59  ;;  %v388_v59 = vld [vmem:[#allocation2 + $0x6c8] sm:$0xff]  ;;  %v5699_v48 = vcombine.low %v460_v39, %v464_v41  ;;  %v217_v33 = vld [vmem:[#allocation2 + $0x170] sm:$0xff] }
  0xf0   :  { %v392_v44 = vld [vmem:[#allocation2 + $0x6e8] sm:$0xff] }
  0xf1   :  { %2338 = vmatpush1.bf16.msra.mxu0 %v5571_v56  ;;  %v452_v56 = vld [vmem:[#allocation2 + $0x8c8] sm:$0xff]  ;;  %v5628_v49 = vcombine.high %v388_v59, %v392_v44  ;;  %v5627_v55 = vcombine.low %v388_v59, %v392_v44  ;;  %v7027_v59 = vld [vmem:[%s7175_s0 + $0x4] ss:$20 sps:$4 sm:$0xff]  }
  0xf2   :  { %2311 = vmatpush2.bf16.msra.mxu1 %v5507_v45  ;;  %2339 = vmatprep.subr.bf16.mxu0 %v5564_v46  ;;  %v5700_v45 = vcombine.high %v460_v39, %v464_v41  ;;  %v456_v46 = vld [vmem:[#allocation2 + $0x8e8] sm:$0xff]  ;;  %v5454_v39 = vcombine.high %v213_v31, %v217_v33  ;;  %v209_v41 = vld [vmem:[#allocation2 + $0x130] sm:$0xff] }
  0xf3   :  { %2312 = vmatprep.subr.bf16.mxu1 %v5500_v50  ;;  %v380_v50 = vld [vmem:[#allocation2 + $0x688] sm:$0xff]  ;;  %v5691_v57 = vcombine.low %v452_v56, %v456_v46 }
  0xf4   :  { %v384_v51 = vld [vmem:[#allocation2 + $0x6a8] sm:$0xff] }
  0xf5   :  { %2340 = vmatpush1.bf16.msra.mxu0 %v5563_v52  ;;  %v444_v52 = vld [vmem:[#allocation2 + $0x888] sm:$0xff]  ;;  %v5620_v58 = vcombine.high %v380_v50, %v384_v51  ;;  %v5619_v1 = vcombine.low %v380_v50, %v384_v51 }
  0xf6   :  { %2313 = vmatpush2.bf16.msra.mxu1 %v5499_v53  ;;  %2341 = vmatprep.subr.bf16.mxu0 %v5556_v54  ;;  %v5692_v53 = vcombine.high %v452_v56, %v456_v46  ;;  %v448_v54 = vld [vmem:[#allocation2 + $0x8a8] sm:$0xff]  ;;  %v201_v46 = vld [vmem:[#allocation2 + $0xf0] sm:$0xff] }
  0xf7   :  { %2314 = vmatprep.subr.bf16.mxu1 %v5492_v60  ;;  %v372_v60 = vld [vmem:[#allocation2 + $0x648] sm:$0xff]  ;;  %v5683_v2 = vcombine.low %v444_v52, %v448_v54 }
  0xf8   :  { %v376_v61 = vld [vmem:[#allocation2 + $0x668] sm:$0xff] }
  0xf9   :  { %2342 = vmatpush1.bf16.msra.mxu0 %v5555_v62  ;;  %v436_v62 = vld [vmem:[#allocation2 + $0x848] sm:$0xff]  ;;  %v5612_v3 = vcombine.high %v372_v60, %v376_v61  ;;  %v5611_v9 = vcombine.low %v372_v60, %v376_v61 }
  0xfa   :  { %2315 = vmatpush2.bf16.msra.mxu1 %v5491_v63  ;;  %2343 = vmatprep.subr.bf16.mxu0 %v5548_v0  ;;  %v5684_v63 = vcombine.high %v444_v52, %v448_v54  ;;  %v440_v0 = vld [vmem:[#allocation2 + $0x868] sm:$0xff]  ;;  %v193_v54 = vld [vmem:[#allocation2 + $0xb0] sm:$0xff] }
  0xfb   :  { %2316 = vmatprep.subr.bf16.mxu1 %v5484_v4  ;;  %v364_v4 = vld [vmem:[#allocation2 + $0x608] sm:$0xff]  ;;  %v5675_v10 = vcombine.low %v436_v62, %v440_v0 }
  0xfc   :  { %v368_v5 = vld [vmem:[#allocation2 + $0x628] sm:$0xff] }
  0xfd   :  { %2344 = vmatpush1.bf16.msra.mxu0 %v5547_v6  ;;  %v428_v6 = vld [vmem:[#allocation2 + $0x808] sm:$0xff]  ;;  %v5604_v11 = vcombine.high %v364_v4, %v368_v5  ;;  %v5603_v20 = vcombine.low %v364_v4, %v368_v5 }
  0xfe   :  { %2317 = vmatpush2.bf16.msra.mxu1 %v5483_v7  ;;  %2345 = vmatprep.subr.bf16.mxu0 %v5540_v8  ;;  %v5676_v7 = vcombine.high %v436_v62, %v440_v0  ;;  %v432_v8 = vld [vmem:[#allocation2 + $0x828] sm:$0xff]  ;;  %v185_v0 = vld [vmem:[#allocation2 + $0x70] sm:$0xff] }
  0xff   :  { %2318 = vmatprep.subr.bf16.mxu1 %v5476_v14  ;;  %v229_v14 = vld [vmem:[#allocation2 + $0x1d0] sm:$0xff]  ;;  %v5667_v21 = vcombine.low %v428_v6, %v432_v8 }
 0x100   :  { %v5470_v22 = vcombine.high %v229_v14, %v233_v16  ;;  %v5469_v28 = vcombine.low %v229_v14, %v233_v16 }
 0x101   :  { %2346 = vmatpush1.bf16.msra.mxu0 %v5539_v17  ;;  %v357_v17 = vld [vmem:[#allocation2 + $0x5d0] sm:$0xff] }
 0x102   :  { %2319 = vmatpush2.bf16.msra.mxu1 %v5475_v18  ;;  %2347 = vmatprep.subr.bf16.mxu0 %v5660_v19  ;;  %v5668_v18 = vcombine.high %v428_v6, %v432_v8  ;;  %v361_v19 = vld [vmem:[#allocation2 + $0x5f0] sm:$0xff] }
 0x103   :  { %2374 = vmatprep.subr.bf16.mxu1 %v5724_v23  ;;  %v221_v23 = vld [vmem:[#allocation2 + $0x190] sm:$0xff]  ;;  %v5597_v29 = vcombine.low %v357_v17, %v361_v19 }
 0x104   :  { %v177_v8 = vld [vmem:[#allocation2 + $0x30] sm:$0xff] }
 0x105   :  { %2321 = vmatmul.mubr.bf16.vlgmr.msra.gmra.mxu1 %v7002_v12  ;;  %2348 = vmatpush2.bf16.msra.mxu0 %v5659_v25  ;;  %v5636_v12 = vcombine.high %v396_v37, %v400_v38  ;;  %v349_v25 = vld [vmem:[#allocation2 + $0x590] sm:$0xff]  ;;  %v5461_v37 = vcombine.low %v221_v23, %v225_v24 }
 0x106   :  { %2375 = vmatpush1.bf16.msra.mxu1 %v5723_v26  ;;  %2349 = vmatprep.subr.bf16.mxu0 %v5652_v27  ;;  %v5598_v26 = vcombine.high %v357_v17, %v361_v19  ;;  %v353_v27 = vld [vmem:[#allocation2 + $0x5b0] sm:$0xff] }
 0x107   :  { %2376 = vmatprep.subr.bf16.mxu1 %v5716_v30  ;;  %2406 = vmatprep.mubr.bf16.mxu1 %v6894_v32  ;;  %v5462_v30 = vcombine.high %v221_v23, %v225_v24  ;;  %v5589_v38 = vcombine.low %v349_v25, %v353_v27  ;;  %v297_v19 = vld [vmem:[#allocation2 + $0x3f0] sm:$0xff] }
 0x109   :  { %2350 = vmatpush2.bf16.msra.mxu0 %v5651_v34  ;;  %v341_v34 = vld [vmem:[#allocation2 + $0x550] sm:$0xff] }
 0x10a   :  { %2377 = vmatpush1.bf16.msra.mxu1 %v5715_v35  ;;  %2351 = vmatprep.subr.bf16.mxu0 %v5644_v36  ;;  %v5590_v35 = vcombine.high %v349_v25, %v353_v27  ;;  %v345_v36 = vld [vmem:[#allocation2 + $0x570] sm:$0xff] }
 0x10b   :  { %2378 = vmatprep.subr.bf16.mxu1 %v5708_v40  ;;  %v205_v40 = vld [vmem:[#allocation2 + $0x110] sm:$0xff]  ;;  %v5581_v44 = vcombine.low %v341_v34, %v345_v36 }
 0x10c   :  { %v5446_v56 = vcombine.high %v205_v40, %v209_v41  ;;  %v5445_v50 = vcombine.low %v205_v40, %v209_v41  ;;  %v289_v27 = vld [vmem:[#allocation2 + $0x3b0] sm:$0xff] }
 0x10d   :  { %2352 = vmatpush2.bf16.msra.mxu0 %v5643_v42  ;;  %v333_v42 = vld [vmem:[#allocation2 + $0x510] sm:$0xff] }
 0x10e   :  { %2379 = vmatpush1.bf16.msra.mxu1 %v5707_v43  ;;  %2353 = vmatprep.subr.bf16.mxu0 %v5636_v12  ;;  %v5582_v43 = vcombine.high %v341_v34, %v345_v36  ;;  %v337_v12 = vld [vmem:[#allocation2 + $0x530] sm:$0xff] }
 0x10f   :  { %2380 = vmatprep.subr.bf16.mxu1 %v5700_v45  ;;  %v197_v45 = vld [vmem:[#allocation2 + $0xd0] sm:$0xff]  ;;  %v5573_v51 = vcombine.low %v333_v42, %v337_v12 }
 0x110   :  { %v5438_v52 = vcombine.high %v197_v45, %v201_v46  ;;  %v5437_v60 = vcombine.low %v197_v45, %v201_v46  ;;  %v277_v36 = vld [vmem:[#allocation2 + $0x350] sm:$0xff] }
 0x111   :  { %2354 = vmatpush2.bf16.msra.mxu0 %v5635_v47  ;;  %v325_v47 = vld [vmem:[#allocation2 + $0x4d0] sm:$0xff] }
 0x112   :  { %2381 = vmatpush1.bf16.msra.mxu1 %v5699_v48  ;;  %2355 = vmatprep.subr.bf16.mxu0 %v5628_v49  ;;  %v5574_v48 = vcombine.high %v333_v42, %v337_v12  ;;  %v329_v49 = vld [vmem:[#allocation2 + $0x4f0] sm:$0xff] }
 0x113   :  { %2382 = vmatprep.subr.bf16.mxu1 %v5692_v53  ;;  %v189_v53 = vld [vmem:[#allocation2 + $0x90] sm:$0xff]  ;;  %v5565_v61 = vcombine.low %v325_v47, %v329_v49 }
 0x114   :  { %v5430_v62 = vcombine.high %v189_v53, %v193_v54  ;;  %v5429_v4 = vcombine.low %v189_v53, %v193_v54  ;;  %v269_v12 = vld [vmem:[#allocation2 + $0x310] sm:$0xff] }
 0x115   :  { %2356 = vmatpush2.bf16.msra.mxu0 %v5627_v55  ;;  %v317_v55 = vld [vmem:[#allocation2 + $0x490] sm:$0xff] }
 0x116   :  { %2383 = vmatpush1.bf16.msra.mxu1 %v5691_v57  ;;  %2357 = vmatprep.subr.bf16.mxu0 %v5620_v58  ;;  %v5566_v57 = vcombine.high %v325_v47, %v329_v49  ;;  %v321_v58 = vld [vmem:[#allocation2 + $0x4b0] sm:$0xff] }
 0x117   :  { %2384 = vmatprep.subr.bf16.mxu1 %v5684_v63  ;;  %v181_v63 = vld [vmem:[#allocation2 + $0x50] sm:$0xff]  ;;  %v5557_v5 = vcombine.low %v317_v55, %v321_v58 }
 0x118   :  { %v5422_v6 = vcombine.high %v181_v63, %v185_v0  ;;  %v5421_v14 = vcombine.low %v181_v63, %v185_v0  ;;  %v261_v49 = vld [vmem:[#allocation2 + $0x2d0] sm:$0xff] }
 0x119   :  { %2358 = vmatpush2.bf16.msra.mxu0 %v5619_v1  ;;  %v309_v1 = vld [vmem:[#allocation2 + $0x450] sm:$0xff] }
 0x11a   :  { %2385 = vmatpush1.bf16.msra.mxu1 %v5683_v2  ;;  %2359 = vmatprep.subr.bf16.mxu0 %v5612_v3  ;;  %v5558_v2 = vcombine.high %v317_v55, %v321_v58  ;;  %v313_v3 = vld [vmem:[#allocation2 + $0x470] sm:$0xff] }
 0x11b   :  { %2386 = vmatprep.subr.bf16.mxu1 %v5676_v7  ;;  %v173_v7 = vld [vmem:[#allocation2 + $0x10] sm:$0xff]  ;;  %v5549_v16 = vcombine.low %v309_v1, %v313_v3 }
 0x11c   :  { %v5414_v17 = vcombine.high %v173_v7, %v177_v8  ;;  %v5413_v23 = vcombine.low %v173_v7, %v177_v8  ;;  %v257_v58 = vld [vmem:[#allocation2 + $0x2b0] sm:$0xff] }
 0x11d   :  { %2360 = vmatpush2.bf16.msra.mxu0 %v5611_v9  ;;  %v301_v9 = vld [vmem:[#allocation2 + $0x410] sm:$0xff] }
 0x11e   :  { %2387 = vmatpush1.bf16.msra.mxu1 %v5675_v10  ;;  %2361 = vmatprep.subr.bf16.mxu0 %v5604_v11  ;;  %v5550_v10 = vcombine.high %v309_v1, %v313_v3  ;;  %v305_v11 = vld [vmem:[#allocation2 + $0x430] sm:$0xff] }
 0x11f   :  { %2388 = vmatprep.subr.bf16.mxu1 %v5668_v18  ;;  %v293_v18 = vld [vmem:[#allocation2 + $0x3d0] sm:$0xff]  ;;  %v5541_v24 = vcombine.low %v301_v9, %v305_v11 }
 0x120   :  { %v5534_v25 = vcombine.high %v293_v18, %v297_v19  ;;  %v249_v3 = vld [vmem:[#allocation2 + $0x270] sm:$0xff] }
 0x121   :  { %2362 = vmatpush2.bf16.msra.mxu0 %v5603_v20  ;;  %v421_v20 = vld [vmem:[#allocation2 + $0x7d0] sm:$0xff] }
 0x122   :  { %2389 = vmatpush1.bf16.msra.mxu1 %v5667_v21  ;;  %2417 = vmatprep.subr.bf16.mxu0 %v5470_v22  ;;  %v5542_v21 = vcombine.high %v301_v9, %v305_v11  ;;  %v425_v22 = vld [vmem:[#allocation2 + $0x7f0] sm:$0xff] }
 0x123   :  { %2460 = vmatprep.subr.bf16.mxu1 %v5598_v26  ;;  %v285_v26 = vld [vmem:[#allocation2 + $0x390] sm:$0xff] }
 0x124   :  { %2364 = vmatmul.mubr.bf16.vlgmr.msra.gmra.mxu0 %v7007_v15  ;;  %v7033_v15 = vld [vmem:[%s7175_s0 + $0xc] ss:$20 sps:$4 sm:$0xff]   ;;  %v5526_v34 = vcombine.high %v285_v26, %v289_v27  ;;  %v5525_v40 = vcombine.low %v285_v26, %v289_v27  ;;  %v241_v11 = vld [vmem:[#allocation2 + $0x230] sm:$0xff] }
 0x125   :  { %2407 = vmatmul.mubr.bf16.vlgmr.msra.gmra.mxu1 %v7016_v13  ;;  %2418 = vmatpush1.bf16.msra.mxu0 %v5469_v28  ;;  %v5453_v13 = vcombine.low %v213_v31, %v217_v33  ;;  %v413_v28 = vld [vmem:[#allocation2 + $0x790] sm:$0xff]  ;;  %v5533_v31 = vcombine.low %v293_v18, %v297_v19  ;;  %v5661_v33 = vcombine.low %v421_v20, %v425_v22 }
 0x126   :  { %2461 = vmatpush1.bf16.msra.mxu1 %v5597_v29  ;;  %2419 = vmatprep.subr.bf16.mxu0 %v5462_v30  ;;  %v5662_v29 = vcombine.high %v421_v20, %v425_v22  ;;  %v417_v30 = vld [vmem:[#allocation2 + $0x7b0] sm:$0xff] }
 0x127   :  { %2462 = vmatprep.subr.bf16.mxu1 %v5590_v35  ;;  %2449 = vmatprep.mubr.bf16.mxu0 %v7027_v59  ;;  %v5654_v35 = vcombine.high %v413_v28, %v417_v30  ;;  %v5653_v41 = vcombine.low %v413_v28, %v417_v30  ;;  %v489_v22 = vld [vmem:[#allocation2 + $0x9f0] sm:$0xff] }
 0x128   :  { %2492 = vmatprep.mubr.bf16.mxu1 %v7033_v15  ;;  %v481_v30 = vld [vmem:[#allocation2 + $0x9b0] sm:$0xff] }
 0x129   :  { %2420 = vmatpush1.bf16.msra.mxu0 %v5461_v37  ;;  %v281_v37 = vld [vmem:[#allocation2 + $0x370] sm:$0xff] }
 0x12a   :  { %2463 = vmatpush1.bf16.msra.mxu1 %v5589_v38  ;;  %2421 = vmatprep.subr.bf16.mxu0 %v5454_v39  ;;  %v405_v38 = vld [vmem:[#allocation2 + $0x750] sm:$0xff]  ;;  %v5518_v42 = vcombine.high %v277_v36, %v281_v37  ;;  %v5517_v45 = vcombine.low %v277_v36, %v281_v37 }
 0x12b   :  { %2464 = vmatprep.subr.bf16.mxu1 %v5582_v43  ;;  %v409_v39 = vld [vmem:[#allocation2 + $0x770] sm:$0xff] }
 0x12c   :  { %v5646_v43 = vcombine.high %v405_v38, %v409_v39  ;;  %v5645_v46 = vcombine.low %v405_v38, %v409_v39  ;;  %v469_v39 = vld [vmem:[#allocation2 + $0x950] sm:$0xff] }
 0x12d   :  { %2422 = vmatpush1.bf16.msra.mxu0 %v5453_v13  ;;  %v273_v13 = vld [vmem:[#allocation2 + $0x330] sm:$0xff] }
 0x12e   :  { %2465 = vmatpush1.bf16.msra.mxu1 %v5581_v44  ;;  %2423 = vmatprep.subr.bf16.mxu0 %v5446_v56  ;;  %v397_v44 = vld [vmem:[#allocation2 + $0x710] sm:$0xff]  ;;  %v5510_v47 = vcombine.high %v269_v12, %v273_v13  ;;  %v5509_v53 = vcombine.low %v269_v12, %v273_v13  ;;  %v7045_v12 = vld [vmem:[%s7175_s0 + $0x8] ss:$20 sps:$4 sm:$0xff]  }
 0x12f   :  { %2466 = vmatprep.subr.bf16.mxu1 %v5574_v48  ;;  %v401_v56 = vld [vmem:[#allocation2 + $0x730] sm:$0xff] }
 0x130   :  { %v5638_v48 = vcombine.high %v397_v44, %v401_v56  ;;  %v5637_v54 = vcombine.low %v397_v44, %v401_v56 }
 0x131   :  { %2424 = vmatpush1.bf16.msra.mxu0 %v5445_v50  ;;  %v265_v50 = vld [vmem:[#allocation2 + $0x2f0] sm:$0xff] }
 0x132   :  { %2467 = vmatpush1.bf16.msra.mxu1 %v5573_v51  ;;  %2425 = vmatprep.subr.bf16.mxu0 %v5438_v52  ;;  %v389_v51 = vld [vmem:[#allocation2 + $0x6d0] sm:$0xff]  ;;  %v5502_v55 = vcombine.high %v261_v49, %v265_v50  ;;  %v5501_v63 = vcombine.low %v261_v49, %v265_v50  ;;  %v210_v49 = vld [vmem:[#allocation2 + $0x138] sm:$0xff] }
 0x133   :  { %2468 = vmatprep.subr.bf16.mxu1 %v5566_v57  ;;  %v393_v52 = vld [vmem:[#allocation2 + $0x6f0] sm:$0xff] }
 0x134   :  { %v253_v57 = vld [vmem:[#allocation2 + $0x290] sm:$0xff]  ;;  %v5629_v0 = vcombine.low %v389_v51, %v393_v52 }
 0x135   :  { %2426 = vmatpush1.bf16.msra.mxu0 %v5437_v60  ;;  %v381_v60 = vld [vmem:[#allocation2 + $0x690] sm:$0xff]  ;;  %v5494_v1 = vcombine.high %v253_v57, %v257_v58  ;;  %v5493_v7 = vcombine.low %v253_v57, %v257_v58  ;;  %v198_v57 = vld [vmem:[#allocation2 + $0xd8] sm:$0xff] }
 0x136   :  { %2469 = vmatpush1.bf16.msra.mxu1 %v5565_v61  ;;  %2427 = vmatprep.subr.bf16.mxu0 %v5430_v62  ;;  %v5630_v61 = vcombine.high %v389_v51, %v393_v52  ;;  %v385_v62 = vld [vmem:[#allocation2 + $0x6b0] sm:$0xff]  ;;  %v202_v58 = vld [vmem:[#allocation2 + $0xf8] sm:$0xff] }
 0x137   :  { %2470 = vmatprep.subr.bf16.mxu1 %v5558_v2  ;;  %v245_v2 = vld [vmem:[#allocation2 + $0x250] sm:$0xff]  ;;  %v5621_v8 = vcombine.low %v381_v60, %v385_v62 }
 0x138   :  { %v5486_v9 = vcombine.high %v245_v2, %v249_v3  ;;  %v5485_v18 = vcombine.low %v245_v2, %v249_v3  ;;  %v194_v2 = vld [vmem:[#allocation2 + $0xb8] sm:$0xff] }
 0x139   :  { %2428 = vmatpush1.bf16.msra.mxu0 %v5429_v4  ;;  %v373_v4 = vld [vmem:[#allocation2 + $0x650] sm:$0xff] }
 0x13a   :  { %2471 = vmatpush1.bf16.msra.mxu1 %v5557_v5  ;;  %2429 = vmatprep.subr.bf16.mxu0 %v5422_v6  ;;  %v5622_v5 = vcombine.high %v381_v60, %v385_v62  ;;  %v377_v6 = vld [vmem:[#allocation2 + $0x670] sm:$0xff] }
 0x13b   :  { %2472 = vmatprep.subr.bf16.mxu1 %v5550_v10  ;;  %v237_v10 = vld [vmem:[#allocation2 + $0x210] sm:$0xff]  ;;  %v5613_v19 = vcombine.low %v373_v4, %v377_v6 }
 0x13c   :  { %v5478_v20 = vcombine.high %v237_v10, %v241_v11  ;;  %v5477_v26 = vcombine.low %v237_v10, %v241_v11  ;;  %v493_v10 = vlaneseq  ;;  %v186_v11 = vld [vmem:[#allocation2 + $0x78] sm:$0xff] }
 0x13d   :  { %2430 = vmatpush1.bf16.msra.mxu0 %v5421_v14  ;;  %v365_v14 = vld [vmem:[#allocation2 + $0x610] sm:$0xff] }
 0x13e   :  { %2473 = vmatpush1.bf16.msra.mxu1 %v5549_v16  ;;  %2431 = vmatprep.subr.bf16.mxu0 %v5414_v17  ;;  %v5614_v16 = vcombine.high %v373_v4, %v377_v6  ;;  %v369_v17 = vld [vmem:[#allocation2 + $0x630] sm:$0xff]  ;;  %v5439_v4 = vcombine.low %v198_v57, %v202_v58 }
 0x13f   :  { %2474 = vmatprep.subr.bf16.mxu1 %v5542_v21  ;;  %v485_v21 = vld [vmem:[#allocation2 + $0x9d0] sm:$0xff]  ;;  %v5605_v27 = vcombine.low %v365_v14, %v369_v17 }
 0x140   :  { %v5726_v28 = vcombine.high %v485_v21, %v489_v22 }
 0x141   :  { %2432 = vmatpush1.bf16.msra.mxu0 %v5413_v23  ;;  %v230_v23 = vld [vmem:[#allocation2 + $0x1d8] sm:$0xff] }
 0x142   :  { %2475 = vmatpush1.bf16.msra.mxu1 %v5541_v24  ;;  %2433 = vmatprep.subr.bf16.mxu0 %v5534_v25  ;;  %v5606_v24 = vcombine.high %v365_v14, %v369_v17  ;;  %v234_v25 = vld [vmem:[#allocation2 + $0x1f8] sm:$0xff] }
 0x143   :  { %2476 = vmatprep.subr.bf16.mxu1 %v5662_v29  ;;  %v477_v29 = vld [vmem:[#allocation2 + $0x990] sm:$0xff]  ;;  %v5471_v36 = vcombine.low %v230_v23, %v234_v25 }
 0x144   :  { %v5718_v37 = vcombine.high %v477_v29, %v481_v30  ;;  %v5717_v13 = vcombine.low %v477_v29, %v481_v30  ;;  %v358_v29 = vld [vmem:[#allocation2 + $0x5d8] sm:$0xff] }
 0x145   :  { %2434 = vmatpush2.bf16.msra.mxu0 %v5533_v31  ;;  %v222_v31 = vld [vmem:[#allocation2 + $0x198] sm:$0xff] }
 0x146   :  { %2477 = vmatpush2.bf16.msra.mxu1 %v5661_v33  ;;  %2435 = vmatprep.subr.bf16.mxu0 %v5526_v34  ;;  %v5472_v33 = vcombine.high %v230_v23, %v234_v25  ;;  %v226_v34 = vld [vmem:[#allocation2 + $0x1b8] sm:$0xff]  ;;  %v7050_v23 = vshrl.u32 %v493_v10, 7 }
 0x147   :  { %2478 = vmatprep.subr.bf16.mxu1 %v5654_v35  ;;  %v5725_v35 = vcombine.low %v485_v21, %v489_v22  ;;  %v5464_v38 = vcombine.high %v222_v31, %v226_v34  ;;  %v5463_v44 = vcombine.low %v222_v31, %v226_v34  ;;  %v178_v22 = vld [vmem:[#allocation2 + $0x38] sm:$0xff] }
 0x148   :  { %v7053_v31 = vsub.s32 0, %v7050_v23  ;;  %v326_v10 = vld [vmem:[#allocation2 + $0x4d8] sm:$0xff] }
 0x149   :  { %2436 = vmatpush2.bf16.msra.mxu0 %v5525_v40  ;;  %v473_v40 = vld [vmem:[#allocation2 + $0x970] sm:$0xff] }
 0x14a   :  { %2479 = vmatpush2.bf16.msra.mxu1 %v5653_v41  ;;  %2437 = vmatprep.subr.bf16.mxu0 %v5518_v42  ;;  %v7039_v41 = vld [vmem:[%s7175_s0] ss:$20 sps:$4 sm:$0xff]   ;;  %v214_v42 = vld [vmem:[#allocation2 + $0x158] sm:$0xff]  ;;  %v5710_v56 = vcombine.high %v469_v39, %v473_v40  ;;  %v5709_v50 = vcombine.low %v469_v39, %v473_v40 }
 0x14b   :  { %2480 = vmatprep.subr.bf16.mxu1 %v5646_v43  ;;  %v218_v43 = vld [vmem:[#allocation2 + $0x178] sm:$0xff] }
 0x14c   :  { %v5455_v51 = vcombine.low %v214_v42, %v218_v43  ;;  %v350_v39 = vld [vmem:[#allocation2 + $0x598] sm:$0xff] }
 0x14d   :  { %2438 = vmatpush2.bf16.msra.mxu0 %v5517_v45  ;;  %v5456_v45 = vcombine.high %v214_v42, %v218_v43  ;;  %v354_v40 = vld [vmem:[#allocation2 + $0x5b8] sm:$0xff] }
 0x14e   :  { %2481 = vmatpush2.bf16.msra.mxu1 %v5645_v46  ;;  %2439 = vmatprep.subr.bf16.mxu0 %v5510_v47  ;;  %v461_v46 = vld [vmem:[#allocation2 + $0x910] sm:$0xff]  ;;  %v286_v42 = vld [vmem:[#allocation2 + $0x398] sm:$0xff] }
 0x14f   :  { %2482 = vmatprep.subr.bf16.mxu1 %v5638_v48  ;;  %v465_v47 = vld [vmem:[#allocation2 + $0x930] sm:$0xff]  ;;  %v206_v48 = vld [vmem:[#allocation2 + $0x118] sm:$0xff] }
 0x150   :  { %v5702_v52 = vcombine.high %v461_v46, %v465_v47  ;;  %v5701_v60 = vcombine.low %v461_v46, %v465_v47  ;;  %v290_v43 = vld [vmem:[#allocation2 + $0x3b8] sm:$0xff] }
 0x151   :  { %2440 = vmatpush2.bf16.msra.mxu0 %v5509_v53  ;;  %v5448_v53 = vcombine.high %v206_v48, %v210_v49  ;;  %v5528_v46 = vcombine.high %v286_v42, %v290_v43  ;;  %v342_v47 = vld [vmem:[#allocation2 + $0x558] sm:$0xff] }
 0x152   :  { %2483 = vmatpush2.bf16.msra.mxu1 %v5637_v54  ;;  %2441 = vmatprep.subr.bf16.mxu0 %v5502_v55  ;;  %v453_v54 = vld [vmem:[#allocation2 + $0x8d0] sm:$0xff] }
 0x153   :  { %2484 = vmatprep.subr.bf16.mxu1 %v5630_v61  ;;  %v457_v55 = vld [vmem:[#allocation2 + $0x8f0] sm:$0xff]  ;;  %v5447_v61 = vcombine.low %v206_v48, %v210_v49  ;;  %v346_v48 = vld [vmem:[#allocation2 + $0x578] sm:$0xff] }
 0x154   :  { %v5694_v62 = vcombine.high %v453_v54, %v457_v55  ;;  %v5693_v3 = vcombine.low %v453_v54, %v457_v55  ;;  %v5591_v55 = vcombine.low %v350_v39, %v354_v40 }
 0x155   :  { %2442 = vmatpush2.bf16.msra.mxu0 %v5501_v63  ;;  %v445_v63 = vld [vmem:[#allocation2 + $0x890] sm:$0xff] }
 0x156   :  { %2485 = vmatpush2.bf16.msra.mxu1 %v5629_v0  ;;  %2443 = vmatprep.subr.bf16.mxu0 %v5494_v1  ;;  %v449_v0 = vld [vmem:[#allocation2 + $0x8b0] sm:$0xff]  ;;  %v190_v1 = vld [vmem:[#allocation2 + $0x98] sm:$0xff] }
 0x157   :  { %2486 = vmatprep.subr.bf16.mxu1 %v5622_v5  ;;  %v5686_v5 = vcombine.high %v445_v63, %v449_v0  ;;  %v5432_v6 = vcombine.high %v190_v1, %v194_v2  ;;  %v5685_v14 = vcombine.low %v445_v63, %v449_v0  ;;  %v334_v63 = vld [vmem:[#allocation2 + $0x518] sm:$0xff] }
 0x158   :  { %v338_v0 = vld [vmem:[#allocation2 + $0x538] sm:$0xff] }
 0x159   :  { %2444 = vmatpush2.bf16.msra.mxu0 %v5493_v7  ;;  %v437_v7 = vld [vmem:[#allocation2 + $0x850] sm:$0xff] }
 0x15a   :  { %2487 = vmatpush2.bf16.msra.mxu1 %v5621_v8  ;;  %2445 = vmatprep.subr.bf16.mxu0 %v5486_v9  ;;  %v441_v8 = vld [vmem:[#allocation2 + $0x870] sm:$0xff]  ;;  %v182_v9 = vld [vmem:[#allocation2 + $0x58] sm:$0xff] }
 0x15b   :  { %2488 = vmatprep.subr.bf16.mxu1 %v5614_v16  ;;  %v5431_v16 = vcombine.low %v190_v1, %v194_v2  ;;  %v5678_v17 = vcombine.high %v437_v7, %v441_v8  ;;  %v5424_v21 = vcombine.high %v182_v9, %v186_v11  ;;  %v5423_v25 = vcombine.low %v182_v9, %v186_v11  ;;  %v270_v2 = vld [vmem:[#allocation2 + $0x318] sm:$0xff] }
 0x15c   :  { %v330_v11 = vld [vmem:[#allocation2 + $0x4f8] sm:$0xff] }
 0x15d   :  { %2446 = vmatpush2.bf16.msra.mxu0 %v5485_v18  ;;  %v429_v18 = vld [vmem:[#allocation2 + $0x810] sm:$0xff] }
 0x15e   :  { %2489 = vmatpush2.bf16.msra.mxu1 %v5613_v19  ;;  %2447 = vmatprep.subr.bf16.mxu0 %v5478_v20  ;;  %v433_v19 = vld [vmem:[#allocation2 + $0x830] sm:$0xff]  ;;  %v174_v20 = vld [vmem:[#allocation2 + $0x18] sm:$0xff] }
 0x15f   :  { %2490 = vmatprep.subr.bf16.mxu1 %v5606_v24  ;;  %v5677_v24 = vcombine.low %v437_v7, %v441_v8  ;;  %v5416_v30 = vcombine.high %v174_v20, %v178_v22  ;;  %v5669_v34 = vcombine.low %v429_v18, %v433_v19  ;;  %v5576_v7 = vcombine.high %v334_v63, %v338_v0 }
 0x161   :  { %2448 = vmatpush2.bf16.msra.mxu0 %v5477_v26  ;;  %v5670_v26 = vcombine.high %v429_v18, %v433_v19  ;;  %v5568_v19 = vcombine.high %v326_v10, %v330_v11 }
 0x162   :  { %2491 = vmatpush2.bf16.msra.mxu1 %v5605_v27  ;;  %2503 = vmatprep.subr.bf16.mxu0 %v5726_v28  ;;  %v294_v27 = vld [vmem:[#allocation2 + $0x3d8] sm:$0xff] }
 0x163   :  { %2546 = vmatprep.subr.bf16.mxu1 %v5472_v33  ;;  %v298_v28 = vld [vmem:[#allocation2 + $0x3f8] sm:$0xff] }
 0x164   :  { %2450 = vmatmul.mubr.bf16.vlgmr.msra.gmra.mxu0 %v7039_v41  ;;  %v362_v33 = vld [vmem:[#allocation2 + $0x5f8] sm:$0xff] }
 0x165   :  { %2493 = vmatmul.mubr.bf16.vlgmr.msra.gmra.mxu1 %v7045_v12  ;;  %2504 = vmatpush1.bf16.msra.mxu0 %v5725_v35  ;;  %v5415_v35 = vcombine.low %v174_v20, %v178_v22  ;;  %v322_v22 = vld [vmem:[#allocation2 + $0x4b8] sm:$0xff] }
 0x166   :  { %2547 = vmatpush1.bf16.msra.mxu1 %v5471_v36  ;;  %2505 = vmatprep.subr.bf16.mxu0 %v5718_v37  ;;  %v7055_v36 = vld [vmem:[#allocation4] sm:$0xff]  ;;  %v5600_v37 = vcombine.high %v358_v29, %v362_v33 }
 0x167   :  { %2548 = vmatprep.subr.bf16.mxu1 %v5464_v38  ;;  %2535 = vmatprep.mubr.bf16.mxu0 %v6894_v32  ;;  %v5536_v38 = vcombine.high %v294_v27, %v298_v28 }
 0x168   :  { %2578 = vmatprep.mubr.bf16.mxu1 %v7027_v59  ;;  %v5440_v59 = vcombine.high %v198_v57, %v202_v58  ;;  %v5527_v58 = vcombine.low %v286_v42, %v290_v43  ;;  %v302_v42 = vld [vmem:[#allocation2 + $0x418] sm:$0xff] }
 0x169   :  { %2506 = vmatpush1.bf16.msra.mxu0 %v5717_v13  ;;  %v496_v13 = vrot.slane %v7055_v36, %v7053_v31  ;;  %v306_v43 = vld [vmem:[#allocation2 + $0x438] sm:$0xff] }
 0x16a   :  { %2549 = vmatpush1.bf16.msra.mxu1 %v5463_v44  ;;  %2507 = vmatprep.subr.bf16.mxu0 %v5710_v56  ;;  %v5599_v44 = vcombine.low %v358_v29, %v362_v33  ;;  %v5535_v56 = vcombine.low %v294_v27, %v298_v28  ;;  %v314_v33 = vld [vmem:[#allocation2 + $0x478] sm:$0xff] }
 0x16b   :  { %2550 = vmatprep.subr.bf16.mxu1 %v5456_v45  ;;  %v5592_v45 = vcombine.high %v350_v39, %v354_v40 }
 0x16d   :  { %2508 = vmatpush1.bf16.msra.mxu0 %v5709_v50  ;;  %v7062_v50 = vld [vmem:[%s7175_s0 + $0x10] ss:$20 sps:$4 sm:$0xff]  }
 0x16e   :  { %2551 = vmatpush1.bf16.msra.mxu1 %v5455_v51  ;;  %2509 = vmatprep.subr.bf16.mxu0 %v5702_v52  ;;  %v278_v51 = vld [vmem:[#allocation2 + $0x358] sm:$0xff] }
 0x16f   :  { %2552 = vmatprep.subr.bf16.mxu1 %v5448_v53  ;;  %v282_v52 = vld [vmem:[#allocation2 + $0x378] sm:$0xff] }
 0x171   :  { %2510 = vmatpush1.bf16.msra.mxu0 %v5701_v60  ;;  %v5584_v60 = vcombine.high %v342_v47, %v346_v48 }
 0x172   :  { %2553 = vmatpush1.bf16.msra.mxu1 %v5447_v61  ;;  %2511 = vmatprep.subr.bf16.mxu0 %v5694_v62 }
 0x173   :  { %2554 = vmatprep.subr.bf16.mxu1 %v5440_v59  ;;  %v5520_v59 = vcombine.high %v278_v51, %v282_v52 }
 0x175   :  { %2512 = vmatpush1.bf16.msra.mxu0 %v5693_v3  ;;  %v274_v3 = vld [vmem:[#allocation2 + $0x338] sm:$0xff] }
 0x176   :  { %2555 = vmatpush1.bf16.msra.mxu1 %v5439_v4  ;;  %2513 = vmatprep.subr.bf16.mxu0 %v5686_v5  ;;  %v5512_v9 = vcombine.high %v270_v2, %v274_v3  ;;  %v5511_v18 = vcombine.low %v270_v2, %v274_v3 }
 0x177   :  { %2556 = vmatprep.subr.bf16.mxu1 %v5432_v6  ;;  %v5519_v6 = vcombine.low %v278_v51, %v282_v52  ;;  %v486_v51 = vld [vmem:[#allocation2 + $0x9d8] sm:$0xff] }
 0x178   :  { %v490_v52 = vld [vmem:[#allocation2 + $0x9f8] sm:$0xff] }
 0x179   :  { %2514 = vmatpush1.bf16.msra.mxu0 %v5685_v14  ;;  %v262_v14 = vld [vmem:[#allocation2 + $0x2d8] sm:$0xff]  ;;  %v5727_v3 = vcombine.low %v486_v51, %v490_v52 }
 0x17a   :  { %2557 = vmatpush1.bf16.msra.mxu1 %v5431_v16  ;;  %2515 = vmatprep.subr.bf16.mxu0 %v5678_v17  ;;  %v266_v16 = vld [vmem:[#allocation2 + $0x2f8] sm:$0xff]  ;;  %v5575_v17 = vcombine.low %v334_v63, %v338_v0 }
 0x17b   :  { %2558 = vmatprep.subr.bf16.mxu1 %v5424_v21  ;;  %v5504_v20 = vcombine.high %v262_v14, %v266_v16  ;;  %v318_v21 = vld [vmem:[#allocation2 + $0x498] sm:$0xff]  ;;  %v5503_v27 = vcombine.low %v262_v14, %v266_v16 }
 0x17c   :  { %v5560_v28 = vcombine.high %v318_v21, %v322_v22  ;;  %v478_v63 = vld [vmem:[#allocation2 + $0x998] sm:$0xff] }
 0x17d   :  { %2516 = vmatpush1.bf16.msra.mxu0 %v5677_v24  ;;  %v254_v24 = vld [vmem:[#allocation2 + $0x298] sm:$0xff] }
 0x17e   :  { %2559 = vmatpush1.bf16.msra.mxu1 %v5423_v25  ;;  %2517 = vmatprep.subr.bf16.mxu0 %v5670_v26  ;;  %v258_v25 = vld [vmem:[#allocation2 + $0x2b8] sm:$0xff]  ;;  %v5567_v26 = vcombine.low %v326_v10, %v330_v11 }
 0x17f   :  { %2560 = vmatprep.subr.bf16.mxu1 %v5416_v30  ;;  %v5496_v29 = vcombine.high %v254_v24, %v258_v25  ;;  %v310_v30 = vld [vmem:[#allocation2 + $0x458] sm:$0xff] }
 0x180   :  { %v5552_v39 = vcombine.high %v310_v30, %v314_v33  ;;  %v482_v0 = vld [vmem:[#allocation2 + $0x9b8] sm:$0xff] }
 0x181   :  { %2518 = vmatpush1.bf16.msra.mxu0 %v5669_v34  ;;  %v246_v34 = vld [vmem:[#allocation2 + $0x258] sm:$0xff] }
 0x182   :  { %2561 = vmatpush1.bf16.msra.mxu1 %v5415_v35  ;;  %2589 = vmatprep.subr.bf16.mxu0 %v5600_v37  ;;  %v250_v35 = vld [vmem:[#allocation2 + $0x278] sm:$0xff]  ;;  %v5559_v37 = vcombine.low %v318_v21, %v322_v22 }
 0x183   :  { %2562 = vmatprep.subr.bf16.mxu1 %v5536_v38  ;;  %v5495_v38 = vcombine.low %v254_v24, %v258_v25  ;;  %v5488_v40 = vcombine.high %v246_v34, %v250_v35  ;;  %v474_v10 = vld [vmem:[#allocation2 + $0x978] sm:$0xff] }
 0x184   :  { %v2193_v49 = vpop.f32.mrf.mxu0  ;;  %2536 = vmatmul.mubr.bf16.vlgmr.msra.gmra.mxu0 %v7062_v50  ;;  %v402_v21 = vld [vmem:[#allocation2 + $0x738] sm:$0xff] }
 0x185   :  { %v2194_v53 = vadd.f32 %v2193_v49, %v496_v13  ;;  %v2236_v54 = vpop.f32.mrf.mxu1  ;;  %2590 = vmatpush1.bf16.msra.mxu0 %v5599_v44  ;;  %2621 = vmatprep.mubr.bf16.mxu0 %v7033_v15  ;;  %v5583_v15 = vcombine.low %v342_v47, %v346_v48  ;;  %v242_v44 = vld [vmem:[#allocation2 + $0x238] sm:$0xff] }
 0x186   :  { %2563 = vmatpush2.bf16.msra.mxu1 %v5535_v56  ;;  %v7066_v57 = vpop.f32.mrf.mxu0  ;;  %2591 = vmatprep.subr.bf16.mxu0 %v5592_v45  ;;  %v5551_v56 = vcombine.low %v310_v30, %v314_v33  ;;  %v5487_v45 = vcombine.low %v246_v34, %v250_v35  ;;  %v422_v48 = vld [vmem:[#allocation2 + $0x7d8] sm:$0xff] }
 0x187   :  { %v7068_v61 = vadd.f32 %v2236_v54, %v2194_v53  ;;  %v7070_v62 = vpop.f32.mrf.mxu1  ;;  %2564 = vmatprep.subr.bf16.mxu1 %v5528_v46  ;;  %v5544_v46 = vcombine.high %v302_v42, %v306_v43  ;;  %v426_v49 = vld [vmem:[#allocation2 + $0x7f8] sm:$0xff]  ;;  %v5543_v53 = vcombine.low %v302_v42, %v306_v43 }
 0x188   :  { %v2197_v1 = vpop.f32.mrf.mxu0  ;;  %v462_v24 = vld [vmem:[#allocation2 + $0x918] sm:$0xff] }
 0x189   :  { %v2198_v4 = vadd.f32 %v2197_v1, %v496_v13  ;;  %2592 = vmatpush1.bf16.msra.mxu0 %v5591_v55  ;;  %v2240_v5 = vpop.f32.mrf.mxu1  ;;  %v238_v13 = vld [vmem:[#allocation2 + $0x218] sm:$0xff]  ;;  %v5664_v55 = vcombine.high %v422_v48, %v426_v49  ;;  %v5663_v1 = vcombine.low %v422_v48, %v426_v49 }
 0x18a   :  { %2565 = vmatpush2.bf16.msra.mxu1 %v5527_v58  ;;  %2593 = vmatprep.subr.bf16.mxu0 %v5584_v60  ;;  %v5480_v47 = vcombine.high %v238_v13, %v242_v44  ;;  %v5479_v54 = vcombine.low %v238_v13, %v242_v44  ;;  %v5728_v58 = vcombine.high %v486_v51, %v490_v52  ;;  %v414_v60 = vld [vmem:[#allocation2 + $0x798] sm:$0xff]  ;;  %v7074_v2 = vpop.f32.mrf.mxu0  ;;  %v7085_v13 = vsub.s32 1, %v7050_v23 }
 0x18b   :  { %v7072_v8 = vadd.f32 %v2240_v5, %v2198_v4  ;;  %2566 = vmatprep.subr.bf16.mxu1 %v5520_v59  ;;  %v418_v59 = vld [vmem:[#allocation2 + $0x7b8] sm:$0xff] }
 0x18c   :  { %v5656_v4 = vcombine.high %v414_v60, %v418_v59  ;;  %v406_v5 = vld [vmem:[#allocation2 + $0x758] sm:$0xff]  ;;  %v5655_v14 = vcombine.low %v414_v60, %v418_v59  ;;  %v500_v52 = vrot.slane %v7055_v36, %v7085_v13 }
 0x18d   :  { %2594 = vmatpush1.bf16.msra.mxu0 %v5583_v15  ;;  %v5720_v15 = vcombine.high %v478_v63, %v482_v0  ;;  %v466_v25 = vld [vmem:[#allocation2 + $0x938] sm:$0xff] }
 0x18e   :  { %2567 = vmatpush2.bf16.msra.mxu1 %v5519_v6  ;;  %2595 = vmatprep.subr.bf16.mxu0 %v5576_v7  ;;  %v410_v6 = vld [vmem:[#allocation2 + $0x778] sm:$0xff]  ;;  %v5704_v30 = vcombine.high %v462_v24, %v466_v25 }
 0x18f   :  { %2568 = vmatprep.subr.bf16.mxu1 %v5512_v9  ;;  %v470_v9 = vld [vmem:[#allocation2 + $0x958] sm:$0xff] }
 0x190   :  { %v390_v33 = vld [vmem:[#allocation2 + $0x6d8] sm:$0xff] }
 0x191   :  { %2596 = vmatpush1.bf16.msra.mxu0 %v5575_v17  ;;  %v5719_v17 = vcombine.low %v478_v63, %v482_v0  ;;  %v394_v34 = vld [vmem:[#allocation2 + $0x6f8] sm:$0xff] }
 0x192   :  { %2569 = vmatpush2.bf16.msra.mxu1 %v5511_v18  ;;  %2597 = vmatprep.subr.bf16.mxu0 %v5568_v19  ;;  %v5648_v18 = vcombine.high %v406_v5, %v410_v6  ;;  %v5712_v19 = vcombine.high %v470_v9, %v474_v10  ;;  %v454_v35 = vld [vmem:[#allocation2 + $0x8d8] sm:$0xff] }
 0x193   :  { %2570 = vmatprep.subr.bf16.mxu1 %v5504_v20  ;;  %v398_v20 = vld [vmem:[#allocation2 + $0x718] sm:$0xff] }
 0x194   :  { %v382_v42 = vld [vmem:[#allocation2 + $0x698] sm:$0xff] }
 0x195   :  { %2598 = vmatpush1.bf16.msra.mxu0 %v5567_v26  ;;  %v5711_v26 = vcombine.low %v470_v9, %v474_v10  ;;  %v386_v43 = vld [vmem:[#allocation2 + $0x6b8] sm:$0xff] }
 0x196   :  { %2571 = vmatpush2.bf16.msra.mxu1 %v5503_v27  ;;  %2599 = vmatprep.subr.bf16.mxu0 %v5560_v28  ;;  %v5640_v27 = vcombine.high %v398_v20, %v402_v21  ;;  %v446_v44 = vld [vmem:[#allocation2 + $0x898] sm:$0xff] }
 0x197   :  { %2572 = vmatprep.subr.bf16.mxu1 %v5496_v29  ;;  %v374_v49 = vld [vmem:[#allocation2 + $0x658] sm:$0xff] }
 0x198   :  { %v378_v51 = vld [vmem:[#allocation2 + $0x678] sm:$0xff] }
 0x199   :  { %2600 = vmatpush1.bf16.msra.mxu0 %v5559_v37  ;;  %v458_v37 = vld [vmem:[#allocation2 + $0x8f8] sm:$0xff]  ;;  %v5616_v59 = vcombine.high %v374_v49, %v378_v51 }
 0x19a   :  { %2573 = vmatpush2.bf16.msra.mxu1 %v5495_v38  ;;  %2601 = vmatprep.subr.bf16.mxu0 %v5552_v39  ;;  %v5639_v38 = vcombine.low %v398_v20, %v402_v21  ;;  %v5632_v39 = vcombine.high %v390_v33, %v394_v34  ;;  %v366_v0 = vld [vmem:[#allocation2 + $0x618] sm:$0xff] }
 0x19b   :  { %2574 = vmatprep.subr.bf16.mxu1 %v5488_v40  ;;  %v5696_v40 = vcombine.high %v454_v35, %v458_v37  ;;  %v6156_v20 = vld [vmem:[#allocation6 + $0xe4] ss:$16 sps:$4 sm:$0xff]  }
 0x19c   :  { %v6159_v21 = vld [vmem:[#allocation6 + $0x2e4] ss:$16 sps:$4 sm:$0xff]  }
 0x19d   :  { %2602 = vmatpush1.bf16.msra.mxu0 %v5551_v56  ;;  %v450_v56 = vld [vmem:[#allocation2 + $0x8b8] sm:$0xff] }
 0x19e   :  { %2575 = vmatpush2.bf16.msra.mxu1 %v5487_v45  ;;  %2603 = vmatprep.subr.bf16.mxu0 %v5544_v46  ;;  %v5631_v45 = vcombine.low %v390_v33, %v394_v34  ;;  %v5695_v46 = vcombine.low %v454_v35, %v458_v37  ;;  %v5688_v48 = vcombine.high %v446_v44, %v450_v56  ;;  %v6169_v33 = vld [vmem:[#allocation6 + $0x2a0] ss:$16 sps:$4 sm:$0xff]   ;;  %v6174_v34 = vld [vmem:[#allocation6 + $0x84] ss:$16 sps:$4 sm:$0xff]  }
 0x19f   :  { %2576 = vmatprep.subr.bf16.mxu1 %v5480_v47  ;;  %v5624_v47 = vcombine.high %v382_v42, %v386_v43  ;;  %v5687_v60 = vcombine.low %v446_v44, %v450_v56  ;;  %v6175_v35 = vld [vmem:[#allocation6 + $0x280] ss:$16 sps:$4 sm:$0xff]   ;;  %v6180_v37 = vld [vmem:[#allocation6 + $0x64] ss:$16 sps:$4 sm:$0xff]  }
 0x1a0   :  { %v6187_v44 = vld [vmem:[#allocation6 + $0x240] ss:$16 sps:$4 sm:$0xff]   ;;  %v6192_v56 = vld [vmem:[#allocation6 + $0x24] ss:$16 sps:$4 sm:$0xff]  }
 0x1a1   :  { %2604 = vmatpush1.bf16.msra.mxu0 %v5543_v53  ;;  %v438_v53 = vld [vmem:[#allocation2 + $0x858] sm:$0xff] }
 0x1a2   :  { %2577 = vmatpush2.bf16.msra.mxu1 %v5479_v54  ;;  %2605 = vmatprep.subr.bf16.mxu0 %v5664_v55  ;;  %v442_v54 = vld [vmem:[#allocation2 + $0x878] sm:$0xff]  ;;  %v5623_v55 = vcombine.low %v382_v42, %v386_v43 }
 0x1a3   :  { %2632 = vmatprep.subr.bf16.mxu1 %v5728_v58  ;;  %v2200_v58 = vadd.f32 %v7074_v2, %v500_v52  ;;  %v5680_v63 = vcombine.high %v438_v53, %v442_v54  ;;  %v5679_v2 = vcombine.low %v438_v53, %v442_v54  ;;  %v6189_v42 = vld [vmem:[#allocation6 + $0x244] ss:$16 sps:$4 sm:$0xff]   ;;  %v6184_v43 = vld [vmem:[#allocation6 + $0x40] ss:$16 sps:$4 sm:$0xff]   ;;  %v507_v53 = vsub.s32 3, %v7050_v23 }
 0x1a4   :  { %v2279_v7 = vpop.f32.mrf.mxu0  ;;  %v6196_v54 = vld [vmem:[#allocation6] ss:$16 sps:$4 sm:$0xff]  }
 0x1a5   :  { %v2280_v11 = vadd.f32 %v2279_v7, %v7068_v61  ;;  %2579 = vmatmul.mubr.bf16.vlgmr.msra.gmra.mxu1 %v7039_v41  ;;  %2606 = vmatpush2.bf16.msra.mxu0 %v5663_v1  ;;  %v5647_v41 = vcombine.low %v406_v5, %v410_v6  ;;  %v370_v1 = vld [vmem:[#allocation2 + $0x638] sm:$0xff]  ;;  %v2242_v5 = vpop.f32.mrf.mxu1  ;;  %v5615_v7 = vcombine.low %v374_v49, %v378_v51 }
 0x1a6   :  { %2633 = vmatpush1.bf16.msra.mxu1 %v5727_v3  ;;  %v7078_v16 = vpop.f32.mrf.mxu0  ;;  %2607 = vmatprep.subr.bf16.mxu0 %v5656_v4  ;;  %v2196_v3 = vadd.f32 %v7066_v57, %v500_v52  ;;  %v430_v4 = vld [vmem:[#allocation2 + $0x818] sm:$0xff]  ;;  %v2243_v9 = vadd.f32 %v2242_v5, %v2200_v58  ;;  %v5608_v10 = vcombine.high %v366_v0, %v370_v1 }
 0x1a7   :  { %2634 = vmatprep.subr.bf16.mxu1 %v5720_v15  ;;  %2664 = vmatprep.mubr.bf16.mxu1 %v6894_v32  ;;  %v2675_v28 = vmax.f32 %v2280_v11, 0.0  ;;  %v434_v15 = vld [vmem:[#allocation2 + $0x838] sm:$0xff] }
 0x1a8   :  { %v2283_v22 = vpop.f32.mrf.mxu0  ;;  %v5672_v11 = vcombine.high %v430_v4, %v434_v15  ;;  %v6198_v49 = vld [vmem:[#allocation6 + $0x4] ss:$16 sps:$4 sm:$0xff]  }
 0x1a9   :  { %v2284_v61 = vadd.f32 %v2283_v22, %v7072_v8  ;;  %2608 = vmatpush2.bf16.msra.mxu0 %v5655_v14  ;;  %v5703_v8 = vcombine.low %v462_v24, %v466_v25  ;;  %v2239_v14 = vadd.f32 %v7070_v62, %v2196_v3  ;;  %v6154_v24 = vld [vmem:[#allocation6 + $0xe0] ss:$16 sps:$4 sm:$0xff]   ;;  %v6162_v62 = vld [vmem:[#allocation6 + $0xc4] ss:$16 sps:$4 sm:$0xff]  }
 0x1aa   :  { %2635 = vmatpush1.bf16.msra.mxu1 %v5719_v17  ;;  %2609 = vmatprep.subr.bf16.mxu0 %v5648_v18  ;;  %v2285_v6 = vpop.f32.mrf.mxu0  ;;  %v5607_v18 = vcombine.low %v366_v0, %v370_v1  ;;  %v6201_v52 = vld [vmem:[#allocation6 + $0x204] ss:$16 sps:$4 sm:$0xff]   ;;  %v6202_v0 = vld [vmem:[#allocation6 + $0x1e0] ss:$16 sps:$4 sm:$0xff]  }
 0x1ab   :  { %v2683_v29 = vmax.f32 %v2284_v61, 0.0  ;;  %2636 = vmatprep.subr.bf16.mxu1 %v5712_v19  ;;  %v2286_v17 = vadd.f32 %v2285_v6, %v2243_v9  ;;  %v2282_v57 = vadd.f32 %v7078_v16, %v2239_v14  ;;  %v5671_v19 = vcombine.low %v430_v4, %v434_v15  ;;  %v6157_v61 = vld [vmem:[#allocation6 + $0x2e0] ss:$16 sps:$4 sm:$0xff]   ;;  %v6204_v58 = vld [vmem:[#allocation6 + $0x1e4] ss:$16 sps:$4 sm:$0xff]  }
 0x1ac   :  { %v6160_v16 = vld [vmem:[#allocation6 + $0xc0] ss:$16 sps:$4 sm:$0xff]   ;;  %v6210_v3 = vld [vmem:[#allocation6 + $0x1c4] ss:$16 sps:$4 sm:$0xff]  }
 0x1ad   :  { %v7082_v32 = vpack.c.bf16 %v2683_v29, %v2675_v28  ;;  %2610 = vmatpush2.bf16.msra.mxu0 %v5647_v41  ;;  %v2684_v22 = vmax.f32 %v2286_v17, 0.0  ;;  %v2676_v25 = vmax.f32 %v2282_v57, 0.0  ;;  %v6165_v41 = vld [vmem:[#allocation6 + $0x2c4] ss:$16 sps:$4 sm:$0xff]   ;;  %v6205_v1 = vld [vmem:[#allocation6 + $0x3e0] ss:$16 sps:$4 sm:$0xff]  }
 0x1ae   :  { %2637 = vmatpush1.bf16.msra.mxu1 %v5711_v26  ;;  %2611 = vmatprep.subr.bf16.mxu0 %v5640_v27  ;;  %v6163_v27 = vld [vmem:[#allocation6 + $0x2c0] ss:$16 sps:$4 sm:$0xff]   ;;  %v6168_v28 = vld [vmem:[#allocation6 + $0xa4] ss:$16 sps:$4 sm:$0xff]  }
 0x1af   :  { %2638 = vmatprep.subr.bf16.mxu1 %v5704_v30  ;;  %v7093_v26 = vpack.c.bf16 %v2684_v22, %v2676_v25  ;;  %v6171_v29 = vld [vmem:[#allocation6 + $0x2a4] ss:$16 sps:$4 sm:$0xff]   ;;  %v6166_v30 = vld [vmem:[#allocation6 + $0xa0] ss:$16 sps:$4 sm:$0xff]  }
 0x1b0   :  { %v6213_v15 = vld [vmem:[#allocation6 + $0x3c4] ss:$16 sps:$4 sm:$0xff]   ;;  %v6208_v9 = vld [vmem:[#allocation6 + $0x1c0] ss:$16 sps:$4 sm:$0xff]  }
 0x1b1   :  { %2612 = vmatpush2.bf16.msra.mxu0 %v5639_v38  ;;  %v6183_v38 = vld [vmem:[#allocation6 + $0x264] ss:$16 sps:$4 sm:$0xff]  }
 0x1b2   :  { %2639 = vmatpush1.bf16.msra.mxu1 %v5703_v8  ;;  %2613 = vmatprep.subr.bf16.mxu0 %v5632_v39  ;;  %v6178_v8 = vld [vmem:[#allocation6 + $0x60] ss:$16 sps:$4 sm:$0xff]   ;;  %v6222_v25 = vld [vmem:[#allocation6 + $0x184] ss:$16 sps:$4 sm:$0xff]  }
 0x1b3   :  { %2640 = vmatprep.subr.bf16.mxu1 %v5696_v40  ;;  %v6181_v39 = vld [vmem:[#allocation6 + $0x260] ss:$16 sps:$4 sm:$0xff]   ;;  %v6186_v40 = vld [vmem:[#allocation6 + $0x44] ss:$16 sps:$4 sm:$0xff]  }
 0x1b5   :  { %2614 = vmatpush2.bf16.msra.mxu0 %v5631_v45 }
 0x1b6   :  { %2641 = vmatpush1.bf16.msra.mxu1 %v5695_v46  ;;  %2615 = vmatprep.subr.bf16.mxu0 %v5624_v47  ;;  %v6195_v46 = vld [vmem:[#allocation6 + $0x224] ss:$16 sps:$4 sm:$0xff]   ;;  %v6190_v47 = vld [vmem:[#allocation6 + $0x20] ss:$16 sps:$4 sm:$0xff]  }
 0x1b7   :  { %2642 = vmatprep.subr.bf16.mxu1 %v5688_v48  ;;  %v6193_v48 = vld [vmem:[#allocation6 + $0x220] ss:$16 sps:$4 sm:$0xff]  }
 0x1b9   :  { %2616 = vmatpush2.bf16.msra.mxu0 %v5623_v55  ;;  %v6199_v55 = vld [vmem:[#allocation6 + $0x200] ss:$16 sps:$4 sm:$0xff]  }
 0x1ba   :  { %2643 = vmatpush1.bf16.msra.mxu1 %v5687_v60  ;;  %2617 = vmatprep.subr.bf16.mxu0 %v5616_v59  ;;  %v6207_v59 = vld [vmem:[#allocation6 + $0x3e4] ss:$16 sps:$4 sm:$0xff]  }
 0x1bb   :  { %2644 = vmatprep.subr.bf16.mxu1 %v5680_v63  ;;  %v508_v63 = vrot.slane %v7055_v36, %v507_v53 }
 0x1bd   :  { %2618 = vmatpush2.bf16.msra.mxu0 %v5615_v7 }
 0x1be   :  { %2645 = vmatpush1.bf16.msra.mxu1 %v5679_v2  ;;  %2619 = vmatprep.subr.bf16.mxu0 %v5608_v10  ;;  %v6211_v10 = vld [vmem:[#allocation6 + $0x3c0] ss:$16 sps:$4 sm:$0xff]  }
 0x1bf   :  { %2646 = vmatprep.subr.bf16.mxu1 %v5672_v11  ;;  %v6216_v11 = vld [vmem:[#allocation6 + $0x1a4] ss:$16 sps:$4 sm:$0xff]  }
 0x1c1   :  { %2620 = vmatpush2.bf16.msra.mxu0 %v5607_v18  ;;  %v6219_v18 = vld [vmem:[#allocation6 + $0x3a4] ss:$16 sps:$4 sm:$0xff]  }
 0x1c2   :  { %2647 = vmatpush1.bf16.msra.mxu1 %v5671_v19  ;;  %4257 = vmatprep.subr.bf16.mxu0 %v6156_v20 }
 0x1c3   :  { %4300 = vmatprep.subr.bf16.mxu1 %v6159_v21  ;;  %v6214_v21 = vld [vmem:[#allocation6 + $0x1a0] ss:$16 sps:$4 sm:$0xff]  }
 0x1c4   :  { %2622 = vmatmul.mubr.bf16.vlgmr.msra.gmra.mxu0 %v7045_v12  ;;  %v6177_v12 = vld [vmem:[#allocation6 + $0x284] ss:$16 sps:$4 sm:$0xff]  }
 0x1c5   :  { %2665 = vmatmul.mubr.bf16.vlgmr.msra.gmra.mxu1 %v7062_v50  ;;  %4258 = vmatpush1.bf16.msra.mxu0 %v6154_v24  ;;  %v6172_v50 = vld [vmem:[#allocation6 + $0x80] ss:$16 sps:$4 sm:$0xff]   ;;  %v7098_v45 = vpop.f32.mrf.mxu1 }
 0x1c6   :  { %4289 = vmatprep.mubr.bf16.mxu0 %v7093_v26  ;;  %4301 = vmatpush1.bf16.msra.mxu1 %v6157_v61  ;;  %v6217_v24 = vld [vmem:[#allocation6 + $0x3a0] ss:$16 sps:$4 sm:$0xff]  }
 0x1c7   :  { %4259 = vmatprep.subr.bf16.mxu0 %v6162_v62  ;;  %4302 = vmatprep.subr.bf16.mxu1 %v6165_v41  ;;  %v2324_v51 = vpop.f32.mrf.mxu1  ;;  %v6225_v41 = vld [vmem:[#allocation6 + $0x384] ss:$16 sps:$4 sm:$0xff]  }
 0x1c8   :  { %v2325_v6 = vadd.f32 %v2324_v51, %v508_v63  ;;  %v6241_v51 = vld [vmem:[#allocation6 + $0x320] ss:$16 sps:$4 sm:$0xff]  }
 0x1c9   :  { %4260 = vmatpush1.bf16.msra.mxu0 %v6160_v16  ;;  %v7101_v60 = vpop.f32.mrf.mxu1 }
 0x1ca   :  { %4303 = vmatpush1.bf16.msra.mxu1 %v6163_v27  ;;  %4261 = vmatprep.subr.bf16.mxu0 %v6168_v28  ;;  %v503_v27 = vsub.s32 2, %v7050_v23 }
 0x1cb   :  { %4304 = vmatprep.subr.bf16.mxu1 %v6171_v29  ;;  %v2328_v4 = vpop.f32.mrf.mxu1  ;;  %v6220_v29 = vld [vmem:[#allocation6 + $0x180] ss:$16 sps:$4 sm:$0xff]  }
 0x1cc   :  { %v2329_v19 = vadd.f32 %v2328_v4, %v508_v63  ;;  %v6255_v4 = vld [vmem:[#allocation6 + $0x4c4] ss:$16 sps:$4 sm:$0xff]  }
 0x1cd   :  { %4262 = vmatpush1.bf16.msra.mxu0 %v6166_v30  ;;  %v6223_v30 = vld [vmem:[#allocation6 + $0x380] ss:$16 sps:$4 sm:$0xff]  }
 0x1ce   :  { %4305 = vmatpush1.bf16.msra.mxu1 %v6169_v33  ;;  %4263 = vmatprep.subr.bf16.mxu0 %v6174_v34  ;;  %v6228_v33 = vld [vmem:[#allocation6 + $0x164] ss:$16 sps:$4 sm:$0xff]  }
 0x1cf   :  { %4306 = vmatprep.subr.bf16.mxu1 %v6177_v12 }
 0x1d1   :  { %4264 = vmatpush1.bf16.msra.mxu0 %v6172_v50  ;;  %v6231_v50 = vld [vmem:[#allocation6 + $0x364] ss:$16 sps:$4 sm:$0xff]  }
 0x1d2   :  { %4307 = vmatpush1.bf16.msra.mxu1 %v6175_v35  ;;  %4265 = vmatprep.subr.bf16.mxu0 %v6180_v37  ;;  %v504_v35 = vrot.slane %v7055_v36, %v503_v27  ;;  %v6240_v36 = vld [vmem:[#allocation6 + $0x124] ss:$16 sps:$4 sm:$0xff]  }
 0x1d3   :  { %4308 = vmatprep.subr.bf16.mxu1 %v6183_v38  ;;  %v6226_v38 = vld [vmem:[#allocation6 + $0x160] ss:$16 sps:$4 sm:$0xff]  }
 0x1d5   :  { %4266 = vmatpush1.bf16.msra.mxu0 %v6178_v8  ;;  %v6229_v8 = vld [vmem:[#allocation6 + $0x360] ss:$16 sps:$4 sm:$0xff]  }
 0x1d6   :  { %4309 = vmatpush1.bf16.msra.mxu1 %v6181_v39  ;;  %4267 = vmatprep.subr.bf16.mxu0 %v6186_v40  ;;  %v6234_v39 = vld [vmem:[#allocation6 + $0x144] ss:$16 sps:$4 sm:$0xff]  }
 0x1d7   :  { %4310 = vmatprep.subr.bf16.mxu1 %v6189_v42  ;;  %v6237_v40 = vld [vmem:[#allocation6 + $0x344] ss:$16 sps:$4 sm:$0xff]   ;;  %v2327_v42 = vadd.f32 %v7101_v60, %v504_v35  ;;  %v6244_v60 = vld [vmem:[#allocation6 + $0x100] ss:$16 sps:$4 sm:$0xff]  }
 0x1d9   :  { %4268 = vmatpush1.bf16.msra.mxu0 %v6184_v43  ;;  %v6232_v43 = vld [vmem:[#allocation6 + $0x140] ss:$16 sps:$4 sm:$0xff]  }
 0x1da   :  { %4311 = vmatpush1.bf16.msra.mxu1 %v6187_v44  ;;  %4269 = vmatprep.subr.bf16.mxu0 %v6192_v56  ;;  %v6235_v44 = vld [vmem:[#allocation6 + $0x340] ss:$16 sps:$4 sm:$0xff]   ;;  %v2323_v56 = vadd.f32 %v7098_v45, %v504_v35 }
 0x1db   :  { %4312 = vmatprep.subr.bf16.mxu1 %v6195_v46  ;;  %v6247_v45 = vld [vmem:[#allocation6 + $0x300] ss:$16 sps:$4 sm:$0xff]  }
 0x1dc   :  { %v6343_v35 = vld [vmem:[#allocation6 + $0x600] ss:$16 sps:$4 sm:$0xff]  }
 0x1dd   :  { %4270 = vmatpush1.bf16.msra.mxu0 %v6190_v47  ;;  %v6243_v47 = vld [vmem:[#allocation6 + $0x324] ss:$16 sps:$4 sm:$0xff]  }
 0x1de   :  { %4313 = vmatpush1.bf16.msra.mxu1 %v6193_v48  ;;  %4271 = vmatprep.subr.bf16.mxu0 %v6198_v49  ;;  %v6238_v49 = vld [vmem:[#allocation6 + $0x120] ss:$16 sps:$4 sm:$0xff]  }
 0x1df   :  { %4314 = vmatprep.subr.bf16.mxu1 %v6201_v52  ;;  %v6246_v52 = vld [vmem:[#allocation6 + $0x104] ss:$16 sps:$4 sm:$0xff]  }
 0x1e1   :  { %4272 = vmatpush1.bf16.msra.mxu0 %v6196_v54 }
 0x1e2   :  { %4315 = vmatpush1.bf16.msra.mxu1 %v6199_v55  ;;  %4273 = vmatprep.subr.bf16.mxu0 %v6204_v58  ;;  %v6249_v55 = vld [vmem:[#allocation6 + $0x304] ss:$16 sps:$4 sm:$0xff]  }
 0x1e3   :  { %4316 = vmatprep.subr.bf16.mxu1 %v6207_v59  ;;  %v6252_v59 = vld [vmem:[#allocation6 + $0x4e4] ss:$16 sps:$4 sm:$0xff]  }
 0x1e4   :  { %v7106_v5 = vpop.f32.mrf.mxu0 }
 0x1e5   :  { %v7108_v7 = vpop.f32.mrf.mxu1  ;;  %4274 = vmatpush2.bf16.msra.mxu0 %v6202_v0  ;;  %v2366_v48 = vadd.f32 %v7106_v5, %v2323_v56  ;;  %v6303_v0 = vld [vmem:[#allocation6 + $0x6e4] ss:$16 sps:$4 sm:$0xff]  }
 0x1e6   :  { %4317 = vmatpush2.bf16.msra.mxu1 %v6205_v1  ;;  %v2367_v2 = vpop.f32.mrf.mxu0  ;;  %4275 = vmatprep.subr.bf16.mxu0 %v6210_v3  ;;  %v6250_v3 = vld [vmem:[#allocation6 + $0x4e0] ss:$16 sps:$4 sm:$0xff]   ;;  %v6363_v56 = vld [vmem:[#allocation6 + $0x7a4] ss:$16 sps:$4 sm:$0xff]  }
 0x1e7   :  { %v2368_v14 = vadd.f32 %v2367_v2, %v2325_v6  ;;  %v2410_v17 = vpop.f32.mrf.mxu1  ;;  %4318 = vmatprep.subr.bf16.mxu1 %v6213_v15  ;;  %v2409_v58 = vadd.f32 %v7108_v7, %v2366_v48  ;;  %v6301_v15 = vld [vmem:[#allocation6 + $0x6e0] ss:$16 sps:$4 sm:$0xff]   ;;  %v6309_v6 = vld [vmem:[#allocation6 + $0x6c4] ss:$16 sps:$4 sm:$0xff]  }
 0x1e8   :  { %v2369_v57 = vpop.f32.mrf.mxu0  ;;  %v6253_v7 = vld [vmem:[#allocation6 + $0x4c0] ss:$16 sps:$4 sm:$0xff]  }
 0x1e9   :  { %v2412_v20 = vpop.f32.mrf.mxu1  ;;  %4276 = vmatpush2.bf16.msra.mxu0 %v6208_v9  ;;  %v2411_v61 = vadd.f32 %v2410_v17, %v2368_v14  ;;  %v2370_v46 = vadd.f32 %v2369_v57, %v2327_v42  ;;  %v2677_v1 = vmax.f32 %v2409_v58, 0.0  ;;  %v6258_v9 = vld [vmem:[#allocation6 + $0x4a4] ss:$16 sps:$4 sm:$0xff]   ;;  %v6307_v2 = vld [vmem:[#allocation6 + $0x6c0] ss:$16 sps:$4 sm:$0xff]  }
 0x1ea   :  { %4319 = vmatpush2.bf16.msra.mxu1 %v6211_v10  ;;  %v2371_v22 = vpop.f32.mrf.mxu0  ;;  %4277 = vmatprep.subr.bf16.mxu0 %v6216_v11  ;;  %v6315_v10 = vld [vmem:[#allocation6 + $0x6a4] ss:$16 sps:$4 sm:$0xff]   ;;  %v6256_v11 = vld [vmem:[#allocation6 + $0x4a0] ss:$16 sps:$4 sm:$0xff]  }
 0x1eb   :  { %v2372_v62 = vadd.f32 %v2371_v22, %v2329_v19  ;;  %4320 = vmatprep.subr.bf16.mxu1 %v6219_v18  ;;  %v2414_v16 = vpop.f32.mrf.mxu1  ;;  %v2678_v34 = vmax.f32 %v2411_v61, 0.0  ;;  %v2413_v54 = vadd.f32 %v2412_v20, %v2370_v46  ;;  %v6261_v14 = vld [vmem:[#allocation6 + $0x484] ss:$16 sps:$4 sm:$0xff]   ;;  %v6313_v17 = vld [vmem:[#allocation6 + $0x6a0] ss:$16 sps:$4 sm:$0xff]  }
 0x1ec   :  { %v6321_v18 = vld [vmem:[#allocation6 + $0x684] ss:$16 sps:$4 sm:$0xff]   ;;  %v6259_v57 = vld [vmem:[#allocation6 + $0x480] ss:$16 sps:$4 sm:$0xff]  }
 0x1ed   :  { %v2415_v28 = vadd.f32 %v2414_v16, %v2372_v62  ;;  %4278 = vmatpush2.bf16.msra.mxu0 %v6214_v21  ;;  %v2685_v63 = vmax.f32 %v2413_v54, 0.0  ;;  %v6264_v19 = vld [vmem:[#allocation6 + $0x464] ss:$16 sps:$4 sm:$0xff]   ;;  %v6319_v20 = vld [vmem:[#allocation6 + $0x680] ss:$16 sps:$4 sm:$0xff]  }
 0x1ee   :  { %4321 = vmatpush2.bf16.msra.mxu1 %v6217_v24  ;;  %4279 = vmatprep.subr.bf16.mxu0 %v6222_v25  ;;  %v6327_v21 = vld [vmem:[#allocation6 + $0x664] ss:$16 sps:$4 sm:$0xff]   ;;  %v6262_v22 = vld [vmem:[#allocation6 + $0x460] ss:$16 sps:$4 sm:$0xff]  }
 0x1ef   :  { %v2686_v12 = vmax.f32 %v2415_v28, 0.0  ;;  %4322 = vmatprep.subr.bf16.mxu1 %v6225_v41  ;;  %v7121_v5 = vpack.c.bf16 %v2685_v63, %v2677_v1  ;;  %v6267_v24 = vld [vmem:[#allocation6 + $0x444] ss:$16 sps:$4 sm:$0xff]   ;;  %v6325_v25 = vld [vmem:[#allocation6 + $0x660] ss:$16 sps:$4 sm:$0xff]  }
 0x1f0   :  { %v6333_v61 = vld [vmem:[#allocation6 + $0x644] ss:$16 sps:$4 sm:$0xff]   ;;  %v6265_v62 = vld [vmem:[#allocation6 + $0x440] ss:$16 sps:$4 sm:$0xff]  }
 0x1f1   :  { %v7114_v37 = vpack.c.bf16 %v2686_v12, %v2678_v34  ;;  %4280 = vmatpush2.bf16.msra.mxu0 %v6220_v29  ;;  %v6270_v41 = vld [vmem:[#allocation6 + $0x424] ss:$16 sps:$4 sm:$0xff]   ;;  %v6331_v16 = vld [vmem:[#allocation6 + $0x640] ss:$16 sps:$4 sm:$0xff]  }
 0x1f2   :  { %4323 = vmatpush2.bf16.msra.mxu1 %v6223_v30  ;;  %4281 = vmatprep.subr.bf16.mxu0 %v6228_v33  ;;  %v6339_v28 = vld [vmem:[#allocation6 + $0x624] ss:$16 sps:$4 sm:$0xff]   ;;  %v6268_v29 = vld [vmem:[#allocation6 + $0x420] ss:$16 sps:$4 sm:$0xff]  }
 0x1f3   :  { %4332 = vmatprep.mubr.bf16.mxu1 %v7114_v37  ;;  %4324 = vmatprep.subr.bf16.mxu1 %v6231_v50  ;;  %v6273_v30 = vld [vmem:[#allocation6 + $0x404] ss:$16 sps:$4 sm:$0xff]   ;;  %v6337_v33 = vld [vmem:[#allocation6 + $0x620] ss:$16 sps:$4 sm:$0xff]  }
 0x1f4   :  { %v6345_v34 = vld [vmem:[#allocation6 + $0x604] ss:$16 sps:$4 sm:$0xff]   ;;  %v6271_v12 = vld [vmem:[#allocation6 + $0x400] ss:$16 sps:$4 sm:$0xff]  }
 0x1f5   :  { %4282 = vmatpush2.bf16.msra.mxu0 %v6226_v38  ;;  %v6276_v50 = vld [vmem:[#allocation6 + $0x5e4] ss:$16 sps:$4 sm:$0xff]   ;;  %v6280_v46 = vld [vmem:[#allocation6 + $0x5a0] ss:$16 sps:$4 sm:$0xff]  }
 0x1f6   :  { %4325 = vmatpush2.bf16.msra.mxu1 %v6229_v8  ;;  %4283 = vmatprep.subr.bf16.mxu0 %v6234_v39  ;;  %v6351_v38 = vld [vmem:[#allocation6 + $0x7e4] ss:$16 sps:$4 sm:$0xff]   ;;  %v6274_v8 = vld [vmem:[#allocation6 + $0x5e0] ss:$16 sps:$4 sm:$0xff]  }
 0x1f7   :  { %4326 = vmatprep.subr.bf16.mxu1 %v6237_v40  ;;  %v6279_v39 = vld [vmem:[#allocation6 + $0x5c4] ss:$16 sps:$4 sm:$0xff]   ;;  %v6349_v40 = vld [vmem:[#allocation6 + $0x7e0] ss:$16 sps:$4 sm:$0xff]  }
 0x1f8   :  { %v6357_v42 = vld [vmem:[#allocation6 + $0x7c4] ss:$16 sps:$4 sm:$0xff]   ;;  %v6361_v48 = vld [vmem:[#allocation6 + $0x7a0] ss:$16 sps:$4 sm:$0xff]  }
 0x1f9   :  { %4284 = vmatpush2.bf16.msra.mxu0 %v6232_v43  ;;  %v6277_v43 = vld [vmem:[#allocation6 + $0x5c0] ss:$16 sps:$4 sm:$0xff]   ;;  %v6294_v1 = vld [vmem:[#allocation6 + $0x524] ss:$16 sps:$4 sm:$0xff]  }
 0x1fa   :  { %4327 = vmatpush2.bf16.msra.mxu1 %v6235_v44  ;;  %4285 = vmatprep.subr.bf16.mxu0 %v6240_v36  ;;  %v6282_v44 = vld [vmem:[#allocation6 + $0x5a4] ss:$16 sps:$4 sm:$0xff]   ;;  %v6355_v36 = vld [vmem:[#allocation6 + $0x7c0] ss:$16 sps:$4 sm:$0xff]  }
 0x1fb   :  { %4328 = vmatprep.subr.bf16.mxu1 %v6243_v47  ;;  %v6285_v47 = vld [vmem:[#allocation6 + $0x584] ss:$16 sps:$4 sm:$0xff]   ;;  %v6367_v54 = vld [vmem:[#allocation6 + $0x780] ss:$16 sps:$4 sm:$0xff]  }
 0x1fc   :  { %v6286_v58 = vld [vmem:[#allocation6 + $0x560] ss:$16 sps:$4 sm:$0xff]  }
 0x1fd   :  { %4286 = vmatpush2.bf16.msra.mxu0 %v6238_v49  ;;  %v6369_v49 = vld [vmem:[#allocation6 + $0x784] ss:$16 sps:$4 sm:$0xff]   ;;  %v6289_v63 = vld [vmem:[#allocation6 + $0x540] ss:$16 sps:$4 sm:$0xff]  }
 0x1fe   :  { %4329 = vmatpush2.bf16.msra.mxu1 %v6241_v51  ;;  %4287 = vmatprep.subr.bf16.mxu0 %v6246_v52  ;;  %v6283_v51 = vld [vmem:[#allocation6 + $0x580] ss:$16 sps:$4 sm:$0xff]   ;;  %v6288_v52 = vld [vmem:[#allocation6 + $0x564] ss:$16 sps:$4 sm:$0xff]  }
 0x1ff   :  { %4330 = vmatprep.subr.bf16.mxu1 %v6249_v55  ;;  %v6375_v55 = vld [vmem:[#allocation6 + $0x764] ss:$16 sps:$4 sm:$0xff]  }
 0x201   :  { %4288 = vmatpush2.bf16.msra.mxu0 %v6244_v60  ;;  %v6291_v60 = vld [vmem:[#allocation6 + $0x544] ss:$16 sps:$4 sm:$0xff]  }
 0x202   :  { %4331 = vmatpush2.bf16.msra.mxu1 %v6247_v45  ;;  %4343 = vmatprep.subr.bf16.mxu0 %v6252_v59  ;;  %v6373_v45 = vld [vmem:[#allocation6 + $0x760] ss:$16 sps:$4 sm:$0xff]   ;;  %v6381_v59 = vld [vmem:[#allocation6 + $0x744] ss:$16 sps:$4 sm:$0xff]  }
 0x203   :  { %4386 = vmatprep.subr.bf16.mxu1 %v6303_v0 }
 0x204   :  { %4290 = vmatmul.mubr.bf16.vlgmr.msra.gmra.mxu0 %v7082_v32 }
 0x205   :  { %4333 = vmatmul.mubr.bf16.vlgmr.msra.gmra.mxu1 %v7121_v5  ;;  %4344 = vmatpush1.bf16.msra.mxu0 %v6250_v3  ;;  %v6379_v3 = vld [vmem:[#allocation6 + $0x740] ss:$16 sps:$4 sm:$0xff]  }
 0x206   :  { %4345 = vmatprep.subr.bf16.mxu0 %v6255_v4  ;;  %4387 = vmatpush1.bf16.msra.mxu1 %v6301_v15  ;;  %v6387_v4 = vld [vmem:[#allocation6 + $0x724] ss:$16 sps:$4 sm:$0xff]   ;;  %v6292_v15 = vld [vmem:[#allocation6 + $0x520] ss:$16 sps:$4 sm:$0xff]  }
 0x207   :  { %4388 = vmatprep.subr.bf16.mxu1 %v6309_v6 }
 0x209   :  { %4346 = vmatpush1.bf16.msra.mxu0 %v6253_v7  ;;  %v6297_v7 = vld [vmem:[#allocation6 + $0x504] ss:$16 sps:$4 sm:$0xff]  }
 0x20a   :  { %4347 = vmatprep.subr.bf16.mxu0 %v6258_v9  ;;  %4389 = vmatpush1.bf16.msra.mxu1 %v6307_v2  ;;  %v6385_v9 = vld [vmem:[#allocation6 + $0x720] ss:$16 sps:$4 sm:$0xff]   ;;  %v515_v2 = vsub.s32 5, %v7050_v23 }
 0x20b   :  { %4390 = vmatprep.subr.bf16.mxu1 %v6315_v10  ;;  %v6393_v10 = vld [vmem:[#allocation6 + $0x704] ss:$16 sps:$4 sm:$0xff]  }
 0x20d   :  { %4348 = vmatpush1.bf16.msra.mxu0 %v6256_v11  ;;  %v511_v11 = vsub.s32 4, %v7050_v23 }
 0x20e   :  { %4349 = vmatprep.subr.bf16.mxu0 %v6261_v14  ;;  %4391 = vmatpush1.bf16.msra.mxu1 %v6313_v17  ;;  %v6295_v17 = vld [vmem:[#allocation6 + $0x500] ss:$16 sps:$4 sm:$0xff]  }
 0x20f   :  { %4392 = vmatprep.subr.bf16.mxu1 %v6321_v18 }
 0x211   :  { %4350 = vmatpush1.bf16.msra.mxu0 %v6259_v57  ;;  %v6300_v57 = vld [vmem:[#allocation6 + $0xec] ss:$16 sps:$4 sm:$0xff]  }
 0x212   :  { %4351 = vmatprep.subr.bf16.mxu0 %v6264_v19  ;;  %4393 = vmatpush1.bf16.msra.mxu1 %v6319_v20  ;;  %v6391_v19 = vld [vmem:[#allocation6 + $0x700] ss:$16 sps:$4 sm:$0xff]   ;;  %v7127_v20 = vld [vmem:[#allocation4] sm:$0xff] }
 0x213   :  { %4394 = vmatprep.subr.bf16.mxu1 %v6327_v21  ;;  %v516_v21 = vrot.slane %v7127_v20, %v515_v2  ;;  %v6352_v2 = vld [vmem:[#allocation6 + $0x1c8] ss:$16 sps:$4 sm:$0xff]  }
 0x215   :  { %4352 = vmatpush1.bf16.msra.mxu0 %v6262_v22  ;;  %v6399_v22 = vld [vmem:[#allocation6 + $0x2ec] ss:$16 sps:$4 sm:$0xff]  }
 0x216   :  { %4353 = vmatprep.subr.bf16.mxu0 %v6267_v24  ;;  %4395 = vmatpush1.bf16.msra.mxu1 %v6325_v25  ;;  %v512_v24 = vrot.slane %v7127_v20, %v511_v11 }
 0x217   :  { %4396 = vmatprep.subr.bf16.mxu1 %v6333_v61 }
 0x219   :  { %4354 = vmatpush1.bf16.msra.mxu0 %v6265_v62 }
 0x21a   :  { %4355 = vmatprep.subr.bf16.mxu0 %v6270_v41  ;;  %4397 = vmatpush1.bf16.msra.mxu1 %v6331_v16 }
 0x21b   :  { %4398 = vmatprep.subr.bf16.mxu1 %v6339_v28 }
 0x21d   :  { %4356 = vmatpush1.bf16.msra.mxu0 %v6268_v29 }
 0x21e   :  { %4357 = vmatprep.subr.bf16.mxu0 %v6273_v30  ;;  %4399 = vmatpush1.bf16.msra.mxu1 %v6337_v33 }
 0x21f   :  { %4400 = vmatprep.subr.bf16.mxu1 %v6345_v34 }
 0x221   :  { %4358 = vmatpush1.bf16.msra.mxu0 %v6271_v12 }
 0x222   :  { %4359 = vmatprep.subr.bf16.mxu0 %v6276_v50  ;;  %4401 = vmatpush1.bf16.msra.mxu1 %v6343_v35 }
 0x223   :  { %4402 = vmatprep.subr.bf16.mxu1 %v6351_v38 }
 0x224   :  { %v2451_v0 = vpop.f32.mrf.mxu0 }
 0x225   :  { %4360 = vmatpush2.bf16.msra.mxu0 %v6274_v8  ;;  %v2494_v14 = vpop.f32.mrf.mxu1  ;;  %v2452_v16 = vadd.f32 %v2451_v0, %v512_v24  ;;  %v6330_v0 = vld [vmem:[#allocation6 + $0x4c] ss:$16 sps:$4 sm:$0xff]  }
 0x226   :  { %4361 = vmatprep.subr.bf16.mxu0 %v6279_v39  ;;  %4403 = vmatpush2.bf16.msra.mxu1 %v6349_v40  ;;  %v2453_v6 = vpop.f32.mrf.mxu0 }
 0x227   :  { %4404 = vmatprep.subr.bf16.mxu1 %v6357_v42  ;;  %v2496_v25 = vpop.f32.mrf.mxu1  ;;  %v2454_v62 = vadd.f32 %v2453_v6, %v516_v21  ;;  %v2495_v50 = vadd.f32 %v2494_v14, %v2452_v16  ;;  %v6348_v6 = vld [vmem:[#allocation6 + $0x1ec] ss:$16 sps:$4 sm:$0xff]   ;;  %v6358_v14 = vld [vmem:[#allocation6 + $0x1a8] ss:$16 sps:$4 sm:$0xff]  }
 0x228   :  { %v2455_v18 = vpop.f32.mrf.mxu0 }
 0x229   :  { %4362 = vmatpush2.bf16.msra.mxu0 %v6277_v43  ;;  %v2456_v41 = vadd.f32 %v2455_v18, %v512_v24  ;;  %v2498_v28 = vpop.f32.mrf.mxu1  ;;  %v2497_v34 = vadd.f32 %v2496_v25, %v2454_v62  ;;  %v6370_v25 = vld [vmem:[#allocation6 + $0x168] ss:$16 sps:$4 sm:$0xff]  }
 0x22a   :  { %4363 = vmatprep.subr.bf16.mxu0 %v6282_v44  ;;  %4405 = vmatpush2.bf16.msra.mxu1 %v6355_v36  ;;  %v2457_v61 = vpop.f32.mrf.mxu0 }
 0x22b   :  { %4406 = vmatprep.subr.bf16.mxu1 %v6363_v56  ;;  %v2458_v30 = vadd.f32 %v2457_v61, %v516_v21  ;;  %v2499_v12 = vadd.f32 %v2498_v28, %v2456_v41  ;;  %v2500_v35 = vpop.f32.mrf.mxu1  ;;  %v523_v21 = vsub.s32 7, %v7050_v23  ;;  %v6378_v61 = vld [vmem:[#allocation6 + $0x14c] ss:$16 sps:$4 sm:$0xff]   ;;  %v6376_v28 = vld [vmem:[#allocation6 + $0x148] ss:$16 sps:$4 sm:$0xff]  }
 0x22d   :  { %4364 = vmatpush2.bf16.msra.mxu0 %v6280_v46  ;;  %v2501_v8 = vadd.f32 %v2500_v35, %v2458_v30  ;;  %v524_v62 = vrot.slane %v7127_v20, %v523_v21  ;;  %v6384_v30 = vld [vmem:[#allocation6 + $0x12c] ss:$16 sps:$4 sm:$0xff]  }
 0x22e   :  { %4365 = vmatprep.subr.bf16.mxu0 %v6285_v47  ;;  %4407 = vmatpush2.bf16.msra.mxu1 %v6361_v48  ;;  %v6426_v21 = vld [vmem:[#allocation6 + $0x44c] ss:$16 sps:$4 sm:$0xff]  }
 0x22f   :  { %4408 = vmatprep.subr.bf16.mxu1 %v6369_v49  ;;  %v6298_v49 = vld [vmem:[#allocation6 + $0xe8] ss:$16 sps:$4 sm:$0xff]  }
 0x231   :  { %4366 = vmatpush2.bf16.msra.mxu0 %v6283_v51 }
 0x232   :  { %4367 = vmatprep.subr.bf16.mxu0 %v6288_v52  ;;  %4409 = vmatpush2.bf16.msra.mxu1 %v6367_v54  ;;  %v6306_v52 = vld [vmem:[#allocation6 + $0xcc] ss:$16 sps:$4 sm:$0xff]   ;;  %v6304_v54 = vld [vmem:[#allocation6 + $0xc8] ss:$16 sps:$4 sm:$0xff]  }
 0x233   :  { %4410 = vmatprep.subr.bf16.mxu1 %v6375_v55  ;;  %v6312_v55 = vld [vmem:[#allocation6 + $0xac] ss:$16 sps:$4 sm:$0xff]  }
 0x235   :  { %4368 = vmatpush2.bf16.msra.mxu0 %v6286_v58  ;;  %v6310_v58 = vld [vmem:[#allocation6 + $0xa8] ss:$16 sps:$4 sm:$0xff]  }
 0x236   :  { %4369 = vmatprep.subr.bf16.mxu0 %v6291_v60  ;;  %4411 = vmatpush2.bf16.msra.mxu1 %v6373_v45  ;;  %v6318_v60 = vld [vmem:[#allocation6 + $0x8c] ss:$16 sps:$4 sm:$0xff]   ;;  %v6316_v45 = vld [vmem:[#allocation6 + $0x88] ss:$16 sps:$4 sm:$0xff]  }
 0x237   :  { %4412 = vmatprep.subr.bf16.mxu1 %v6381_v59  ;;  %v6324_v59 = vld [vmem:[#allocation6 + $0x6c] ss:$16 sps:$4 sm:$0xff]  }
 0x239   :  { %4370 = vmatpush2.bf16.msra.mxu0 %v6289_v63  ;;  %v6322_v63 = vld [vmem:[#allocation6 + $0x68] ss:$16 sps:$4 sm:$0xff]  }
 0x23a   :  { %4371 = vmatprep.subr.bf16.mxu0 %v6294_v1  ;;  %4413 = vmatpush2.bf16.msra.mxu1 %v6379_v3  ;;  %v6328_v1 = vld [vmem:[#allocation6 + $0x48] ss:$16 sps:$4 sm:$0xff]   ;;  %v6336_v3 = vld [vmem:[#allocation6 + $0x2c] ss:$16 sps:$4 sm:$0xff]  }
 0x23b   :  { %4414 = vmatprep.subr.bf16.mxu1 %v6387_v4  ;;  %v6342_v4 = vld [vmem:[#allocation6 + $0xc] ss:$16 sps:$4 sm:$0xff]  }
 0x23d   :  { %4372 = vmatpush2.bf16.msra.mxu0 %v6292_v15  ;;  %v6340_v15 = vld [vmem:[#allocation6 + $0x8] ss:$16 sps:$4 sm:$0xff]  }
 0x23e   :  { %4373 = vmatprep.subr.bf16.mxu0 %v6297_v7  ;;  %4415 = vmatpush2.bf16.msra.mxu1 %v6385_v9  ;;  %v6346_v7 = vld [vmem:[#allocation6 + $0x1e8] ss:$16 sps:$4 sm:$0xff]   ;;  %v6354_v9 = vld [vmem:[#allocation6 + $0x1cc] ss:$16 sps:$4 sm:$0xff]  }
 0x23f   :  { %4416 = vmatprep.subr.bf16.mxu1 %v6393_v10  ;;  %v6360_v10 = vld [vmem:[#allocation6 + $0x1ac] ss:$16 sps:$4 sm:$0xff]  }
 0x241   :  { %4374 = vmatpush2.bf16.msra.mxu0 %v6295_v17  ;;  %v6366_v17 = vld [vmem:[#allocation6 + $0x18c] ss:$16 sps:$4 sm:$0xff]  }
 0x242   :  { %4429 = vmatprep.subr.bf16.mxu0 %v6300_v57  ;;  %4417 = vmatpush2.bf16.msra.mxu1 %v6391_v19  ;;  %v6364_v57 = vld [vmem:[#allocation6 + $0x188] ss:$16 sps:$4 sm:$0xff]   ;;  %v6372_v19 = vld [vmem:[#allocation6 + $0x16c] ss:$16 sps:$4 sm:$0xff]  }
 0x243   :  { %4472 = vmatprep.subr.bf16.mxu1 %v6399_v22  ;;  %v519_v22 = vsub.s32 6, %v7050_v23 }
 0x244   :  { %v2537_v29 = vpop.f32.mrf.mxu0 }
 0x245   :  { %v2538_v42 = vadd.f32 %v2537_v29, %v2495_v50  ;;  %v520_v41 = vrot.slane %v7127_v20, %v519_v22  ;;  %v6421_v22 = vld [vmem:[#allocation6 + $0x268] ss:$16 sps:$4 sm:$0xff]  }
 0x246   :  { %v2539_v33 = vpop.f32.mrf.mxu0 }
 0x247   :  { %v2540_v39 = vadd.f32 %v2539_v33, %v2497_v34  ;;  %v2679_v47 = vmax.f32 %v2538_v42, 0.0  ;;  %v6390_v42 = vld [vmem:[#allocation6 + $0x10c] ss:$16 sps:$4 sm:$0xff]  }
 0x248   :  { %v2541_v38 = vpop.f32.mrf.mxu0 }
 0x249   :  { %v2542_v40 = vadd.f32 %v2541_v38, %v2499_v12  ;;  %v2680_v56 = vmax.f32 %v2540_v39, 0.0  ;;  %v6382_v39 = vld [vmem:[#allocation6 + $0x128] ss:$16 sps:$4 sm:$0xff]  }
 0x24a   :  { %v2543_v43 = vpop.f32.mrf.mxu0 }
 0x24b   :  { %v2544_v44 = vadd.f32 %v2543_v43, %v2501_v8  ;;  %v2687_v36 = vmax.f32 %v2542_v40, 0.0 }
 0x24d   :  { %v2688_v46 = vmax.f32 %v2544_v44, 0.0  ;;  %v7133_v51 = vpack.c.bf16 %v2687_v36, %v2679_v47 }
 0x24f   :  { %v7131_v48 = vpack.c.bf16 %v2688_v46, %v2680_v56 }
 0x251   :  { %4375 = vmatprep.mubr.bf16.mxu0 %v7131_v48 }
 0x252   :  { %4376 = vmatmul.mubr.bf16.vlgmr.msra.gmra.mxu0 %v7133_v51 }
 0x253   :  { %4430 = vmatpush1.bf16.msra.mxu0 %v6298_v49  ;;  %4461 = vmatprep.mubr.bf16.mxu0 %v7093_v26  ;;  %v6334_v26 = vld [vmem:[#allocation6 + $0x28] ss:$16 sps:$4 sm:$0xff]  }
 0x254   :  { %4431 = vmatprep.subr.bf16.mxu0 %v6306_v52  ;;  %v6388_v52 = vld [vmem:[#allocation6 + $0x108] ss:$16 sps:$4 sm:$0xff]  }
 0x257   :  { %4432 = vmatpush1.bf16.msra.mxu0 %v6304_v54 }
 0x258   :  { %4433 = vmatprep.subr.bf16.mxu0 %v6312_v55  ;;  %v6396_v55 = vld [vmem:[#allocation6 + $0x4ec] ss:$16 sps:$4 sm:$0xff]  }
 0x25b   :  { %4434 = vmatpush1.bf16.msra.mxu0 %v6310_v58 }
 0x25c   :  { %4435 = vmatprep.subr.bf16.mxu0 %v6318_v60 }
 0x25f   :  { %4436 = vmatpush1.bf16.msra.mxu0 %v6316_v45 }
 0x260   :  { %4437 = vmatprep.subr.bf16.mxu0 %v6324_v59 }
 0x263   :  { %4438 = vmatpush1.bf16.msra.mxu0 %v6322_v63 }
 0x264   :  { %4439 = vmatprep.subr.bf16.mxu0 %v6330_v0  ;;  %v6394_v0 = vld [vmem:[#allocation6 + $0x4e8] ss:$16 sps:$4 sm:$0xff]  }
 0x265   :  { %v2580_v11 = vpop.f32.mrf.mxu1 }
 0x266   :  { %v2581_v50 = vadd.f32 %v2580_v11, %v520_v41  ;;  %v6414_v11 = vld [vmem:[#allocation6 + $0x48c] ss:$16 sps:$4 sm:$0xff]  }
 0x267   :  { %4440 = vmatpush1.bf16.msra.mxu0 %v6328_v1  ;;  %v2582_v18 = vpop.f32.mrf.mxu1  ;;  %v6402_v1 = vld [vmem:[#allocation6 + $0x4cc] ss:$16 sps:$4 sm:$0xff]  }
 0x268   :  { %4441 = vmatprep.subr.bf16.mxu0 %v6336_v3  ;;  %v2583_v33 = vadd.f32 %v2582_v18, %v524_v62  ;;  %v6420_v18 = vld [vmem:[#allocation6 + $0x46c] ss:$16 sps:$4 sm:$0xff]  }
 0x269   :  { %v2584_v24 = vpop.f32.mrf.mxu1 }
 0x26a   :  { %v2585_v35 = vadd.f32 %v2584_v24, %v520_v41  ;;  %v6424_v24 = vld [vmem:[#allocation6 + $0x448] ss:$16 sps:$4 sm:$0xff]  }
 0x26b   :  { %4442 = vmatpush1.bf16.msra.mxu0 %v6334_v26  ;;  %v2586_v16 = vpop.f32.mrf.mxu1  ;;  %v6430_v41 = vld [vmem:[#allocation6 + $0x428] ss:$16 sps:$4 sm:$0xff]  }
 0x26c   :  { %4443 = vmatprep.subr.bf16.mxu0 %v6342_v4  ;;  %v2587_v43 = vadd.f32 %v2586_v16, %v524_v62  ;;  %v6397_v4 = vld [vmem:[#allocation6 + $0x2e8] ss:$16 sps:$4 sm:$0xff]   ;;  %v6435_v16 = vld [vmem:[#allocation6 + $0x22c] ss:$16 sps:$4 sm:$0xff]  }
 0x26d   :  { %v6427_v62 = vld [vmem:[#allocation6 + $0x248] ss:$16 sps:$4 sm:$0xff]  }
 0x26f   :  { %4444 = vmatpush1.bf16.msra.mxu0 %v6340_v15 }
 0x270   :  { %4445 = vmatprep.subr.bf16.mxu0 %v6348_v6  ;;  %v6400_v6 = vld [vmem:[#allocation6 + $0x4c8] ss:$16 sps:$4 sm:$0xff]  }
 0x273   :  { %4446 = vmatpush2.bf16.msra.mxu0 %v6346_v7  ;;  %v6405_v7 = vld [vmem:[#allocation6 + $0x2cc] ss:$16 sps:$4 sm:$0xff]  }
 0x274   :  { %4447 = vmatprep.subr.bf16.mxu0 %v6354_v9  ;;  %v6408_v9 = vld [vmem:[#allocation6 + $0x4ac] ss:$16 sps:$4 sm:$0xff]  }
 0x277   :  { %4448 = vmatpush2.bf16.msra.mxu0 %v6352_v2  ;;  %v6403_v2 = vld [vmem:[#allocation6 + $0x2c8] ss:$16 sps:$4 sm:$0xff]  }
 0x278   :  { %4449 = vmatprep.subr.bf16.mxu0 %v6360_v10  ;;  %v6411_v10 = vld [vmem:[#allocation6 + $0x2ac] ss:$16 sps:$4 sm:$0xff]  }
 0x27b   :  { %4450 = vmatpush2.bf16.msra.mxu0 %v6358_v14  ;;  %v6412_v14 = vld [vmem:[#allocation6 + $0x488] ss:$16 sps:$4 sm:$0xff]  }
 0x27c   :  { %4451 = vmatprep.subr.bf16.mxu0 %v6366_v17  ;;  %v6417_v17 = vld [vmem:[#allocation6 + $0x28c] ss:$16 sps:$4 sm:$0xff]  }
 0x27f   :  { %4452 = vmatpush2.bf16.msra.mxu0 %v6364_v57  ;;  %v6415_v57 = vld [vmem:[#allocation6 + $0x288] ss:$16 sps:$4 sm:$0xff]  }
 0x280   :  { %4453 = vmatprep.subr.bf16.mxu0 %v6372_v19  ;;  %v6423_v19 = vld [vmem:[#allocation6 + $0x26c] ss:$16 sps:$4 sm:$0xff]  }
 0x283   :  { %4454 = vmatpush2.bf16.msra.mxu0 %v6370_v25  ;;  %v6429_v25 = vld [vmem:[#allocation6 + $0x24c] ss:$16 sps:$4 sm:$0xff]  }
 0x284   :  { %v2623_v29 = vpop.f32.mrf.mxu0  ;;  %4455 = vmatprep.subr.bf16.mxu0 %v6378_v61  ;;  %v6432_v61 = vld [vmem:[#allocation6 + $0x42c] ss:$16 sps:$4 sm:$0xff]  }
 0x285   :  { %v2666_v34 = vpop.f32.mrf.mxu1  ;;  %v2624_v20 = vadd.f32 %v2623_v29, %v2581_v50  ;;  %v6433_v29 = vld [vmem:[#allocation6 + $0x228] ss:$16 sps:$4 sm:$0xff]  }
 0x286   :  { %v2625_v12 = vpop.f32.mrf.mxu0  ;;  %v6442_v50 = vld [vmem:[#allocation6 + $0x5e8] ss:$16 sps:$4 sm:$0xff]  }
 0x287   :  { %v2626_v38 = vadd.f32 %v2625_v12, %v2583_v33  ;;  %v2668_v8 = vpop.f32.mrf.mxu1  ;;  %4456 = vmatpush2.bf16.msra.mxu0 %v6376_v28  ;;  %v2667_v58 = vadd.f32 %v2666_v34, %v2624_v20  ;;  %v6438_v28 = vld [vmem:[#allocation6 + $0x40c] ss:$16 sps:$4 sm:$0xff]   ;;  %v6439_v12 = vld [vmem:[#allocation6 + $0x208] ss:$16 sps:$4 sm:$0xff]  }
 0x288   :  { %v2627_v40 = vpop.f32.mrf.mxu0  ;;  %4457 = vmatprep.subr.bf16.mxu0 %v6384_v30  ;;  %v6436_v30 = vld [vmem:[#allocation6 + $0x408] ss:$16 sps:$4 sm:$0xff]   ;;  %v6441_v33 = vld [vmem:[#allocation6 + $0x20c] ss:$16 sps:$4 sm:$0xff]  }
 0x289   :  { %v2628_v44 = vadd.f32 %v2627_v40, %v2585_v35  ;;  %v2670_v36 = vpop.f32.mrf.mxu1  ;;  %v2669_v46 = vadd.f32 %v2668_v8, %v2626_v38  ;;  %v2681_v3 = vmax.f32 %v2667_v58, 0.0  ;;  %v6444_v34 = vld [vmem:[#allocation6 + $0x5ec] ss:$16 sps:$4 sm:$0xff]   ;;  %v6445_v8 = vld [vmem:[#allocation6 + $0x3e8] ss:$16 sps:$4 sm:$0xff]  }
 0x28a   :  { %v2629_v56 = vpop.f32.mrf.mxu0  ;;  %v6447_v35 = vld [vmem:[#allocation6 + $0x3ec] ss:$16 sps:$4 sm:$0xff]   ;;  %v6454_v20 = vld [vmem:[#allocation6 + $0x5a8] ss:$16 sps:$4 sm:$0xff]  }
 0x28b   :  { %v2671_v47 = vadd.f32 %v2670_v36, %v2628_v44  ;;  %v2630_v49 = vadd.f32 %v2629_v56, %v2587_v43  ;;  %4458 = vmatpush2.bf16.msra.mxu0 %v6382_v39  ;;  %v2672_v54 = vpop.f32.mrf.mxu1  ;;  %v2682_v45 = vmax.f32 %v2669_v46, 0.0  ;;  %v6450_v38 = vld [vmem:[#allocation6 + $0x5cc] ss:$16 sps:$4 sm:$0xff]   ;;  %v6448_v39 = vld [vmem:[#allocation6 + $0x5c8] ss:$16 sps:$4 sm:$0xff]  }
 0x28c   :  { %4459 = vmatprep.subr.bf16.mxu0 %v6390_v42  ;;  %v6453_v40 = vld [vmem:[#allocation6 + $0x3cc] ss:$16 sps:$4 sm:$0xff]   ;;  %v6451_v43 = vld [vmem:[#allocation6 + $0x3c8] ss:$16 sps:$4 sm:$0xff]  }
 0x28d   :  { %v2673_v60 = vadd.f32 %v2672_v54, %v2630_v49  ;;  %v2689_v59 = vmax.f32 %v2671_v47, 0.0  ;;  %v6456_v42 = vld [vmem:[#allocation6 + $0x5ac] ss:$16 sps:$4 sm:$0xff]   ;;  %v6457_v56 = vld [vmem:[#allocation6 + $0x3a8] ss:$16 sps:$4 sm:$0xff]  }
 0x28e   :  { %v6459_v44 = vld [vmem:[#allocation6 + $0x3ac] ss:$16 sps:$4 sm:$0xff]   ;;  %v6460_v46 = vld [vmem:[#allocation6 + $0x588] ss:$16 sps:$4 sm:$0xff]  }
 0x28f   :  { %v2690_v63 = vmax.f32 %v2673_v60, 0.0  ;;  %4460 = vmatpush2.bf16.msra.mxu0 %v6388_v52  ;;  %v7145_v15 = vpack.c.bf16 %v2689_v59, %v2681_v3  ;;  %v6462_v36 = vld [vmem:[#allocation6 + $0x58c] ss:$16 sps:$4 sm:$0xff]   ;;  %v6463_v52 = vld [vmem:[#allocation6 + $0x388] ss:$16 sps:$4 sm:$0xff]  }
 0x290   :  { %4515 = vmatprep.subr.bf16.mxu0 %v6396_v55  ;;  %v6465_v47 = vld [vmem:[#allocation6 + $0x38c] ss:$16 sps:$4 sm:$0xff]   ;;  %v6466_v54 = vld [vmem:[#allocation6 + $0x568] ss:$16 sps:$4 sm:$0xff]  }
 0x291   :  { %v7142_v26 = vpack.c.bf16 %v2690_v63, %v2682_v45  ;;  %v6468_v49 = vld [vmem:[#allocation6 + $0x56c] ss:$16 sps:$4 sm:$0xff]   ;;  %v6469_v60 = vld [vmem:[#allocation6 + $0x368] ss:$16 sps:$4 sm:$0xff]  }
 0x292   :  { %4462 = vmatmul.mubr.bf16.vlgmr.msra.gmra.mxu0 %v7082_v32  ;;  %v6406_v32 = vld [vmem:[#allocation6 + $0x4a8] ss:$16 sps:$4 sm:$0xff]   ;;  %v6471_v55 = vld [vmem:[#allocation6 + $0x36c] ss:$16 sps:$4 sm:$0xff]  }
 0x293   :  { %4516 = vmatpush1.bf16.msra.mxu0 %v6394_v0  ;;  %4547 = vmatprep.mubr.bf16.mxu0 %v7131_v48  ;;  %v6409_v48 = vld [vmem:[#allocation6 + $0x2a8] ss:$16 sps:$4 sm:$0xff]   ;;  %v6474_v58 = vld [vmem:[#allocation6 + $0x54c] ss:$16 sps:$4 sm:$0xff]  }
 0x294   :  { %4418 = vmatprep.mubr.bf16.mxu1 %v7142_v26  ;;  %4517 = vmatprep.subr.bf16.mxu0 %v6402_v1  ;;  %v6472_v45 = vld [vmem:[#allocation6 + $0x548] ss:$16 sps:$4 sm:$0xff]   ;;  %v6477_v59 = vld [vmem:[#allocation6 + $0x34c] ss:$16 sps:$4 sm:$0xff]  }
 0x295   :  { %4419 = vmatmul.mubr.bf16.vlgmr.msra.gmra.mxu1 %v7145_v15  ;;  %v6480_v63 = vld [vmem:[#allocation6 + $0x52c] ss:$16 sps:$4 sm:$0xff]   ;;  %v6475_v0 = vld [vmem:[#allocation6 + $0x348] ss:$16 sps:$4 sm:$0xff]  }
 0x296   :  { %4473 = vmatpush1.bf16.msra.mxu1 %v6397_v4  ;;  %4504 = vmatprep.mubr.bf16.mxu1 %v7114_v37  ;;  %v6418_v37 = vld [vmem:[#allocation6 + $0x468] ss:$16 sps:$4 sm:$0xff]   ;;  %v6483_v3 = vld [vmem:[#allocation6 + $0x32c] ss:$16 sps:$4 sm:$0xff]  }
 0x297   :  { %4518 = vmatpush1.bf16.msra.mxu0 %v6400_v6  ;;  %4474 = vmatprep.subr.bf16.mxu1 %v6405_v7  ;;  %v6478_v1 = vld [vmem:[#allocation6 + $0x528] ss:$16 sps:$4 sm:$0xff]   ;;  %v6486_v4 = vld [vmem:[#allocation6 + $0x50c] ss:$16 sps:$4 sm:$0xff]  }
 0x298   :  { %4519 = vmatprep.subr.bf16.mxu0 %v6408_v9  ;;  %v6481_v6 = vld [vmem:[#allocation6 + $0x328] ss:$16 sps:$4 sm:$0xff]   ;;  %v6489_v9 = vld [vmem:[#allocation6 + $0x30c] ss:$16 sps:$4 sm:$0xff]  }
 0x299   :  { %v6484_v7 = vld [vmem:[#allocation6 + $0x508] ss:$16 sps:$4 sm:$0xff]  }
 0x29a   :  { %4475 = vmatpush1.bf16.msra.mxu1 %v6403_v2  ;;  %v6540_v2 = vld [vmem:[#allocation9 + $0x74] ss:$8 sps:$4 sm:$0xff]  }
 0x29b   :  { %4520 = vmatpush1.bf16.msra.mxu0 %v6406_v32  ;;  %4476 = vmatprep.subr.bf16.mxu1 %v6411_v10  ;;  %v6487_v32 = vld [vmem:[#allocation6 + $0x308] ss:$16 sps:$4 sm:$0xff]   ;;  %v6492_v10 = vld [vmem:[#allocation6 + $0x6ec] ss:$16 sps:$4 sm:$0xff]  }
 0x29c   :  { %4521 = vmatprep.subr.bf16.mxu0 %v6414_v11  ;;  %v6538_v11 = vld [vmem:[#allocation9 + $0x70] ss:$8 sps:$4 sm:$0xff]  }
 0x29e   :  { %4477 = vmatpush1.bf16.msra.mxu1 %v6409_v48  ;;  %v6543_v48 = vld [vmem:[#allocation9 + $0x64] ss:$8 sps:$4 sm:$0xff]  }
 0x29f   :  { %4522 = vmatpush1.bf16.msra.mxu0 %v6412_v14  ;;  %4478 = vmatprep.subr.bf16.mxu1 %v6417_v17  ;;  %v6490_v14 = vld [vmem:[#allocation6 + $0x6e8] ss:$16 sps:$4 sm:$0xff]   ;;  %v6495_v17 = vld [vmem:[#allocation6 + $0x6cc] ss:$16 sps:$4 sm:$0xff]  }
 0x2a0   :  { %4523 = vmatprep.subr.bf16.mxu0 %v6420_v18  ;;  %v6541_v18 = vld [vmem:[#allocation9 + $0x60] ss:$8 sps:$4 sm:$0xff]  }
 0x2a2   :  { %4479 = vmatpush1.bf16.msra.mxu1 %v6415_v57  ;;  %v6546_v57 = vld [vmem:[#allocation9 + $0x54] ss:$8 sps:$4 sm:$0xff]  }
 0x2a3   :  { %4524 = vmatpush1.bf16.msra.mxu0 %v6418_v37  ;;  %4480 = vmatprep.subr.bf16.mxu1 %v6423_v19  ;;  %v6493_v37 = vld [vmem:[#allocation6 + $0x6c8] ss:$16 sps:$4 sm:$0xff]   ;;  %v6498_v19 = vld [vmem:[#allocation6 + $0x6ac] ss:$16 sps:$4 sm:$0xff]  }
 0x2a4   :  { %4525 = vmatprep.subr.bf16.mxu0 %v6426_v21  ;;  %v6544_v21 = vld [vmem:[#allocation9 + $0x50] ss:$8 sps:$4 sm:$0xff]  }
 0x2a6   :  { %4481 = vmatpush1.bf16.msra.mxu1 %v6421_v22  ;;  %v6549_v22 = vld [vmem:[#allocation9 + $0x44] ss:$8 sps:$4 sm:$0xff]  }
 0x2a7   :  { %4526 = vmatpush1.bf16.msra.mxu0 %v6424_v24  ;;  %4482 = vmatprep.subr.bf16.mxu1 %v6429_v25  ;;  %v6501_v24 = vld [vmem:[#allocation6 + $0x68c] ss:$16 sps:$4 sm:$0xff]  }
 0x2a8   :  { %4527 = vmatprep.subr.bf16.mxu0 %v6432_v61  ;;  %v6547_v25 = vld [vmem:[#allocation9 + $0x40] ss:$8 sps:$4 sm:$0xff]   ;;  %v6552_v61 = vld [vmem:[#allocation9 + $0x34] ss:$8 sps:$4 sm:$0xff]  }
 0x2aa   :  { %4483 = vmatpush1.bf16.msra.mxu1 %v6427_v62  ;;  %v6504_v62 = vld [vmem:[#allocation6 + $0x66c] ss:$16 sps:$4 sm:$0xff]  }
 0x2ab   :  { %4528 = vmatpush1.bf16.msra.mxu0 %v6430_v41  ;;  %4484 = vmatprep.subr.bf16.mxu1 %v6435_v16  ;;  %v6555_v41 = vld [vmem:[#allocation9 + $0x24] ss:$8 sps:$4 sm:$0xff]  }
 0x2ac   :  { %4529 = vmatprep.subr.bf16.mxu0 %v6438_v28  ;;  %v6502_v16 = vld [vmem:[#allocation6 + $0x668] ss:$16 sps:$4 sm:$0xff]   ;;  %v6507_v28 = vld [vmem:[#allocation6 + $0x64c] ss:$16 sps:$4 sm:$0xff]  }
 0x2ae   :  { %4485 = vmatpush1.bf16.msra.mxu1 %v6433_v29  ;;  %v6553_v29 = vld [vmem:[#allocation9 + $0x20] ss:$8 sps:$4 sm:$0xff]  }
 0x2af   :  { %4530 = vmatpush1.bf16.msra.mxu0 %v6436_v30  ;;  %4486 = vmatprep.subr.bf16.mxu1 %v6441_v33  ;;  %v6558_v30 = vld [vmem:[#allocation9 + $0x14] ss:$8 sps:$4 sm:$0xff]  }
 0x2b0   :  { %4531 = vmatprep.subr.bf16.mxu0 %v6444_v34  ;;  %v6505_v33 = vld [vmem:[#allocation6 + $0x648] ss:$16 sps:$4 sm:$0xff]   ;;  %v6510_v34 = vld [vmem:[#allocation6 + $0x62c] ss:$16 sps:$4 sm:$0xff]  }
 0x2b2   :  { %4487 = vmatpush1.bf16.msra.mxu1 %v6439_v12  ;;  %v6556_v12 = vld [vmem:[#allocation9 + $0x10] ss:$8 sps:$4 sm:$0xff]  }
 0x2b3   :  { %4532 = vmatpush2.bf16.msra.mxu0 %v6442_v50  ;;  %4488 = vmatprep.subr.bf16.mxu1 %v6447_v35  ;;  %v6561_v50 = vld [vmem:[#allocation9 + $0x4] ss:$8 sps:$4 sm:$0xff]  }
 0x2b4   :  { %4533 = vmatprep.subr.bf16.mxu0 %v6450_v38  ;;  %v6508_v35 = vld [vmem:[#allocation6 + $0x628] ss:$16 sps:$4 sm:$0xff]   ;;  %v6513_v38 = vld [vmem:[#allocation6 + $0x60c] ss:$16 sps:$4 sm:$0xff]  }
 0x2b6   :  { %4489 = vmatpush2.bf16.msra.mxu1 %v6445_v8  ;;  %v6559_v8 = vld [vmem:[#allocation9] ss:$8 sps:$4 sm:$0xff]  }
 0x2b7   :  { %4534 = vmatpush2.bf16.msra.mxu0 %v6448_v39  ;;  %4490 = vmatprep.subr.bf16.mxu1 %v6453_v40  ;;  %v6564_v39 = vld [vmem:[#allocation9 + $0xf4] ss:$8 sps:$4 sm:$0xff]  }
 0x2b8   :  { %4535 = vmatprep.subr.bf16.mxu0 %v6456_v42  ;;  %v6511_v40 = vld [vmem:[#allocation6 + $0x608] ss:$16 sps:$4 sm:$0xff]   ;;  %v6516_v42 = vld [vmem:[#allocation6 + $0x7ec] ss:$16 sps:$4 sm:$0xff]  }
 0x2ba   :  { %4491 = vmatpush2.bf16.msra.mxu1 %v6451_v43  ;;  %v6562_v43 = vld [vmem:[#allocation9 + $0xf0] ss:$8 sps:$4 sm:$0xff]  }
 0x2bb   :  { %4536 = vmatpush2.bf16.msra.mxu0 %v6454_v20  ;;  %4492 = vmatprep.subr.bf16.mxu1 %v6459_v44  ;;  %v6567_v20 = vld [vmem:[#allocation9 + $0xe4] ss:$8 sps:$4 sm:$0xff]  }
 0x2bc   :  { %4537 = vmatprep.subr.bf16.mxu0 %v6462_v36  ;;  %v6514_v44 = vld [vmem:[#allocation6 + $0x7e8] ss:$16 sps:$4 sm:$0xff]   ;;  %v6519_v36 = vld [vmem:[#allocation6 + $0x7cc] ss:$16 sps:$4 sm:$0xff]  }
 0x2be   :  { %4493 = vmatpush2.bf16.msra.mxu1 %v6457_v56  ;;  %v6565_v56 = vld [vmem:[#allocation9 + $0xe0] ss:$8 sps:$4 sm:$0xff]  }
 0x2bf   :  { %4538 = vmatpush2.bf16.msra.mxu0 %v6460_v46  ;;  %4494 = vmatprep.subr.bf16.mxu1 %v6465_v47  ;;  %v6570_v46 = vld [vmem:[#allocation9 + $0xd4] ss:$8 sps:$4 sm:$0xff]  }
 0x2c0   :  { %4539 = vmatprep.subr.bf16.mxu0 %v6468_v49  ;;  %v6517_v47 = vld [vmem:[#allocation6 + $0x7c8] ss:$16 sps:$4 sm:$0xff]   ;;  %v6522_v49 = vld [vmem:[#allocation6 + $0x7ac] ss:$16 sps:$4 sm:$0xff]  }
 0x2c2   :  { %4495 = vmatpush2.bf16.msra.mxu1 %v6463_v52  ;;  %v6568_v52 = vld [vmem:[#allocation9 + $0xd0] ss:$8 sps:$4 sm:$0xff]  }
 0x2c3   :  { %4540 = vmatpush2.bf16.msra.mxu0 %v6466_v54  ;;  %4496 = vmatprep.subr.bf16.mxu1 %v6471_v55  ;;  %v6573_v54 = vld [vmem:[#allocation9 + $0xc4] ss:$8 sps:$4 sm:$0xff]  }
 0x2c4   :  { %4541 = vmatprep.subr.bf16.mxu0 %v6474_v58  ;;  %v6520_v55 = vld [vmem:[#allocation6 + $0x7a8] ss:$16 sps:$4 sm:$0xff]   ;;  %v6525_v58 = vld [vmem:[#allocation6 + $0x78c] ss:$16 sps:$4 sm:$0xff]  }
 0x2c6   :  { %4497 = vmatpush2.bf16.msra.mxu1 %v6469_v60  ;;  %v6571_v60 = vld [vmem:[#allocation9 + $0xc0] ss:$8 sps:$4 sm:$0xff]  }
 0x2c7   :  { %4542 = vmatpush2.bf16.msra.mxu0 %v6472_v45  ;;  %4498 = vmatprep.subr.bf16.mxu1 %v6477_v59  ;;  %v6576_v45 = vld [vmem:[#allocation9 + $0xb4] ss:$8 sps:$4 sm:$0xff]  }
 0x2c8   :  { %4543 = vmatprep.subr.bf16.mxu0 %v6480_v63  ;;  %v6523_v59 = vld [vmem:[#allocation6 + $0x788] ss:$16 sps:$4 sm:$0xff]   ;;  %v6528_v63 = vld [vmem:[#allocation6 + $0x76c] ss:$16 sps:$4 sm:$0xff]  }
 0x2ca   :  { %4499 = vmatpush2.bf16.msra.mxu1 %v6475_v0  ;;  %v6574_v0 = vld [vmem:[#allocation9 + $0xb0] ss:$8 sps:$4 sm:$0xff]  }
 0x2cb   :  { %4544 = vmatpush2.bf16.msra.mxu0 %v6478_v1  ;;  %4500 = vmatprep.subr.bf16.mxu1 %v6483_v3  ;;  %v6579_v1 = vld [vmem:[#allocation9 + $0xa4] ss:$8 sps:$4 sm:$0xff]  }
 0x2cc   :  { %4545 = vmatprep.subr.bf16.mxu0 %v6486_v4  ;;  %v6526_v3 = vld [vmem:[#allocation6 + $0x768] ss:$16 sps:$4 sm:$0xff]   ;;  %v6531_v4 = vld [vmem:[#allocation6 + $0x74c] ss:$16 sps:$4 sm:$0xff]  }
 0x2ce   :  { %4501 = vmatpush2.bf16.msra.mxu1 %v6481_v6  ;;  %v6577_v6 = vld [vmem:[#allocation9 + $0xa0] ss:$8 sps:$4 sm:$0xff]  }
 0x2cf   :  { %4546 = vmatpush2.bf16.msra.mxu0 %v6484_v7  ;;  %4502 = vmatprep.subr.bf16.mxu1 %v6489_v9  ;;  %v6582_v7 = vld [vmem:[#allocation9 + $0x94] ss:$8 sps:$4 sm:$0xff]  }
 0x2d0   :  { %5009 = vmatprep.subr.bf16.mxu0 %v6540_v2  ;;  %v6529_v9 = vld [vmem:[#allocation6 + $0x748] ss:$16 sps:$4 sm:$0xff]   ;;  %v6534_v2 = vld [vmem:[#allocation6 + $0x72c] ss:$16 sps:$4 sm:$0xff]  }
 0x2d2   :  { %4503 = vmatpush2.bf16.msra.mxu1 %v6487_v32  ;;  %4548 = vmatmul.mubr.bf16.vlgmr.msra.gmra.mxu0 %v7133_v51  ;;  %v6496_v51 = vld [vmem:[#allocation6 + $0x6a8] ss:$16 sps:$4 sm:$0xff]   ;;  %v6580_v32 = vld [vmem:[#allocation9 + $0x90] ss:$8 sps:$4 sm:$0xff]  }
 0x2d3   :  { %4558 = vmatprep.subr.bf16.mxu1 %v6492_v10  ;;  %5010 = vmatpush1.bf16.msra.mxu0 %v6538_v11  ;;  %v6585_v10 = vld [vmem:[#allocation9 + $0x84] ss:$8 sps:$4 sm:$0xff]  }
 0x2d4   :  { %5011 = vmatprep.subr.bf16.mxu0 %v6543_v48  ;;  %v6532_v11 = vld [vmem:[#allocation6 + $0x728] ss:$16 sps:$4 sm:$0xff]   ;;  %v6537_v48 = vld [vmem:[#allocation6 + $0x70c] ss:$16 sps:$4 sm:$0xff]  }
 0x2d5   :  { %4505 = vmatmul.mubr.bf16.vlgmr.msra.gmra.mxu1 %v7121_v5  ;;  %v6499_v5 = vld [vmem:[#allocation6 + $0x688] ss:$16 sps:$4 sm:$0xff]  }
 0x2d6   :  { %4559 = vmatpush1.bf16.msra.mxu1 %v6490_v14  ;;  %4590 = vmatprep.mubr.bf16.mxu1 %v7142_v26  ;;  %v6550_v26 = vld [vmem:[#allocation9 + $0x30] ss:$8 sps:$4 sm:$0xff]   ;;  %v6583_v14 = vld [vmem:[#allocation9 + $0x80] ss:$8 sps:$4 sm:$0xff]  }
 0x2d7   :  { %4560 = vmatprep.subr.bf16.mxu1 %v6495_v17  ;;  %5012 = vmatpush1.bf16.msra.mxu0 %v6541_v18  ;;  %v6535_v17 = vld [vmem:[#allocation6 + $0x708] ss:$16 sps:$4 sm:$0xff]   ;;  %v6586_v18 = vld [vmem:[#allocation9 + $0x170] ss:$8 sps:$4 sm:$0xff]  }
 0x2d8   :  { %5013 = vmatprep.subr.bf16.mxu0 %v6546_v57  ;;  %v6588_v57 = vld [vmem:[#allocation9 + $0x174] ss:$8 sps:$4 sm:$0xff]  }
 0x2da   :  { %4561 = vmatpush1.bf16.msra.mxu1 %v6493_v37  ;;  %v6591_v37 = vld [vmem:[#allocation9 + $0x164] ss:$8 sps:$4 sm:$0xff]  }
 0x2db   :  { %4562 = vmatprep.subr.bf16.mxu1 %v6498_v19  ;;  %5014 = vmatpush1.bf16.msra.mxu0 %v6544_v21  ;;  %v6589_v19 = vld [vmem:[#allocation9 + $0x160] ss:$8 sps:$4 sm:$0xff]   ;;  %v6594_v21 = vld [vmem:[#allocation9 + $0x154] ss:$8 sps:$4 sm:$0xff]  }
 0x2dc   :  { %5015 = vmatprep.subr.bf16.mxu0 %v6549_v22  ;;  %v6592_v22 = vld [vmem:[#allocation9 + $0x150] ss:$8 sps:$4 sm:$0xff]  }
 0x2de   :  { %4563 = vmatpush1.bf16.msra.mxu1 %v6496_v51  ;;  %v6597_v51 = vld [vmem:[#allocation9 + $0x144] ss:$8 sps:$4 sm:$0xff]  }
 0x2df   :  { %4564 = vmatprep.subr.bf16.mxu1 %v6501_v24  ;;  %5016 = vmatpush1.bf16.msra.mxu0 %v6547_v25  ;;  %v6595_v24 = vld [vmem:[#allocation9 + $0x140] ss:$8 sps:$4 sm:$0xff]   ;;  %v6600_v25 = vld [vmem:[#allocation9 + $0x134] ss:$8 sps:$4 sm:$0xff]  }
 0x2e0   :  { %5017 = vmatprep.subr.bf16.mxu0 %v6552_v61  ;;  %v6598_v61 = vld [vmem:[#allocation9 + $0x130] ss:$8 sps:$4 sm:$0xff]  }
 0x2e2   :  { %4565 = vmatpush1.bf16.msra.mxu1 %v6499_v5  ;;  %v6601_v5 = vld [vmem:[#allocation9 + $0x120] ss:$8 sps:$4 sm:$0xff]  }
 0x2e3   :  { %4566 = vmatprep.subr.bf16.mxu1 %v6504_v62  ;;  %5018 = vmatpush1.bf16.msra.mxu0 %v6550_v26  ;;  %v6606_v62 = vld [vmem:[#allocation9 + $0x114] ss:$8 sps:$4 sm:$0xff]   ;;  %v6604_v26 = vld [vmem:[#allocation9 + $0x110] ss:$8 sps:$4 sm:$0xff]  }
 0x2e4   :  { %5019 = vmatprep.subr.bf16.mxu0 %v6555_v41  ;;  %v6609_v41 = vld [vmem:[#allocation9 + $0x104] ss:$8 sps:$4 sm:$0xff]  }
 0x2e6   :  { %4567 = vmatpush1.bf16.msra.mxu1 %v6502_v16  ;;  %v6607_v16 = vld [vmem:[#allocation9 + $0x100] ss:$8 sps:$4 sm:$0xff]  }
 0x2e7   :  { %4568 = vmatprep.subr.bf16.mxu1 %v6507_v28  ;;  %5020 = vmatpush1.bf16.msra.mxu0 %v6553_v29  ;;  %v6612_v28 = vld [vmem:[#allocation9 + $0x1f4] ss:$8 sps:$4 sm:$0xff]   ;;  %v6610_v29 = vld [vmem:[#allocation9 + $0x1f0] ss:$8 sps:$4 sm:$0xff]  }
 0x2e8   :  { %5021 = vmatprep.subr.bf16.mxu0 %v6558_v30  ;;  %v6615_v30 = vld [vmem:[#allocation9 + $0x1e4] ss:$8 sps:$4 sm:$0xff]  }
 0x2ea   :  { %4569 = vmatpush1.bf16.msra.mxu1 %v6505_v33  ;;  %v4291_v33 = vpop.f32.mrf.mxu0 }
 0x2eb   :  { %4570 = vmatprep.subr.bf16.mxu1 %v6510_v34  ;;  %5022 = vmatpush1.bf16.msra.mxu0 %v6556_v12  ;;  %v6613_v34 = vld [vmem:[#allocation9 + $0x1e0] ss:$8 sps:$4 sm:$0xff]   ;;  %v6618_v12 = vld [vmem:[#allocation9 + $0x1d4] ss:$8 sps:$4 sm:$0xff]  }
 0x2ec   :  { %5023 = vmatprep.subr.bf16.mxu0 %v6561_v50  ;;  %v4293_v50 = vpop.f32.mrf.mxu0 }
 0x2ee   :  { %4571 = vmatpush1.bf16.msra.mxu1 %v6508_v35  ;;  %v6616_v35 = vld [vmem:[#allocation9 + $0x1d0] ss:$8 sps:$4 sm:$0xff]  }
 0x2ef   :  { %4572 = vmatprep.subr.bf16.mxu1 %v6513_v38  ;;  %5024 = vmatpush1.bf16.msra.mxu0 %v6559_v8  ;;  %v6621_v38 = vld [vmem:[#allocation9 + $0x1c4] ss:$8 sps:$4 sm:$0xff]   ;;  %v4295_v8 = vpop.f32.mrf.mxu0 }
 0x2f0   :  { %5025 = vmatprep.subr.bf16.mxu0 %v6564_v39  ;;  %v4334_v39 = vpop.f32.mrf.mxu1 }
 0x2f2   :  { %4573 = vmatpush1.bf16.msra.mxu1 %v6511_v40  ;;  %v6619_v40 = vld [vmem:[#allocation9 + $0x1c0] ss:$8 sps:$4 sm:$0xff]  }
 0x2f3   :  { %4574 = vmatprep.subr.bf16.mxu1 %v6516_v42  ;;  %5026 = vmatpush2.bf16.msra.mxu0 %v6562_v43  ;;  %v6624_v42 = vld [vmem:[#allocation9 + $0x1b4] ss:$8 sps:$4 sm:$0xff]   ;;  %v4297_v43 = vpop.f32.mrf.mxu0 }
 0x2f4   :  { %5027 = vmatprep.subr.bf16.mxu0 %v6567_v20  ;;  %v4336_v20 = vpop.f32.mrf.mxu1 }
 0x2f6   :  { %4575 = vmatpush2.bf16.msra.mxu1 %v6514_v44 }
 0x2f7   :  { %4576 = vmatprep.subr.bf16.mxu1 %v6519_v36  ;;  %5028 = vmatpush2.bf16.msra.mxu0 %v6565_v56  ;;  %v6622_v36 = vld [vmem:[#allocation9 + $0x1b0] ss:$8 sps:$4 sm:$0xff]   ;;  %v7155_v56 = vld [vmem:[#allocation7] sm:$0xf] }
 0x2f8   :  { %5029 = vmatprep.subr.bf16.mxu0 %v6570_v46  ;;  %v2964_v46 = vrot.slane %v7155_v56, %v7085_v13 }
 0x2fa   :  { %4577 = vmatpush2.bf16.msra.mxu1 %v6517_v47  ;;  %v2960_v47 = vrot.slane %v7155_v56, %v7053_v31 }
 0x2fb   :  { %4578 = vmatprep.subr.bf16.mxu1 %v6522_v49  ;;  %5030 = vmatpush2.bf16.msra.mxu0 %v6568_v52  ;;  %v4338_v49 = vpop.f32.mrf.mxu1 }
 0x2fc   :  { %5031 = vmatprep.subr.bf16.mxu0 %v6573_v54  ;;  %v4294_v54 = vadd.f32 %v4293_v50, %v2964_v46  ;;  %v6642_v50 = vld [vmem:[#allocation12 + $0x58] sm:$0xff]  }
 0x2fe   :  { %4579 = vmatpush2.bf16.msra.mxu1 %v6520_v55  ;;  %v4296_v55 = vadd.f32 %v4295_v8, %v2960_v47 }
 0x2ff   :  { %4580 = vmatprep.subr.bf16.mxu1 %v6525_v58  ;;  %5032 = vmatpush2.bf16.msra.mxu0 %v6571_v60  ;;  %v4292_v58 = vadd.f32 %v4291_v33, %v2960_v47  ;;  %v4340_v60 = vpop.f32.mrf.mxu1  ;;  %v6639_v33 = vld [vmem:[#allocation12 + $0x28] sm:$0xff]  }
 0x300   :  { %5033 = vmatprep.subr.bf16.mxu0 %v6576_v45 }
 0x302   :  { %4581 = vmatpush2.bf16.msra.mxu1 %v6523_v59  ;;  %v4298_v59 = vadd.f32 %v4297_v43, %v2964_v46 }
 0x303   :  { %4582 = vmatprep.subr.bf16.mxu1 %v6528_v63  ;;  %5034 = vmatpush2.bf16.msra.mxu0 %v6574_v0  ;;  %v6627_v0 = vld [vmem:[#allocation9 + $0x1a4] ss:$8 sps:$4 sm:$0xff]  }
 0x304   :  { %5035 = vmatprep.subr.bf16.mxu0 %v6579_v1  ;;  %v4337_v1 = vadd.f32 %v4336_v20, %v4294_v54 }
 0x306   :  { %4583 = vmatpush2.bf16.msra.mxu1 %v6526_v3  ;;  %v4339_v3 = vadd.f32 %v4338_v49, %v4296_v55 }
 0x307   :  { %4584 = vmatprep.subr.bf16.mxu1 %v6531_v4  ;;  %5036 = vmatpush2.bf16.msra.mxu0 %v6577_v6  ;;  %v6625_v4 = vld [vmem:[#allocation9 + $0x1a0] ss:$8 sps:$4 sm:$0xff]   ;;  %v4335_v6 = vadd.f32 %v4334_v39, %v4292_v58 }
 0x308   :  { %5037 = vmatprep.subr.bf16.mxu0 %v6582_v7 }
 0x30a   :  { %4585 = vmatpush2.bf16.msra.mxu1 %v6529_v9 }
 0x30b   :  { %4586 = vmatprep.subr.bf16.mxu1 %v6534_v2  ;;  %5038 = vmatpush2.bf16.msra.mxu0 %v6580_v32  ;;  %v4341_v2 = vadd.f32 %v4340_v60, %v4298_v59 }
 0x30c   :  { %5039 = vmatprep.subr.bf16.mxu0 %v6585_v10 }
 0x30e   :  { %4587 = vmatpush2.bf16.msra.mxu1 %v6532_v11 }
 0x30f   :  { %4588 = vmatprep.subr.bf16.mxu1 %v6537_v48  ;;  %5040 = vmatpush2.bf16.msra.mxu0 %v6583_v14  ;;  %v6630_v14 = vld [vmem:[#allocation9 + $0x194] ss:$8 sps:$4 sm:$0xff]  }
 0x312   :  { %4589 = vmatpush2.bf16.msra.mxu1 %v6535_v17  ;;  %v4377_v44 = vpop.f32.mrf.mxu0 }
 0x313   :  { %5052 = vmatprep.subr.bf16.mxu1 %v6588_v57  ;;  %v4378_v11 = vadd.f32 %v4377_v44, %v4335_v6  ;;  %v2972_v44 = vrot.slane %v7155_v56, %v507_v53 }
 0x314   :  { %v4379_v52 = vpop.f32.mrf.mxu0 }
 0x315   :  { %4591 = vmatmul.mubr.bf16.vlgmr.msra.gmra.mxu1 %v7145_v15  ;;  %v6603_v15 = vld [vmem:[#allocation9 + $0x124] ss:$8 sps:$4 sm:$0xff]   ;;  %v4380_v32 = vadd.f32 %v4379_v52, %v4337_v1 }
 0x316   :  { %5053 = vmatpush1.bf16.msra.mxu1 %v6586_v18  ;;  %v4381_v45 = vpop.f32.mrf.mxu0 }
 0x317   :  { %5054 = vmatprep.subr.bf16.mxu1 %v6591_v37  ;;  %v4382_v10 = vadd.f32 %v4381_v45, %v4339_v3  ;;  %v6628_v37 = vld [vmem:[#allocation9 + $0x190] ss:$8 sps:$4 sm:$0xff]  }
 0x318   :  { %v4383_v7 = vpop.f32.mrf.mxu0 }
 0x319   :  { %v4384_v17 = vadd.f32 %v4383_v7, %v4341_v2 }
 0x31a   :  { %5055 = vmatpush1.bf16.msra.mxu1 %v6589_v19 }
 0x31b   :  { %5056 = vmatprep.subr.bf16.mxu1 %v6594_v21 }
 0x31e   :  { %5057 = vmatpush1.bf16.msra.mxu1 %v6592_v22 }
 0x31f   :  { %5058 = vmatprep.subr.bf16.mxu1 %v6597_v51 }
 0x322   :  { %5059 = vmatpush1.bf16.msra.mxu1 %v6595_v24  ;;  %v6633_v24 = vld [vmem:[#allocation9 + $0x184] ss:$8 sps:$4 sm:$0xff]  }
 0x323   :  { %5060 = vmatprep.subr.bf16.mxu1 %v6600_v25 }
 0x326   :  { %5061 = vmatpush1.bf16.msra.mxu1 %v6598_v61 }
 0x327   :  { %5062 = vmatprep.subr.bf16.mxu1 %v6603_v15  ;;  %v6631_v15 = vld [vmem:[#allocation9 + $0x180] ss:$8 sps:$4 sm:$0xff]  }
 0x32a   :  { %5063 = vmatpush1.bf16.msra.mxu1 %v6601_v5 }
 0x32b   :  { %5064 = vmatprep.subr.bf16.mxu1 %v6606_v62 }
 0x32e   :  { %5065 = vmatpush1.bf16.msra.mxu1 %v6604_v26 }
 0x32f   :  { %5066 = vmatprep.subr.bf16.mxu1 %v6609_v41  ;;  %v6634_v41 = vld [vmem:[#allocation12 + $0x78] sm:$0xff]  }
 0x330   :  { %6075 = vmatprep.subr.bf16.mxu0 %v6634_v41 }
 0x332   :  { %5067 = vmatpush1.bf16.msra.mxu1 %v6607_v16  ;;  %v6635_v16 = vld [vmem:[#allocation12 + $0x38] sm:$0xff]  }
 0x333   :  { %5068 = vmatprep.subr.bf16.mxu1 %v6612_v28  ;;  %v6636_v28 = vld [vmem:[#allocation12 + $0x70] sm:$0xff]  }
 0x336   :  { %5069 = vmatpush2.bf16.msra.mxu1 %v6610_v29  ;;  %v6637_v29 = vld [vmem:[#allocation12 + $0x30] sm:$0xff]  }
 0x337   :  { %5070 = vmatprep.subr.bf16.mxu1 %v6615_v30  ;;  %v6638_v30 = vld [vmem:[#allocation12 + $0x68] sm:$0xff]  }
 0x33a   :  { %5071 = vmatpush2.bf16.msra.mxu1 %v6613_v34  ;;  %v6640_v34 = vld [vmem:[#allocation12 + $0x60] sm:$0xff]  }
 0x33b   :  { %5072 = vmatprep.subr.bf16.mxu1 %v6618_v12  ;;  %v6641_v12 = vld [vmem:[#allocation12 + $0x20] sm:$0xff]  }
 0x33e   :  { %5073 = vmatpush2.bf16.msra.mxu1 %v6616_v35  ;;  %v6643_v35 = vld [vmem:[#allocation12 + $0x18] sm:$0xff]  }
 0x33f   :  { %5074 = vmatprep.subr.bf16.mxu1 %v6621_v38 }
 0x342   :  { %5075 = vmatpush2.bf16.msra.mxu1 %v6619_v40 }
 0x343   :  { %5076 = vmatprep.subr.bf16.mxu1 %v6624_v42 }
 0x346   :  { %5077 = vmatpush2.bf16.msra.mxu1 %v6622_v36  ;;  %v2968_v36 = vrot.slane %v7155_v56, %v503_v27 }
 0x347   :  { %5078 = vmatprep.subr.bf16.mxu1 %v6627_v0 }
 0x34a   :  { %5079 = vmatpush2.bf16.msra.mxu1 %v6625_v4 }
 0x34b   :  { %5080 = vmatprep.subr.bf16.mxu1 %v6630_v14 }
 0x34e   :  { %5081 = vmatpush2.bf16.msra.mxu1 %v6628_v37  ;;  %v6644_v37 = vld [vmem:[#allocation12 + $0x50] sm:$0xff]  }
 0x34f   :  { %5082 = vmatprep.subr.bf16.mxu1 %v6633_v24  ;;  %v6649_v24 = vld [vmem:[#allocation12] sm:$0xff]  }
 0x352   :  { %5083 = vmatpush2.bf16.msra.mxu1 %v6631_v15  ;;  %v4463_v38 = vpop.f32.mrf.mxu0  ;;  %v6651_v15 = vld [vmem:[#allocation15 + $0x30] sm:$0xff]  }
 0x353   :  { %v4464_v54 = vadd.f32 %v4463_v38, %v2968_v36 }
 0x354   :  { %v4465_v8 = vpop.f32.mrf.mxu0 }
 0x355   :  { %v4420_v63 = vpop.f32.mrf.mxu1  ;;  %v4466_v49 = vadd.f32 %v4465_v8, %v2972_v44 }
 0x356   :  { %v4421_v19 = vadd.f32 %v4420_v63, %v4378_v11  ;;  %v4467_v39 = vpop.f32.mrf.mxu0 }
 0x357   :  { %v4422_v9 = vpop.f32.mrf.mxu1  ;;  %v4468_v52 = vadd.f32 %v4467_v39, %v2968_v36 }
 0x358   :  { %v4423_v18 = vadd.f32 %v4422_v9, %v4380_v32  ;;  %v4601_v5 = vmax.f32 %v4421_v19, 0.0  ;;  %v4469_v42 = vpop.f32.mrf.mxu0  ;;  %v6645_v19 = vld [vmem:[#allocation12 + $0x10] sm:$0xff]  }
 0x359   :  { %v4424_v48 = vpop.f32.mrf.mxu1  ;;  %v4470_v58 = vadd.f32 %v4469_v42, %v2972_v44 }
 0x35a   :  { %v4425_v57 = vadd.f32 %v4424_v48, %v4382_v10  ;;  %v4602_v25 = vmax.f32 %v4423_v18, 0.0 }
 0x35b   :  { %v4426_v21 = vpop.f32.mrf.mxu1 }
 0x35c   :  { %v4427_v22 = vadd.f32 %v4426_v21, %v4384_v17  ;;  %v4605_v51 = vmax.f32 %v4425_v57, 0.0  ;;  %v6646_v21 = vld [vmem:[#allocation12 + $0x48] sm:$0xff]  }
 0x35e   :  { %v4606_v61 = vmax.f32 %v4427_v22, 0.0  ;;  %v4609_v26 = vpack.c.bf16 %v4605_v51, %v4601_v5  ;;  %v6647_v22 = vld [vmem:[#allocation12 + $0x8] sm:$0xff]   ;;  %v6648_v51 = vld [vmem:[#allocation12 + $0x40] sm:$0xff]  }
 0x35f   :  { %v6652_v5 = vld [vmem:[#allocation15 + $0x28] sm:$0xff]  }
 0x360   :  { %v4610_v62 = vpack.c.bf16 %v4606_v61, %v4602_v25  ;;  %v6650_v25 = vld [vmem:[#allocation15 + $0x38] sm:$0xff]   ;;  %v6895_v61 = vmov 0.0  }
 0x361   :  { %6106 = vmatprep.subr.bf16.mxu1 %v6895_v61 }
 0x362   :  { %5041 = vmatprep.mubr.bf16.mxu0 %v4610_v62  ;;  %v6653_v62 = vld [vmem:[#allocation15 + $0x20] sm:$0xff]  }
 0x363   :  { %5042 = vmatmul.mubr.bf16.vlgmr.msra.gmra.mxu0 %v4609_v26 }
 0x364   :  { %6076 = vmatpush3.bf16.msra.mxu0 %v6635_v16  ;;  %v4677_v16 = vld [vmem:[#allocation10] sm:$0x3] }
 0x365   :  { %6077 = vmatprep.subr.bf16.mxu0 %v6636_v28 }
 0x368   :  { %6078 = vmatpush3.bf16.msra.mxu0 %v6637_v29  ;;  %v4686_v29 = vrot.slane %v4677_v16, %v7085_v13 }
 0x369   :  { %6079 = vmatprep.subr.bf16.mxu0 %v6638_v30  ;;  %v4682_v30 = vrot.slane %v4677_v16, %v7053_v31  ;;  %v6654_v31 = vld [vmem:[#allocation15 + $0x18] sm:$0xff]  }
 0x36c   :  { %6080 = vmatpush3.bf16.msra.mxu0 %v6639_v33 }
 0x36d   :  { %6081 = vmatprep.subr.bf16.mxu0 %v6640_v34 }
 0x370   :  { %6082 = vmatpush3.bf16.msra.mxu0 %v6641_v12 }
 0x371   :  { %6083 = vmatprep.subr.bf16.mxu0 %v6642_v50 }
 0x374   :  { %6084 = vmatpush3.bf16.msra.mxu0 %v6643_v35 }
 0x375   :  { %6085 = vmatprep.subr.bf16.mxu0 %v6644_v37 }
 0x378   :  { %6086 = vmatpush3.bf16.msra.mxu0 %v6645_v19 }
 0x379   :  { %6087 = vmatprep.subr.bf16.mxu0 %v6646_v21 }
 0x37c   :  { %6088 = vmatpush3.bf16.msra.mxu0 %v6647_v22 }
 0x37d   :  { %6089 = vmatprep.subr.bf16.mxu0 %v6648_v51 }
 0x380   :  { %6090 = vmatpush3.bf16.msra.mxu0 %v6649_v24 }
 0x392   :  { %v4549_v20 = vpop.f32.mrf.mxu0 }
 0x394   :  { %v4551_v47 = vpop.f32.mrf.mxu0 }
 0x395   :  { %v4506_v40 = vpop.f32.mrf.mxu1 }
 0x396   :  { %v4507_v59 = vadd.f32 %v4506_v40, %v4464_v54  ;;  %v4553_v63 = vpop.f32.mrf.mxu0  ;;  %v6655_v54 = vld [vmem:[#allocation15 + $0x10] sm:$0xff]  }
 0x397   :  { %v4508_v43 = vpop.f32.mrf.mxu1 }
 0x398   :  { %v4509_v60 = vadd.f32 %v4508_v43, %v4466_v49  ;;  %v4555_v6 = vpop.f32.mrf.mxu0  ;;  %v4550_v23 = vadd.f32 %v4549_v20, %v4507_v59 }
 0x399   :  { %v4510_v46 = vpop.f32.mrf.mxu1 }
 0x39a   :  { %v4511_v45 = vadd.f32 %v4510_v46, %v4468_v52  ;;  %v4552_v4 = vadd.f32 %v4551_v47, %v4509_v60 }
 0x39b   :  { %v4512_v55 = vpop.f32.mrf.mxu1 }
 0x39c   :  { %v4513_v1 = vadd.f32 %v4512_v55, %v4470_v58  ;;  %v4554_v53 = vadd.f32 %v4553_v63, %v4511_v45  ;;  %v6656_v55 = vld [vmem:[#allocation15 + $0x8] sm:$0xff]   ;;  %v6657_v58 = vld [vmem:[#allocation15] sm:$0xff]   ;;  %v6049_v63 = vld [vmem:[#allocation13] ss:$0 sm:$0xff] }
 0x39e   :  { %v4556_v9 = vadd.f32 %v4555_v6, %v4513_v1 }
 0x3d5   :  { %v4592_v0 = vpop.f32.mrf.mxu1 }
 0x3d6   :  { %v4593_v2 = vadd.f32 %v4592_v0, %v4550_v23 }
 0x3d7   :  { %v4594_v3 = vpop.f32.mrf.mxu1 }
 0x3d8   :  { %v4595_v27 = vadd.f32 %v4594_v3, %v4552_v4  ;;  %v4603_v17 = vmax.f32 %v4593_v2, 0.0 }
 0x3d9   :  { %v4596_v7 = vpop.f32.mrf.mxu1 }
 0x3da   :  { %v4597_v56 = vadd.f32 %v4596_v7, %v4554_v53  ;;  %v4604_v48 = vmax.f32 %v4595_v27, 0.0  ;;  %v6066_v27 = vld [vmem:[#allocation16] ss:$0 sm:$0xff] }
 0x3db   :  { %v4598_v32 = vpop.f32.mrf.mxu1 }
 0x3dc   :  { %v4599_v10 = vadd.f32 %v4598_v32, %v4556_v9  ;;  %v4607_v11 = vmax.f32 %v4597_v56, 0.0 }
 0x3de   :  { %v4608_v14 = vmax.f32 %v4599_v10, 0.0  ;;  %v4611_v57 = vpack.c.bf16 %v4607_v11, %v4603_v17 }
 0x3e0   :  { %v4612_v18 = vpack.c.bf16 %v4608_v14, %v4604_v48 }
 0x3e2   :  { %5084 = vmatprep.mubr.bf16.mxu1 %v4612_v18 }
 0x3e3   :  { %5085 = vmatmul.mubr.bf16.vlgmr.msra.gmra.mxu1 %v4611_v57 }
 0x3e4   :  { %6107 = vmatpush3.bf16.msra.mxu1 %v6650_v25  ;;  %6122 = vmatprep.mubr.msk.bf16.mxu1 %vm6896_vm0, %v6895_v61 }
 0x3e5   :  { %6108 = vmatprep.subr.bf16.mxu1 %v6895_v61 }
 0x3e8   :  { %6109 = vmatpush3.bf16.msra.mxu1 %v6651_v15 }
 0x3e9   :  { %6110 = vmatprep.subr.bf16.mxu1 %v6895_v61 }
 0x3ec   :  { %6111 = vmatpush3.bf16.msra.mxu1 %v6652_v5 }
 0x3ed   :  { %6112 = vmatprep.subr.bf16.mxu1 %v6895_v61 }
 0x3f0   :  { %6113 = vmatpush3.bf16.msra.mxu1 %v6653_v62 }
 0x3f1   :  { %6114 = vmatprep.subr.bf16.mxu1 %v6895_v61 }
 0x3f4   :  { %6115 = vmatpush3.bf16.msra.mxu1 %v6654_v31 }
 0x3f5   :  { %6116 = vmatprep.subr.bf16.mxu1 %v6895_v61 }
 0x3f8   :  { %6117 = vmatpush3.bf16.msra.mxu1 %v6655_v54 }
 0x3f9   :  { %6118 = vmatprep.subr.bf16.mxu1 %v6895_v61 }
 0x3fc   :  { %6119 = vmatpush3.bf16.msra.mxu1 %v6656_v55 }
 0x3fd   :  { %6120 = vmatprep.subr.bf16.mxu1 %v6895_v61 }
 0x400   :  { %6121 = vmatpush3.bf16.msra.mxu1 %v6657_v58 }
 0x423   :  { %v5043_v26 = vpop.f32.mrf.mxu0 }
 0x424   :  { %v5044_v38 = vadd.f32 %v5043_v26, %v4682_v30 }
 0x425   :  { %v5045_v41 = vpop.f32.mrf.mxu0 }
 0x426   :  { %v5046_v50 = vadd.f32 %v5045_v41, %v4686_v29 }
 0x427   :  { %v5047_v28 = vpop.f32.mrf.mxu0 }
 0x428   :  { %v5048_v35 = vadd.f32 %v5047_v28, %v4682_v30 }
 0x429   :  { %v5049_v34 = vpop.f32.mrf.mxu0 }
 0x42a   :  { %v5050_v39 = vadd.f32 %v5049_v34, %v4686_v29 }
 0x4a3   :  { %v5086_v33 = vpop.f32.mrf.mxu1 }
 0x4a4   :  { %v5087_v43 = vadd.f32 %v5086_v33, %v5044_v38 }
 0x4a5   :  { %v5088_v12 = vpop.f32.mrf.mxu1 }
 0x4a6   :  { %v5089_v40 = vadd.f32 %v5088_v12, %v5046_v50  ;;  %v5095_v49 = vmax.f32 %v5087_v43, 0.0 }
 0x4a7   :  { %v5090_v8 = vpop.f32.mrf.mxu1 }
 0x4a8   :  { %v5091_v42 = vadd.f32 %v5090_v8, %v5048_v35  ;;  %v5096_v46 = vmax.f32 %v5089_v40, 0.0 }
 0x4a9   :  { %v5092_v20 = vpop.f32.mrf.mxu1 }
 0x4aa   :  { %v5093_v44 = vadd.f32 %v5092_v20, %v5050_v39  ;;  %v5097_v36 = vmax.f32 %v5091_v42, 0.0 }
 0x4ac   :  { %v5098_v47 = vmax.f32 %v5093_v44, 0.0  ;;  %v5099_v52 = vpack.c.bf16 %v5097_v36, %v5095_v49 }
 0x4ae   :  { %v5100_v13 = vpack.c.bf16 %v5098_v47, %v5096_v46 }
 0x4b0   :  { %5268 = vmatprep.mubr.bf16.mxu0 %v5100_v13 }
 0x4b1   :  { %5269 = vmatmul.mubr.bf16.vlgmr.msra.gmra.mxu0 %v5099_v52 }
 0x571   :  { %v6091_v60 = vpop.f32.mrf.mxu0 }
 0x573   :  { %v6092_v45 = vpop.f32.mrf.mxu0 }
 0x574   :  { %v6093_v59 = vadd.f32 %v6092_v45, %v6091_v60 }
 0x575   :  { %v6094_v0 = vpop.f32.mrf.mxu0 }
 0x576   :  { %v5271_v3 = vadd.f32 %v6093_v59, %v6049_v63 }
 0x577   :  { %v6095_v1 = vpop.f32.mrf.mxu0 }
 0x578   :  { %v6096_v4 = vadd.f32 %v6095_v1, %v6094_v0  ;;  %v5277_v6 = vmax.f32 %v5271_v3, 0.0 }
 0x57a   :  { %v5274_v53 = vadd.f32 %v6096_v4, %v6049_v63 }
 0x57c   :  { %v5278_v23 = vmax.f32 %v5274_v53, 0.0 }
 0x57e   :  { %v5279_v7 = vpack.c.bf16 %v5278_v23, %v5277_v6 }
 0x580   :  { %6123 = vmatmul.mubr.bf16.vlgmr.msra.gmra.mxu1 %v5279_v7 }
 0x640   :  { %v5385_v56 = vpop.f32.mrf.mxu1 }
 0x641   :  { %v5386_v9 = vadd.f32 %v6066_v27, %v5385_v56 }
 0x642   :  { %v6124_v2 = vpop.f32.mrf.mxu1 }
 0x643   :  { %5392 = vst [vmem:[%s7186_s11] sm:$0xff] %v5386_v9 }
 0x644   :  { %v5388_v32 = vpop.f32.mrf.mxu1 }
 0x645   :  { %v5389_v10 = vadd.f32 %v6066_v27, %v5388_v32 }
 0x646   :  { %v6125_v11 = vpop.f32.mrf.mxu1 }
 0x647   :  { %5393 = vst [vmem:[%s7186_s11 + $0x8] sm:$0xff] %v5389_v10 }
 0x648   :  { %5398 = vsyncpa [#allocation3], 1 }
 0x649   :  { %5399 = vsyncpa [#allocation5], 1 }
 0x64a   :  { %5400 = vsyncpa [#allocation8], 1 }
 0x64b   :  { %5401 = vsyncpa [#allocation11], 1 }
 0x64c   :  { %5402 = vsyncpa [#allocation14], 1 }
 0x64d   :  { %5403 = vsyncpa [#allocation17], 1 }

</bundles_post_ra>
